<compile_context>
chip_gen: v7x
topology: tpu7x:2x2x1
jax: 0.10.0
libtpu: 0.0.40
codegen_flags: <defaults>
</compile_context>

<pallas_src>
import functools

import jax
import jax.numpy as jnp
import numpy as np
from jax.experimental import pallas as pl
from jax.experimental.pallas import tpu as pltpu

EPS = 1e-5


# ---------------------------------------------------------------------------
# Fused kernel: num_convs x (3x3 conv + bias/BN shift + LeakyReLU) for one
# batch element, intermediates kept in a padded VMEM scratch.
# ---------------------------------------------------------------------------
def _stacked_kernel(*refs, num_convs, cin, cout, h, w):
    # refs = (x_ref, w_0, shift_0, ..., w_{B-1}, shift_{B-1}, o_ref, xp_ref)
    x_ref = refs[0]
    o_ref = refs[1 + 2 * num_convs]
    xp_ref = refs[2 + 2 * num_convs]          # (Cmax, H+2, W+2) bf16 padded scratch

    hw = h * w

    # In-kernel padding=1: zero the halo once, place the block-0 input interior.
    xp_ref[...] = jnp.zeros_like(xp_ref)
    xp_ref[0:cin, 1:h + 1, 1:w + 1] = x_ref[0]

    c_in = cin
    for b in range(num_convs):                # static unroll over blocks
        w_ref = refs[1 + 2 * b]               # (Cout, 9*c_in)   bf16, BN-scale folded
        t_ref = refs[2 + 2 * b]               # (Cout, 1)        f32 fused shift

        # im2col RHS: (9*c_in, H*W), taps ordered (dy, dx, ci) to match w_ref.
        taps = []
        for dy in range(3):
            for dx in range(3):
                taps.append(
                    xp_ref[0:c_in, dy:dy + h, dx:dx + w].reshape(c_in, hw))
        patches = jnp.concatenate(taps, axis=0)

        # Single MXU matmul per block, f32 accumulation, lane-dense (Cout, H*W).
        acc = jnp.dot(w_ref[...], patches, preferred_element_type=jnp.float32)

        y = acc + t_ref[...]                                  # bias + BN (eval) shift
        y = jnp.where(y > 0, y, jnp.float32(0.01) * y)        # LeakyReLU(0.01)

        if b + 1 < num_convs:
            # Next block's padded input: interior overwrite, halo stays zero.
            xp_ref[0:cout, 1:h + 1, 1:w + 1] = (
                y.reshape(cout, h, w).astype(xp_ref.dtype))
            c_in = cout
        else:
            o_ref[0] = y                                      # (Cout, H*W) f32, lane-dense


def stacked_conv_layers(x_nchw, params_list):
    """StackedConvLayers.forward (eval mode): NCHW in -> NCHW out, one pallas_call."""
    N, Cin, H, W = x_nchw.shape
    num_convs = len(params_list)
    Cout = params_list[0]["w_fused"].shape[0]
    Cmax = max(Cin, Cout)

    x_bf16 = x_nchw.astype(jnp.bfloat16)      # halve DMA bytes; MXU bf16 path

    inputs = [x_bf16]
    in_specs = [pl.BlockSpec((1, Cin, H, W), lambda n: (n, 0, 0, 0))]
    for p in params_list:
        kdim = p["w_fused"].shape[1]
        inputs += [p["w_fused"], p["shift_col"]]
        in_specs += [pl.BlockSpec((Cout, kdim), lambda n: (0, 0)),
                     pl.BlockSpec((Cout, 1), lambda n: (0, 0))]

    kernel = functools.partial(_stacked_kernel, num_convs=num_convs,
                               cin=Cin, cout=Cout, h=H, w=W)

    out = pl.pallas_call(
        kernel,
        out_shape=jax.ShapeDtypeStruct((N, Cout, H * W), jnp.float32),
        grid_spec=pltpu.PrefetchScalarGridSpec(
            num_scalar_prefetch=0,
            grid=(N,),                         # one grid step per batch element
            in_specs=in_specs,
            out_specs=pl.BlockSpec((1, Cout, H * W), lambda n: (n, 0, 0)),
            scratch_shapes=[pltpu.VMEM((Cmax, H + 2, W + 2), jnp.bfloat16)],
        ),
        compiler_params=pltpu.CompilerParams(
            dimension_semantics=("parallel",),
            vmem_limit_bytes=32 * 1024 * 1024),
    )(*inputs)

    return out.reshape(N, Cout, H, W)


# ---------------------------------------------------------------------------
# Deterministic synthetic parameters (nn.Conv2d / nn.BatchNorm2d shapes), with
# conv-bias + eval-mode BN folded into the weights (scale) and a shift vector.
# ---------------------------------------------------------------------------
def init_block_params(key, cin, cout):
    kw, kb, kg, kbe, km, kv = jax.random.split(key, 6)
    bound = 1.0 / np.sqrt(cin * 9)
    w_pt = jax.random.uniform(kw, (cout, cin, 3, 3), jnp.float32, -bound, bound)
    b = jax.random.uniform(kb, (cout,), jnp.float32, -bound, bound)
    gamma = 1.0 + 0.1 * jax.random.normal(kg, (cout,), jnp.float32)
    beta = 0.1 * jax.random.normal(kbe, (cout,), jnp.float32)
    rmean = 0.1 * jax.random.normal(km, (cout,), jnp.float32)
    rvar = 1.0 + 0.1 * jax.random.uniform(kv, (cout,), jnp.float32)

    s = gamma / jnp.sqrt(rvar + EPS)
    t = (b - rmean) * s + beta
    # (Cout, Cin, kh, kw) -> (Cout, kh, kw, Cin) -> (Cout, 9*Cin); fold BN scale.
    w_taps = jnp.transpose(w_pt, (0, 2, 3, 1)).reshape(cout, 9 * cin)
    w_fused = (w_taps * s[:, None]).astype(jnp.bfloat16)
    return dict(w_pt=w_pt, b=b, gamma=gamma, beta=beta, rmean=rmean, rvar=rvar,
                w_fused=w_fused, shift_col=t.reshape(cout, 1).astype(jnp.float32))


# ---------------------------------------------------------------------------
# References.
#  * reference_f32: exact eval-mode module semantics in full f32 (loose check).
#  * reference_folded_bf16: same folded/bf16 precision as the kernel (tight check).
# ---------------------------------------------------------------------------
def reference_f32(x_nchw, params_list):
    x = x_nchw
    for p in params_list:
        y = jax.lax.conv_general_dilated(
            x, p["w_pt"], (1, 1), ((1, 1), (1, 1)),
            dimension_numbers=("NCHW", "OIHW", "NCHW"),
            precision=jax.lax.Precision.HIGHEST)
        y = y + p["b"][None, :, None, None]
        y = (y - p["rmean"][None, :, None, None]) / jnp.sqrt(
            p["rvar"][None, :, None, None] + EPS)
        y = y * p["gamma"][None, :, None, None] + p["beta"][None, :, None, None]
        x = jnp.where(y > 0, y, 0.01 * y)
    return x


def reference_folded_bf16(x_nchw, params_list):
    x = x_nchw.astype(jnp.bfloat16)
    y = None
    for p in params_list:
        cout = p["w_fused"].shape[0]
        cin = p["w_fused"].shape[1] // 9
        w = p["w_fused"].reshape(cout, 3, 3, cin).transpose(0, 3, 1, 2)  # OIHW bf16
        y = jax.lax.conv_general_dilated(
            x, w, (1, 1), ((1, 1), (1, 1)),
            dimension_numbers=("NCHW", "OIHW", "NCHW"),
            preferred_element_type=jnp.float32)
        y = y + p["shift_col"].reshape(1, cout, 1, 1)
        y = jnp.where(y > 0, y, 0.01 * y)
        x = y.astype(jnp.bfloat16)
    return y


if __name__ == "__main__":
    # StackedConvLayers(input_feature_channels=4, output_feature_channels=8,
    #                   num_convs=2, first_stride=None), eval mode.
    N, Cin, Cout, H, W = 2, 4, 8, 16, 16
    num_convs = 2

    root = jax.random.PRNGKey(0)
    kx, *kps = jax.random.split(root, 1 + num_convs)
    x = jax.random.normal(kx, (N, Cin, H, W), jnp.float32)

    params = []
    c_in = Cin
    for i in range(num_convs):
        params.append(init_block_params(kps[i], c_in, Cout))
        c_in = Cout

    fwd = jax.jit(stacked_conv_layers)
    out = jax.block_until_ready(fwd(x, params))
    assert out.shape == (N, Cout, H, W)

    ref_tight = jax.block_until_ready(reference_folded_bf16(x, params))
    ref_f32 = jax.block_until_ready(reference_f32(x, params))
    o = np.asarray(out)

    d_tight = float(np.max(np.abs(o - np.asarray(ref_tight))))
    d_f32 = float(np.max(np.abs(o - np.asarray(ref_f32))))
    assert np.allclose(o, np.asarray(ref_tight), atol=1e-3, rtol=1e-3), (
        "kernel vs bf16-folded reference: max abs diff %g" % d_tight)
    assert np.allclose(o, np.asarray(ref_f32), atol=5e-2, rtol=5e-2), (
        "kernel vs f32 module reference: max abs diff %g" % d_f32)

    print("KERNEL_OK")
</pallas_src>

<mosaic_0001>
module attributes {stable_mosaic.version = 11 : i64} {
  func.func @_stacked_kernel(%arg0: i32, %arg1: memref<1x4x16x16xbf16, #tpu.memory_space<vmem>>, %arg2: memref<8x36xbf16, #tpu.memory_space<vmem>>, %arg3: memref<8x1xf32, #tpu.memory_space<vmem>>, %arg4: memref<8x72xbf16, #tpu.memory_space<vmem>>, %arg5: memref<8x1xf32, #tpu.memory_space<vmem>>, %arg6: memref<1x8x256xf32, #tpu.memory_space<vmem>>, %arg7: memref<8x18x18xbf16, #tpu.memory_space<vmem>>) attributes {dimension_semantics = [#tpu.dimension_semantics<parallel>], iteration_bounds = array<i64: 2>, scalar_prefetch = 0 : i64, scratch_operands = 1 : i64, tpu.core_type = #tpu.core_type<tc>, window_params = [{transform_indices = @transform_0, window_bounds = array<i64: 1, 4, 16, 16>}, {pipeline_mode = #tpu.pipeline_mode<synchronous>, transform_indices = @transform_1, window_bounds = array<i64: 8, 36>}, {pipeline_mode = #tpu.pipeline_mode<synchronous>, transform_indices = @transform_2, window_bounds = array<i64: 8, 1>}, {pipeline_mode = #tpu.pipeline_mode<synchronous>, transform_indices = @transform_3, window_bounds = array<i64: 8, 72>}, {pipeline_mode = #tpu.pipeline_mode<synchronous>, transform_indices = @transform_4, window_bounds = array<i64: 8, 1>}, {transform_indices = @transform_5, window_bounds = array<i64: 1, 8, 256>}]} {
    %cst = arith.constant 0.000000e+00 : bf16
    %0 = vector.broadcast %cst : bf16 to vector<8x18x18xbf16>
    %c0 = arith.constant 0 : index
    %c0_0 = arith.constant 0 : index
    %c0_1 = arith.constant 0 : index
    %1 = vector.load %arg7[%c0, %c0_0, %c0_1] : memref<8x18x18xbf16, #tpu.memory_space<vmem>>, vector<8x18x18xbf16>
    tpu.vector_store %arg7[%c0, %c0_0, %c0_1], %0 {strides = array<i32>} : memref<8x18x18xbf16, #tpu.memory_space<vmem>>, vector<8x18x18xbf16>,
    %c0_2 = arith.constant 0 : index
    %c0_3 = arith.constant 0 : index
    %c0_4 = arith.constant 0 : index
    %c0_5 = arith.constant 0 : index
    %2 = vector.load %arg1[%c0_2, %c0_3, %c0_4, %c0_5] : memref<1x4x16x16xbf16, #tpu.memory_space<vmem>>, vector<1x4x16x16xbf16>
    %3 = vector.shape_cast %2 : vector<1x4x16x16xbf16> to vector<4x16x16xbf16>
    %c0_6 = arith.constant 0 : index
    %c1 = arith.constant 1 : index
    %c1_7 = arith.constant 1 : index
    %4 = vector.load %arg7[%c0_6, %c1, %c1_7] : memref<8x18x18xbf16, #tpu.memory_space<vmem>>, vector<4x16x16xbf16>
    tpu.vector_store %arg7[%c0_6, %c1, %c1_7], %3 {strides = array<i32>} : memref<8x18x18xbf16, #tpu.memory_space<vmem>>, vector<4x16x16xbf16>,
    %c0_8 = arith.constant 0 : index
    %c0_9 = arith.constant 0 : index
    %c0_10 = arith.constant 0 : index
    %5 = vector.load %arg7[%c0_8, %c0_9, %c0_10] : memref<8x18x18xbf16, #tpu.memory_space<vmem>>, vector<4x16x16xbf16>
    %6 = vector.shape_cast %5 : vector<4x16x16xbf16> to vector<4x256xbf16>
    %c0_11 = arith.constant 0 : index
    %c0_12 = arith.constant 0 : index
    %c1_13 = arith.constant 1 : index
    %7 = vector.load %arg7[%c0_11, %c0_12, %c1_13] : memref<8x18x18xbf16, #tpu.memory_space<vmem>>, vector<4x16x16xbf16>
    %8 = vector.shape_cast %7 : vector<4x16x16xbf16> to vector<4x256xbf16>
    %c0_14 = arith.constant 0 : index
    %c0_15 = arith.constant 0 : index
    %c2 = arith.constant 2 : index
    %9 = vector.load %arg7[%c0_14, %c0_15, %c2] : memref<8x18x18xbf16, #tpu.memory_space<vmem>>, vector<4x16x16xbf16>
    %10 = vector.shape_cast %9 : vector<4x16x16xbf16> to vector<4x256xbf16>
    %c0_16 = arith.constant 0 : index
    %c1_17 = arith.constant 1 : index
    %c0_18 = arith.constant 0 : index
    %11 = vector.load %arg7[%c0_16, %c1_17, %c0_18] : memref<8x18x18xbf16, #tpu.memory_space<vmem>>, vector<4x16x16xbf16>
    %12 = vector.shape_cast %11 : vector<4x16x16xbf16> to vector<4x256xbf16>
    %c0_19 = arith.constant 0 : index
    %c1_20 = arith.constant 1 : index
    %c1_21 = arith.constant 1 : index
    %13 = vector.load %arg7[%c0_19, %c1_20, %c1_21] : memref<8x18x18xbf16, #tpu.memory_space<vmem>>, vector<4x16x16xbf16>
    %14 = vector.shape_cast %13 : vector<4x16x16xbf16> to vector<4x256xbf16>
    %c0_22 = arith.constant 0 : index
    %c1_23 = arith.constant 1 : index
    %c2_24 = arith.constant 2 : index
    %15 = vector.load %arg7[%c0_22, %c1_23, %c2_24] : memref<8x18x18xbf16, #tpu.memory_space<vmem>>, vector<4x16x16xbf16>
    %16 = vector.shape_cast %15 : vector<4x16x16xbf16> to vector<4x256xbf16>
    %c0_25 = arith.constant 0 : index
    %c2_26 = arith.constant 2 : index
    %c0_27 = arith.constant 0 : index
    %17 = vector.load %arg7[%c0_25, %c2_26, %c0_27] : memref<8x18x18xbf16, #tpu.memory_space<vmem>>, vector<4x16x16xbf16>
    %18 = vector.shape_cast %17 : vector<4x16x16xbf16> to vector<4x256xbf16>
    %c0_28 = arith.constant 0 : index
    %c2_29 = arith.constant 2 : index
    %c1_30 = arith.constant 1 : index
    %19 = vector.load %arg7[%c0_28, %c2_29, %c1_30] : memref<8x18x18xbf16, #tpu.memory_space<vmem>>, vector<4x16x16xbf16>
    %20 = vector.shape_cast %19 : vector<4x16x16xbf16> to vector<4x256xbf16>
    %c0_31 = arith.constant 0 : index
    %c2_32 = arith.constant 2 : index
    %c2_33 = arith.constant 2 : index
    %21 = vector.load %arg7[%c0_31, %c2_32, %c2_33] : memref<8x18x18xbf16, #tpu.memory_space<vmem>>, vector<4x16x16xbf16>
    %22 = vector.shape_cast %21 : vector<4x16x16xbf16> to vector<4x256xbf16>
    %23 = tpu.concatenate %6, %8, %10, %12, %14, %16, %18, %20, %22 in 0 : vector<4x256xbf16>, vector<4x256xbf16>, vector<4x256xbf16>, vector<4x256xbf16>, vector<4x256xbf16>, vector<4x256xbf16>, vector<4x256xbf16>, vector<4x256xbf16>, vector<4x256xbf16> -> vector<36x256xbf16>
    %c0_34 = arith.constant 0 : index
    %c0_35 = arith.constant 0 : index
    %24 = vector.load %arg2[%c0_34, %c0_35] : memref<8x36xbf16, #tpu.memory_space<vmem>>, vector<8x36xbf16>
    %cst_36 = arith.constant dense<0.000000e+00> : vector<8x256xf32>
    %25 = tpu.matmul %24, %23, %cst_36 {dimension_numbers = #tpu.dot_dimension_numbers<[1], [0], [0], [1], [0, 0, 1, 1], [], []>} : vector<8x36xbf16>, vector<36x256xbf16>, vector<8x256xf32> -> vector<8x256xf32>
    %c0_37 = arith.constant 0 : index
    %c0_38 = arith.constant 0 : index
    %26 = vector.load %arg3[%c0_37, %c0_38] : memref<8x1xf32, #tpu.memory_space<vmem>>, vector<8x1xf32>
    %27 = vector.broadcast %26 : vector<8x1xf32> to vector<8x256xf32>
    %28 = arith.addf %25, %27 : vector<8x256xf32>
    %cst_39 = arith.constant 0.000000e+00 : f32
    %29 = vector.broadcast %cst_39 : f32 to vector<8x256xf32>
    %30 = arith.cmpf ogt, %28, %29 : vector<8x256xf32>
    %cst_40 = arith.constant 0.00999999977 : f32
    %31 = vector.broadcast %cst_40 : f32 to vector<8x256xf32>
    %32 = arith.mulf %31, %28 : vector<8x256xf32>
    %33 = arith.select %30, %28, %32 : vector<8x256xi1>, vector<8x256xf32>
    %34 = vector.shape_cast %33 : vector<8x256xf32> to vector<8x16x16xf32>
    %35 = arith.truncf %34 : vector<8x16x16xf32> to vector<8x16x16xbf16>
    %c0_41 = arith.constant 0 : index
    %c1_42 = arith.constant 1 : index
    %c1_43 = arith.constant 1 : index
    %36 = vector.load %arg7[%c0_41, %c1_42, %c1_43] : memref<8x18x18xbf16, #tpu.memory_space<vmem>>, vector<8x16x16xbf16>
    tpu.vector_store %arg7[%c0_41, %c1_42, %c1_43], %35 {strides = array<i32>} : memref<8x18x18xbf16, #tpu.memory_space<vmem>>, vector<8x16x16xbf16>,
    %c0_44 = arith.constant 0 : index
    %c0_45 = arith.constant 0 : index
    %c0_46 = arith.constant 0 : index
    %37 = vector.load %arg7[%c0_44, %c0_45, %c0_46] : memref<8x18x18xbf16, #tpu.memory_space<vmem>>, vector<8x16x16xbf16>
    %38 = vector.shape_cast %37 : vector<8x16x16xbf16> to vector<8x256xbf16>
    %c0_47 = arith.constant 0 : index
    %c0_48 = arith.constant 0 : index
    %c1_49 = arith.constant 1 : index
    %39 = vector.load %arg7[%c0_47, %c0_48, %c1_49] : memref<8x18x18xbf16, #tpu.memory_space<vmem>>, vector<8x16x16xbf16>
    %40 = vector.shape_cast %39 : vector<8x16x16xbf16> to vector<8x256xbf16>
    %c0_50 = arith.constant 0 : index
    %c0_51 = arith.constant 0 : index
    %c2_52 = arith.constant 2 : index
    %41 = vector.load %arg7[%c0_50, %c0_51, %c2_52] : memref<8x18x18xbf16, #tpu.memory_space<vmem>>, vector<8x16x16xbf16>
    %42 = vector.shape_cast %41 : vector<8x16x16xbf16> to vector<8x256xbf16>
    %c0_53 = arith.constant 0 : index
    %c1_54 = arith.constant 1 : index
    %c0_55 = arith.constant 0 : index
    %43 = vector.load %arg7[%c0_53, %c1_54, %c0_55] : memref<8x18x18xbf16, #tpu.memory_space<vmem>>, vector<8x16x16xbf16>
    %44 = vector.shape_cast %43 : vector<8x16x16xbf16> to vector<8x256xbf16>
    %c0_56 = arith.constant 0 : index
    %c1_57 = arith.constant 1 : index
    %c1_58 = arith.constant 1 : index
    %45 = vector.load %arg7[%c0_56, %c1_57, %c1_58] : memref<8x18x18xbf16, #tpu.memory_space<vmem>>, vector<8x16x16xbf16>
    %46 = vector.shape_cast %45 : vector<8x16x16xbf16> to vector<8x256xbf16>
    %c0_59 = arith.constant 0 : index
    %c1_60 = arith.constant 1 : index
    %c2_61 = arith.constant 2 : index
    %47 = vector.load %arg7[%c0_59, %c1_60, %c2_61] : memref<8x18x18xbf16, #tpu.memory_space<vmem>>, vector<8x16x16xbf16>
    %48 = vector.shape_cast %47 : vector<8x16x16xbf16> to vector<8x256xbf16>
    %c0_62 = arith.constant 0 : index
    %c2_63 = arith.constant 2 : index
    %c0_64 = arith.constant 0 : index
    %49 = vector.load %arg7[%c0_62, %c2_63, %c0_64] : memref<8x18x18xbf16, #tpu.memory_space<vmem>>, vector<8x16x16xbf16>
    %50 = vector.shape_cast %49 : vector<8x16x16xbf16> to vector<8x256xbf16>
    %c0_65 = arith.constant 0 : index
    %c2_66 = arith.constant 2 : index
    %c1_67 = arith.constant 1 : index
    %51 = vector.load %arg7[%c0_65, %c2_66, %c1_67] : memref<8x18x18xbf16, #tpu.memory_space<vmem>>, vector<8x16x16xbf16>
    %52 = vector.shape_cast %51 : vector<8x16x16xbf16> to vector<8x256xbf16>
    %c0_68 = arith.constant 0 : index
    %c2_69 = arith.constant 2 : index
    %c2_70 = arith.constant 2 : index
    %53 = vector.load %arg7[%c0_68, %c2_69, %c2_70] : memref<8x18x18xbf16, #tpu.memory_space<vmem>>, vector<8x16x16xbf16>
    %54 = vector.shape_cast %53 : vector<8x16x16xbf16> to vector<8x256xbf16>
    %55 = tpu.concatenate %38, %40, %42, %44, %46, %48, %50, %52, %54 in 0 : vector<8x256xbf16>, vector<8x256xbf16>, vector<8x256xbf16>, vector<8x256xbf16>, vector<8x256xbf16>, vector<8x256xbf16>, vector<8x256xbf16>, vector<8x256xbf16>, vector<8x256xbf16> -> vector<72x256xbf16>
    %c0_71 = arith.constant 0 : index
    %c0_72 = arith.constant 0 : index
    %56 = vector.load %arg4[%c0_71, %c0_72] : memref<8x72xbf16, #tpu.memory_space<vmem>>, vector<8x72xbf16>
    %cst_73 = arith.constant dense<0.000000e+00> : vector<8x256xf32>
    %57 = tpu.matmul %56, %55, %cst_73 {dimension_numbers = #tpu.dot_dimension_numbers<[1], [0], [0], [1], [0, 0, 1, 1], [], []>} : vector<8x72xbf16>, vector<72x256xbf16>, vector<8x256xf32> -> vector<8x256xf32>
    %c0_74 = arith.constant 0 : index
    %c0_75 = arith.constant 0 : index
    %58 = vector.load %arg5[%c0_74, %c0_75] : memref<8x1xf32, #tpu.memory_space<vmem>>, vector<8x1xf32>
    %59 = vector.broadcast %58 : vector<8x1xf32> to vector<8x256xf32>
    %60 = arith.addf %57, %59 : vector<8x256xf32>
    %cst_76 = arith.constant 0.000000e+00 : f32
    %61 = vector.broadcast %cst_76 : f32 to vector<8x256xf32>
    %62 = arith.cmpf ogt, %60, %61 : vector<8x256xf32>
    %cst_77 = arith.constant 0.00999999977 : f32
    %63 = vector.broadcast %cst_77 : f32 to vector<8x256xf32>
    %64 = arith.mulf %63, %60 : vector<8x256xf32>
    %65 = arith.select %62, %60, %64 : vector<8x256xi1>, vector<8x256xf32>
    %c0_78 = arith.constant 0 : index
    %c0_79 = arith.constant 0 : index
    %c0_80 = arith.constant 0 : index
    %66 = vector.load %arg6[%c0_78, %c0_79, %c0_80] : memref<1x8x256xf32, #tpu.memory_space<vmem>>, vector<1x8x256xf32>
    %67 = vector.shape_cast %66 : vector<1x8x256xf32> to vector<8x256xf32>
    %68 = vector.shape_cast %65 : vector<8x256xf32> to vector<1x8x256xf32>
    tpu.vector_store %arg6[%c0_78, %c0_79, %c0_80], %68 {strides = array<i32>} : memref<1x8x256xf32, #tpu.memory_space<vmem>>, vector<1x8x256xf32>,
    return
  }
  func.func @transform_0(%arg0: i32) -> (i32, i32, i32, i32) {
    %c0_i32 = arith.constant 0 : i32
    %c0_i32_0 = arith.constant 0 : i32
    %c0_i32_1 = arith.constant 0 : i32
    %c0_i32_2 = arith.constant 0 : i32
    return %arg0, %c0_i32, %c0_i32_0, %c0_i32_1 : i32, i32, i32, i32
  }
  func.func @transform_1(%arg0: i32) -> (i32, i32) {
    %c0_i32 = arith.constant 0 : i32
    %c0_i32_0 = arith.constant 0 : i32
    %c0_i32_1 = arith.constant 0 : i32
    return %c0_i32, %c0_i32_0 : i32, i32
  }
  func.func @transform_2(%arg0: i32) -> (i32, i32) {
    %c0_i32 = arith.constant 0 : i32
    %c0_i32_0 = arith.constant 0 : i32
    %c0_i32_1 = arith.constant 0 : i32
    return %c0_i32, %c0_i32_0 : i32, i32
  }
  func.func @transform_3(%arg0: i32) -> (i32, i32) {
    %c0_i32 = arith.constant 0 : i32
    %c0_i32_0 = arith.constant 0 : i32
    %c0_i32_1 = arith.constant 0 : i32
    return %c0_i32, %c0_i32_0 : i32, i32
  }
  func.func @transform_4(%arg0: i32) -> (i32, i32) {
    %c0_i32 = arith.constant 0 : i32
    %c0_i32_0 = arith.constant 0 : i32
    %c0_i32_1 = arith.constant 0 : i32
    return %c0_i32, %c0_i32_0 : i32, i32
  }
  func.func @transform_5(%arg0: i32) -> (i32, i32, i32) {
    %c0_i32 = arith.constant 0 : i32
    %c0_i32_0 = arith.constant 0 : i32
    %c0_i32_1 = arith.constant 0 : i32
    return %arg0, %c0_i32, %c0_i32_0 : i32, i32, i32
  }
}

</mosaic_0001>

<bundles_post_ra>
// kernel: stacked_conv_layers.1
= control target key start
LH: loop header
LB: loop body
LE: loop exit
PB: predicated region body
PF: predicated region fallthrough
CT: control target
= control target key end

     0   :  { %s7418_s18 = smov 0   ;;  %s11482_s0 = inlined_call_operand.vmem [shape: bf16[2,4,16,16], index: 0, kind: input, shape index: {}]   ;;  %s11483_s1 = inlined_call_operand.vmem [shape: bf16[8,36], index: 1, kind: input, shape index: {}]   ;;  %s11484_s2 = inlined_call_operand.vmem [shape: f32[8,1], index: 2, kind: input, shape index: {}]   ;;  %s11485_s3 = inlined_call_operand.vmem [shape: bf16[8,72], index: 3, kind: input, shape index: {}]   ;;  %s11486_s4 = inlined_call_operand.vmem [shape: f32[8,1], index: 4, kind: input, shape index: {}]   ;;  %s11487_s5 = inlined_call_operand.vmem [shape: f32[2,8,256], index: 5, kind: output, shape index: {}]  }
   0x1 LB: > { %s6956_s19 = sadd.s32 4294967295, %s7373_s18   ;;  %p6960_p0 = scmp.ge.s32.totalorder %s7373_s18, 1  ;;  %s7373_s18 = sphi %s7418_s18, %s15_s18  }
   0x2   : > { %p187_p1 = scmp.lt.s32.totalorder %s7373_s18, 3 }
   0x4   : > { %p188_p2 = pnand %p6960_p0, %p187_p1 }
   0x6   : > { %191 = sbr.rel (%p188_p2) target bundleno = 1909 (0x775), region = 40 }
   0xd   : > { %p215_p3 = scmp.lt.s32.totalorder %s6956_s19, 1  ;;  %vm226_vm0 = vcmask 142336   ;;  %v11488_v0 = vmov 0   ;;  %vm260_vm1 = vsmask.f32 256  ;;  %v11620_v26 = vmov 0 }
   0xe   : > { %231 = vst.msk [vmem:[#allocation2 + $0xc] sm:$0xf] %vm226_vm0, %v11488_v0  ;;  %227 = vst.msk [vmem:[#allocation2] sm:$0xf] %vm226_vm0, %v11488_v0  ;;  %3092 = vmatprep.mubr.bf16.mxu0 %v11488_v0  ;;  %7362 = vset.pattern.permute.xlu0 %v11488_v0  ;;  %vm261_vm2 = vsmask.f32 4368 }
   0xf   : > { %s11961_s19 = smov (!%p215_p3, %s6956_s19), 1  ;;  %228 = vst.msk [vmem:[#allocation2 + $0x4] sm:$0xf] %vm226_vm0, %v11488_v0  ;;  %232 = vst.msk [vmem:[#allocation2 + $0x10] sm:$0xf] %vm226_vm0, %v11488_v0  ;;  %6884 = vmatprep.mubr.bf16.mxu1 %v11488_v0  ;;  %s7376_s24 = smov 1  }
  0x10   : > { %234 = vst.msk [vmem:[#allocation2 + $0x18] sm:$0xf] %vm226_vm0, %v11488_v0  ;;  %235 = vst.msk [vmem:[#allocation2 + $0x1c] sm:$0xf] %vm226_vm0, %v11488_v0  ;;  %s7251_s20 = sshll.u32 %s11961_s19, 5  ;;  %vm229_vm4 = vcmask 139264  }
  0x11   : > { %237 = vst.msk [vmem:[#allocation2 + $0x24] sm:$0xf] %vm226_vm0, %v11488_v0  ;;  %238 = vst.msk [vmem:[#allocation2 + $0x28] sm:$0xf] %vm226_vm0, %v11488_v0  ;;  %s219_s23 = scalar_lea.vmem %s11482_s0, %s7251_s20  ;;  %vm367_vm5 = vcmask 134152   ;;  %v11623_v54 = vmov 0 }
  0x12   : > { %240 = vst.msk [vmem:[#allocation2 + $0x30] sm:$0xf] %vm226_vm0, %v11488_v0  ;;  %241 = vst.msk [vmem:[#allocation2 + $0x34] sm:$0xf] %vm226_vm0, %v11488_v0  ;;  %v254_v1 = vld [vmem:[%s219_s23 + $0x8] sm:$0xf] }
  0x13   : > { %243 = vst.msk [vmem:[#allocation2 + $0x3c] sm:$0xf] %vm226_vm0, %v11488_v0  ;;  %244 = vst.msk [vmem:[#allocation2 + $0x40] sm:$0xf] %vm226_vm0, %v11488_v0  ;;  %v252_v2 = vld [vmem:[%s219_s23] sm:$0xf] }
  0x14   : > { %246 = vst.msk [vmem:[#allocation2 + $0x48] sm:$0xf] %vm226_vm0, %v11488_v0  ;;  %247 = vst.msk [vmem:[#allocation2 + $0x4c] sm:$0xf] %vm226_vm0, %v11488_v0  ;;  %v255_v3 = vld [vmem:[%s219_s23 + $0xc] sm:$0xf] }
  0x15   : > { %249 = vst.msk [vmem:[#allocation2 + $0x54] sm:$0xf] %vm226_vm0, %v11488_v0  ;;  %250 = vst.msk [vmem:[#allocation2 + $0x58] sm:$0xf] %vm226_vm0, %v11488_v0  ;;  %v281_v4 = vshrl.u32 %v254_v1, 16  ;;  %v284_v5 = vshll.u32 %v254_v1, 16 }
  0x16   : > { %v264_v6 = vshrl.u32 %v252_v2, 16  ;;  %v267_v7 = vshll.u32 %v252_v2, 16  ;;  %v256_v8 = vld [vmem:[%s219_s23 + $0x10] sm:$0xf]  ;;  %v289_v9 = vshrl.u32 %v255_v3, 16  ;;  %v292_v10 = vshll.u32 %v255_v3, 16  ;;  %vm7469_vm3 = vmor %vm260_vm1, %vm261_vm2 }
  0x17   : > { %v298_v11 = vshrl.u32 %v256_v8, 16  ;;  %v301_v12 = vshll.u32 %v256_v8, 16  ;;  %v257_v13 = vld [vmem:[%s219_s23 + $0x14] sm:$0xf]  ;;  %v283_v14 = vrot.slane %v281_v4, 7  ;;  %v11621_v26 = vsel %vm7469_vm3, 4294967295, %v11620_v26 }
  0x18   : > { %v266_v15 = vrot.slane %v264_v6, 7  ;;  %v306_v16 = vshrl.u32 %v257_v13, 16  ;;  %v258_v17 = vld [vmem:[%s219_s23 + $0x18] sm:$0xf]  ;;  %v291_v18 = vrot.slane %v289_v9, 7  ;;  %v309_v20 = vshll.u32 %v257_v13, 16 }
  0x19   : > { %v300_v19 = vrot.slane %v298_v11, 7  ;;  %v315_v21 = vshrl.u32 %v258_v17, 16  ;;  %v259_v22 = vld [vmem:[%s219_s23 + $0x1c] sm:$0xf]  ;;  %v286_v23 = vor.u32 %v284_v5, %v283_v14  ;;  %v287_v24 = vrot.slane %v283_v14, 4  ;;  %11622 = vst [vmem:[#allocation3_spill] sm:$0xff] %v11621_v26 }
  0x1a   : > { %v269_v25 = vor.u32 %v267_v7, %v266_v15  ;;  %v253_v27 = vld [vmem:[%s219_s23 + $0x4] sm:$0xf]  ;;  %v294_v28 = vor.u32 %v292_v10, %v291_v18  ;;  %v308_v30 = vrot.slane %v306_v16, 7  ;;  %v318_v31 = vshll.u32 %v258_v17, 16  ;;  %233 = vst.msk [vmem:[#allocation2 + $0x14] sm:$0x1] %vm229_vm4, %v11488_v0 }
  0x1b   : > { %v303_v29 = vor.u32 %v301_v12, %v300_v19  ;;  %337 = vrot.lane.b32.xlu1 %v286_v23, %s7376_s24  ;;  %v304_v32 = vrot.slane %v300_v19, 4  ;;  %v317_v33 = vrot.slane %v315_v21, 7  ;;  %v323_v34 = vshrl.u32 %v259_v22, 16  ;;  %230 = vst.msk [vmem:[#allocation2 + $0x8] sm:$0x1] %vm229_vm4, %v11488_v0  ;;  %s7377_s25 = smov 127  }
  0x1c   : > { %331 = vrot.lane.b32.xlu0 %v269_v25, %s7376_s24  ;;  %v272_v35 = vshrl.u32 %v253_v27, 16  ;;  %v295_v36 = vsel %vm7469_vm3, %v287_v24, %v294_v28  ;;  %v311_v37 = vor.u32 %v309_v20, %v308_v30  ;;  %v326_v38 = vshll.u32 %v259_v22, 16  ;;  %236 = vst.msk [vmem:[#allocation2 + $0x20] sm:$0x1] %vm229_vm4, %v11488_v0  ;;  %239 = vst.msk [vmem:[#allocation2 + $0x2c] sm:$0x1] %vm229_vm4, %v11488_v0 }
  0x1d   : > { %v275_v39 = vshll.u32 %v253_v27, 16  ;;  %v325_v40 = vrot.slane %v323_v34, 7  ;;  %v270_v42 = vrot.slane %v266_v15, 4  ;;  %v320_v43 = vor.u32 %v318_v31, %v317_v33  ;;  %242 = vst.msk [vmem:[#allocation2 + $0x38] sm:$0x1] %vm229_vm4, %v11488_v0  ;;  %s7378_s26 = smov 126  }
  0x1e   : > { %v274_v41 = vrot.slane %v272_v35, 7  ;;  %245 = vst.msk [vmem:[#allocation2 + $0x44] sm:$0x1] %vm229_vm4, %v11488_v0  ;;  %248 = vst.msk [vmem:[#allocation2 + $0x50] sm:$0x1] %vm229_vm4, %v11488_v0  ;;  %v312_v44 = vsel %vm7469_vm3, %v304_v32, %v311_v37  ;;  %v321_v45 = vrot.slane %v317_v33, 4 }
  0x1f   : > { %339 = vrot.lane.b32.xlu1 %v295_v36, %s7376_s24  ;;  %251 = vst.msk [vmem:[#allocation2 + $0x5c] sm:$0x1] %vm229_vm4, %v11488_v0  ;;  %v328_v46 = vor.u32 %v326_v38, %v325_v40  ;;  %v296_v50 = vrot.slane %v291_v18, 4  ;;  %v330_v52 = vrot.slane %v325_v40, 4  ;;  %v313_v53 = vrot.slane %v308_v30, 4  ;;  %s7381_s27 = smov 32  }
  0x20   : > { %343 = vrot.lane.b32.xlu0 %v303_v29, %s7376_s24  ;;  %v277_v47 = vor.u32 %v275_v39, %v274_v41  ;;  %v279_v51 = vrot.slane %v274_v41, 4  ;;  %vm368_vm6 = vsmask.f32 7938  ;;  %v380_v55 = vld [vmem:[#allocation2 + $0xc] sm:$0xf]  ;;  %vm375_vm8 = vcmask 131080  }
  0x21   : > { %v329_v48 = vsel %vm7469_vm3, %v321_v45, %v328_v46  ;;  %vm7502_vm7 = vmand %vm367_vm5, %vm368_vm6  ;;  %v370_v56 = vld [vmem:[#allocation2] sm:$0xf]  ;;  %v387_v61 = vld [vmem:[#allocation2 + $0x18] sm:$0xf]  ;;  %v11626_v10 = vmov 0  ;;  %vm2147_vm10 = vcmask 1042432  }
  0x22   : > { %v278_v49 = vsel %vm7469_vm3, %v270_v42, %v277_v47  ;;  %v11624_v54 = vsel %vm7502_vm7, 4294967295, %v11623_v54  ;;  %v394_v2 = vld [vmem:[#allocation2 + $0x24] sm:$0xf]  ;;  %vm7523_vm9 = vmand %vm375_vm8, %vm260_vm1  ;;  %v384_v11 = vld [vmem:[#allocation2 + $0x14] sm:$0x1]  ;;  %vm2148_vm11 = vcmask 1046532  }
  0x23   : > { %345 = vrot.lane.b32.xlu1 %v312_v44, %s7376_s24  ;;  %11625 = vst [vmem:[#allocation4_spill] sm:$0xff] %v11624_v54  ;;  %v11627_v10 = vsel %vm7523_vm9, 4294967295, %v11626_v10  ;;  %v377_v12 = vld [vmem:[#allocation2 + $0x8] sm:$0x1]  ;;  %vm7534_vm12 = vmor %vm2147_vm10, %vm2148_vm11  ;;  %v11629_v21 = vmov 0  ;;  %s7382_s28 = smov 48  }
  0x24   : > { %349 = vrot.lane.b32.xlu0 %v320_v43, %s7376_s24  ;;  %11628 = vst [vmem:[#allocation5_spill] sm:$0xff] %v11627_v10  ;;  %v11630_v21 = vsel %vm7534_vm12, 4294967295, %v11629_v21  ;;  %v398_v25 = vld [vmem:[#allocation2 + $0x2c] sm:$0x1]  ;;  %v391_v27 = vld [vmem:[#allocation2 + $0x20] sm:$0x1] }
  0x25   : > { %11631 = vst [vmem:[#allocation6_spill] sm:$0xff] %v11630_v21  ;;  %vm1240_vm13 = vsmask.f32 3328  ;;  %vm1241_vm14 = vsmask.f32 7440  ;;  %s7383_s29 = smov 64  }
  0x26   : > { %vm7750_vm15 = vmor %vm1240_vm13, %vm1241_vm14  ;;  %s7384_s30 = smov 80   ;;  %s7385_s6 = smov 16   ;;  %vm639_vm0 = vcmask 130048   ;;  %vm643_vm1 = vcmask 261120   ;;  %vm646_vm2 = vcmask 392192   ;;  %vm649_vm4 = vcmask 523264  }
  0x27   : > { %351 = vrot.lane.b32.xlu1 %v329_v48, %s7376_s24  ;;  %s7386_s7 = smov 96   ;;  %s7387_s8 = smov 112   ;;  %vm652_vm6 = vcmask 654336   ;;  %vm655_vm8 = vcmask 785408   ;;  %vm658_vm10 = vcmask 916480   ;;  %vm3014_vm11 = vcmask 1041408  }
  0x28   : > { %333 = vrot.lane.b32.xlu0 %v278_v49, %s7376_s24  ;;  %vm11521_vm13 = vcmask 1043456   ;;  %vm3024_vm14 = vcmask 1045504   ;;  %s7252_s17 = sshll.u32 %s11961_s19, 4 }
  0x29   : > { %s224_s22 = scalar_lea.vmem %s11487_s5, %s7252_s17 }
  0x2b   : > { %341 = vrot.lane.b32.xlu1 %v296_v50, %s7376_s24 }
  0x2c   : > { %335 = vrot.lane.b32.xlu0 %v279_v51, %s7376_s24 }
  0x2f   : > { %353 = vrot.lane.b32.xlu1 %v330_v52, %s7376_s24 }
  0x30   : > { %347 = vrot.lane.b32.xlu0 %v313_v53, %s7376_s24 }
  0x8d   : > { %v338_v57 = vpop.permute.xlu1 %337 }
  0x8e   : > { %v332_v58 = vpop.permute.xlu0 %331  ;;  %v381_v59 = vsel %vm7502_vm7, %v338_v57, %v380_v55 }
  0x8f   : > { %v371_v60 = vsel %vm7502_vm7, %v332_v58, %v370_v56  ;;  %382 = vst [vmem:[#allocation2 + $0xc] sm:$0xf] %v381_v59 }
  0x90   : > { %372 = vst [vmem:[#allocation2] sm:$0xf] %v371_v60 }
  0x91   : > { %v340_v62 = vpop.permute.xlu1 %339 }
  0x92   : > { %v344_v63 = vpop.permute.xlu0 %343  ;;  %383 = vst.msk [vmem:[#allocation2 + $0x10] sm:$0xf] %vm367_vm5, %v340_v62 }
  0x93   : > { %v388_v1 = vsel %vm7502_vm7, %v344_v63, %v387_v61 }
  0x94   : > { %389 = vst [vmem:[#allocation2 + $0x18] sm:$0xf] %v388_v1 }
  0x95   : > { %v346_v3 = vpop.permute.xlu1 %345 }
  0x96   : > { %v350_v4 = vpop.permute.xlu0 %349  ;;  %390 = vst.msk [vmem:[#allocation2 + $0x1c] sm:$0xf] %vm367_vm5, %v346_v3  ;;  %v2136_v9 = vld [vmem:[#allocation2 + $0xc] sm:$0xe] }
  0x97   : > { %v395_v5 = vsel %vm7502_vm7, %v350_v4, %v394_v2  ;;  %v7050_v17 = vrot.slane %v2136_v9, 9  ;;  %v2135_v23 = vld [vmem:[#allocation2] sm:$0xe]  ;;  %v7571_v45 = vld [vmem:[#allocation2 + $0xc] sm:$0xf] }
  0x98   : > { %396 = vst [vmem:[#allocation2 + $0x24] sm:$0xf] %v395_v5  ;;  %v7049_v35 = vrot.slane %v2135_v23, 9  ;;  %v7591_v60 = vld [vmem:[#allocation2] sm:$0xf] }
  0x99   : > { %v352_v6 = vpop.permute.xlu1 %351  ;;  %v7516_v8 = vld [vmem:[#allocation2 + $0x10] sm:$0xf] }
  0x9a   : > { %v334_v7 = vpop.permute.xlu0 %333  ;;  %397 = vst.msk [vmem:[#allocation2 + $0x28] sm:$0xf] %vm367_vm5, %v352_v6  ;;  %690 = vrot.lane.b32.xlu1 %v7516_v8, %s7377_s25  ;;  %v2159_v18 = vrot.slane %v7516_v8, 5 }
  0x9b   : > { %374 = vst.msk [vmem:[#allocation2 + $0x4] sm:$0xf] %vm367_vm5, %v334_v7  ;;  %v2137_v13 = vld [vmem:[#allocation2 + $0x18] sm:$0xe] }
  0x9c   : > { %v7051_v28 = vrot.slane %v2137_v13, 9  ;;  %v7545_v33 = vsel %vm7534_vm12, %v7050_v17, %v2159_v18  ;;  %v2161_v53 = vrot.slane %v2159_v18, 4  ;;  %v7613_v7 = vld [vmem:[#allocation2 + $0x18] sm:$0xf]  ;;  %v7379_v13 = vmov 1983009808  }
  0x9d   : > { %v342_v14 = vpop.permute.xlu1 %341  ;;  %v7527_v16 = vld [vmem:[#allocation2 + $0x1c] sm:$0xf]  ;;  %v2182_v41 = vshrl.u32 %v7545_v33, 16  ;;  %v1285_v0 = vshll.u32 %v7613_v7, 16 }
  0x9e   : > { %v336_v15 = vpop.permute.xlu0 %335  ;;  %v385_v19 = vsel %vm7523_vm9, %v342_v14, %v384_v11  ;;  %v2166_v24 = vrot.slane %v7527_v16, 5  ;;  %v435_v14 = vunpack.c.l.s4 %v7379_v13 }
  0x9f   : > { %v378_v20 = vsel %vm7523_vm9, %v336_v15, %v377_v12  ;;  %v2138_v22 = vld [vmem:[#allocation2 + $0x24] sm:$0xe]  ;;  %386 = vst [vmem:[#allocation2 + $0x14] sm:$0x1] %v385_v19  ;;  %v437_v15 = vlaneseq }
  0xa0   : > { %379 = vst [vmem:[#allocation2 + $0x8] sm:$0x1] %v378_v20  ;;  %v7052_v34 = vrot.slane %v2138_v22, 9  ;;  %v7549_v36 = vsel %vm7534_vm12, %v7051_v28, %v2166_v24  ;;  %v7589_v59 = vld [vmem:[#allocation2 + $0x24] sm:$0xf]  ;;  %v2168_v2 = vrot.slane %v2166_v24, 4  ;;  %v436_v17 = vunpack.c.0.s8 %v435_v14 }
  0xa1   : > { %v354_v29 = vpop.permute.xlu1 %353  ;;  %v7539_v31 = vld [vmem:[#allocation2 + $0x28] sm:$0xf]  ;;  %v2187_v44 = vshrl.u32 %v7549_v36, 16  ;;  %v7645_v18 = vshrl.u32 %v437_v15, 7 }
  0xa2   : > { %v348_v30 = vpop.permute.xlu0 %347  ;;  %v7541_v32 = vld [vmem:[#allocation2 + $0x4] sm:$0xf]  ;;  %v399_v37 = vsel %vm7523_vm9, %v354_v29, %v398_v25  ;;  %698 = vrot.lane.b32.xlu1 %v7539_v31, %s7377_s25  ;;  %v2173_v39 = vrot.slane %v7539_v31, 5 }
  0xa3   : > { %v392_v38 = vsel %vm7523_vm9, %v348_v30, %v391_v27  ;;  %686 = vrot.lane.b32.xlu0 %v7541_v32, %s7377_s25  ;;  %v2152_v40 = vrot.slane %v7541_v32, 5  ;;  %400 = vst [vmem:[#allocation2 + $0x2c] sm:$0x1] %v399_v37  ;;  %v7652_v19 = vsub.s32 %v436_v17, %v7645_v18  ;;  %v430_v17 = vshrl.u32 %v7527_v16, 16 }
  0xa4   : > { %393 = vst [vmem:[#allocation2 + $0x20] sm:$0x1] %v392_v38  ;;  %v7564_v42 = vsel %vm7534_vm12, %v7052_v34, %v2173_v39  ;;  %v2175_v3 = vrot.slane %v2173_v39, 4 }
  0xa5   : > { %v7568_v43 = vsel %vm7534_vm12, %v7049_v35, %v2152_v40  ;;  %v2188_v46 = vshrl.u32 %v7564_v42, 16  ;;  %v2186_v49 = vpack.i.b16 %v7564_v42, %v7549_v36  ;;  %v2154_v57 = vrot.slane %v2152_v40, 4 }
  0xa6   : > { %v2180_v47 = vpack.i.b16 %v7545_v33, %v7568_v43  ;;  %v2181_v48 = vshrl.u32 %v7568_v43, 16  ;;  %688 = vrot.lane.b32.xlu1 %v7571_v45, %s7377_s25  ;;  %v7583_v50 = vld [vmem:[#allocation2 + $0x14] sm:$0x1]  ;;  %v425_v40 = vshrl.u32 %v7516_v8, 16 }
  0xa7   : > { %694 = vrot.lane.b32.xlu0 %v7527_v16, %s7377_s25  ;;  %v7585_v51 = vld [vmem:[#allocation2 + $0x8] sm:$0x1]  ;;  %v2162_v55 = vrot.slane %v7583_v50, 5  ;;  %v2189_v56 = vpack.i.b16 %v2188_v46, %v2187_v44  ;;  %v7680_v35 = vrot.slane %v2186_v49, %v7652_v19 }
  0xa8   : > { %v2183_v52 = vpack.i.b16 %v2182_v41, %v2181_v48  ;;  %v2155_v58 = vrot.slane %v7585_v51, 5  ;;  %v7677_v34 = vrot.slane %v2180_v47, %v7652_v19  ;;  %v1270_v41 = vshll.u32 %v7516_v8, 16 }
  0xa9   : > { %v7595_v61 = vsel %vm7534_vm12, %v2161_v53, %v2162_v55  ;;  %v7674_v30 = vrot.slane %v2189_v56, %v7652_v19  ;;  %v1275_v46 = vrot.slane %v425_v40, 4  ;;  %v424_v47 = vshrl.u32 %v7541_v32, 16 }
  0xaa   : > { %696 = vrot.lane.b32.xlu1 %v7589_v59, %s7377_s25  ;;  %v7601_v62 = vld [vmem:[#allocation2 + $0x2c] sm:$0x1]  ;;  %v7605_v63 = vsel %vm7534_vm12, %v2154_v57, %v2155_v58  ;;  %v2194_v25 = vshrl.u32 %v7595_v61, 16  ;;  %v7671_v29 = vrot.slane %v2183_v52, %v7652_v19  ;;  %v1250_v48 = vshll.u32 %v7541_v32, 16 }
  0xab   : > { %684 = vrot.lane.b32.xlu0 %v7591_v60, %s7377_s25  ;;  %v7607_v1 = vld [vmem:[#allocation2 + $0x20] sm:$0x1]  ;;  %v2176_v4 = vrot.slane %v7601_v62, 5  ;;  %v2192_v5 = vpack.i.b16 %v7595_v61, %v7605_v63  ;;  %v2193_v27 = vshrl.u32 %v7605_v63, 16  ;;  %v431_v52 = vshrl.u32 %v7539_v31, 16 }
  0xac   : > { %v2169_v6 = vrot.slane %v7607_v1, 5  ;;  %v2252_v38 = vcombine.low %v7671_v29, %v7674_v30  ;;  %v1310_v53 = vshll.u32 %v7539_v31, 16  ;;  %v1265_v56 = vshll.u32 %v7571_v45, 16 }
  0xad   : > { %v7617_v9 = vsel %vm7534_vm12, %v2175_v3, %v2176_v4  ;;  %v7664_v24 = vrot.slane %v2192_v5, %v7652_v19  ;;  %v2195_v39 = vpack.i.b16 %v2194_v25, %v2193_v27  ;;  %v1315_v3 = vrot.slane %v431_v52, 4 }
  0xae   : > { %v7621_v11 = vsel %vm7534_vm12, %v2168_v2, %v2169_v6  ;;  %966 = vrot.lane.b32.xlu1 %v7516_v8, %s7378_s26  ;;  %v2200_v22 = vshrl.u32 %v7617_v9, 16  ;;  %v1279_v2 = vshll.u32 %v7583_v50, 16  ;;  %v413_v5 = vshrl.u32 %v7571_v45, 16 }
  0xaf   : > { %692 = vrot.lane.b32.xlu0 %v7613_v7, %s7377_s25  ;;  %v2198_v12 = vpack.i.b16 %v7617_v9, %v7621_v11  ;;  %v2199_v23 = vshrl.u32 %v7621_v11, 16  ;;  %v7704_v49 = vrot.slane %v2195_v39, %v7652_v19  ;;  %v1267_v13 = vrot.slane %v1265_v56, 5 }
  0xb0   : > { %v1264_v50 = vrot.slane %v413_v5, 4  ;;  %v1281_v14 = vrot.slane %v1279_v2, 5  ;;  %v1259_v25 = vshll.u32 %v7585_v51, 16  ;;  %v1305_v39 = vshll.u32 %v7589_v59, 16 }
  0xb1   : > { %v7655_v20 = vrot.slane %v2198_v12, %v7652_v19  ;;  %v2201_v37 = vpack.i.b16 %v2200_v22, %v2199_v23  ;;  %v1312_v12 = vrot.slane %v1310_v53, 5  ;;  %v1319_v22 = vshll.u32 %v7601_v62, 16 }
  0xb2   : > { %974 = vrot.lane.b32.xlu1 %v7539_v31, %s7378_s26  ;;  %v11632_v62 = vmov 0  ;;  %v412_v51 = vshrl.u32 %v7591_v60, 16  ;;  %v1287_v4 = vrot.slane %v1285_v0, 5 }
  0xb3   : > { %962 = vrot.lane.b32.xlu0 %v7541_v32, %s7378_s26  ;;  %v2286_v28 = vcombine.low %v7664_v24, %v7655_v20  ;;  %v7695_v44 = vrot.slane %v2201_v37, %v7652_v19  ;;  %v2287_v55 = vcombine.high %v7664_v24, %v7655_v20  ;;  %v1316_v15 = vor.u32 %v1315_v3, %v1312_v12 }
  0xb4   : > { %v419_v37 = vshrl.u32 %v7589_v59, 16  ;;  %v11633_v62 = vsel %vm7750_vm15, 4294967295, %v11632_v62  ;;  %v1321_v56 = vrot.slane %v1319_v22, 5  ;;  %v1261_v3 = vrot.slane %v1259_v25, 5 }
  0xb5   : > { %11634 = vst [vmem:[#allocation7_spill] sm:$0xff] %v11633_v62  ;;  %v1317_v53 = vrot.slane %v1316_v15, 4  ;;  %v1244_v15 = vrot.slane %v412_v51, 4 }
  0xb6   : > { %964 = vrot.lane.b32.xlu1 %v7571_v45, %s7378_s26 }
  0xb7   : > { %970 = vrot.lane.b32.xlu0 %v7527_v16, %s7378_s26 }
  0xba   : > { %972 = vrot.lane.b32.xlu1 %v7589_v59, %s7378_s26 }
  0xbb   : > { %960 = vrot.lane.b32.xlu0 %v7591_v60, %s7378_s26 }
  0xbe   : > { %2442 = vrot.lane.b32.xlu1 %v7545_v33, %s7377_s25 }
  0xbf   : > { %968 = vrot.lane.b32.xlu0 %v7613_v7, %s7378_s26 }
  0xc2   : > { %2450 = vrot.lane.b32.xlu1 %v7564_v42, %s7377_s25 }
  0xc3   : > { %2438 = vrot.lane.b32.xlu0 %v7568_v43, %s7377_s25 }
  0xc6   : > { %2444 = vrot.lane.b32.xlu1 %v7595_v61, %s7377_s25 }
  0xc7   : > { %2446 = vrot.lane.b32.xlu0 %v7549_v36, %s7377_s25 }
  0xca   : > { %2452 = vrot.lane.b32.xlu1 %v7617_v9, %s7377_s25 }
  0xcb   : > { %2714 = vrot.lane.b32.xlu0 %v7568_v43, %s7378_s26  ;;  %v2218_v43 = vcombine.low %v7677_v34, %v7680_v35 }
  0xce   : > { %2716 = vrot.lane.b32.xlu1 %v7605_v63, %s7378_s26 }
  0xcf   : > { %2718 = vrot.lane.b32.xlu0 %v7545_v33, %s7378_s26  ;;  %v7706_v33 = vrot.slane %v1270_v41, 5  ;;  %v1268_v41 = vor.u32 %v1267_v13, %v1264_v50  ;;  %v1304_v50 = vrot.slane %v419_v37, 4  ;;  %v1307_v13 = vrot.slane %v1305_v39, 5 }
  0xd1   : > { %v1276_v6 = vor.u32 %v1275_v46, %v7706_v33  ;;  %v1245_v46 = vshll.u32 %v7591_v60, 16  ;;  %v1269_v25 = vrot.slane %v1268_v41, 4 }
  0xd2   : > { %2720 = vrot.lane.b32.xlu1 %v7595_v61, %s7378_s26  ;;  %v1255_v61 = vrot.slane %v424_v47, 4 }
  0xd3   : > { %2722 = vrot.lane.b32.xlu0 %v7549_v36, %s7378_s26  ;;  %v7726_v36 = vrot.slane %v1250_v48, 5  ;;  %v1277_v27 = vrot.slane %v1276_v6, 4  ;;  %v1299_v6 = vshll.u32 %v7607_v1, 16  ;;  %v1247_v22 = vrot.slane %v1245_v46, 5 }
  0xd4   : > { %v7775_v1 = vsel %vm7750_vm15, %v1317_v53, %v1321_v56  ;;  %v7788_v53 = vsel %vm7750_vm15, %v1269_v25, %v7706_v33 }
  0xd5   : > { %v1256_v23 = vor.u32 %v1255_v61, %v7726_v36  ;;  %v7758_v48 = vsel %vm7750_vm15, %v1277_v27, %v1281_v14  ;;  %v1308_v27 = vor.u32 %v1307_v13, %v1304_v50  ;;  %v1248_v46 = vor.u32 %v1247_v22, %v1244_v15 }
  0xd6   : > { %2724 = vrot.lane.b32.xlu1 %v7621_v11, %s7378_s26  ;;  %v7380_v50 = vmov 1934713408   ;;  %v426_v15 = vpack.i.b16 %v425_v40, %v424_v47  ;;  %v417_v22 = vpack.i.b16 %v7589_v59, %v7613_v7 }
  0xd7   : > { %2726 = vrot.lane.b32.xlu0 %v7564_v42, %s7378_s26  ;;  %v1290_v42 = vshll.u32 %v7527_v16, 16  ;;  %v1257_v2 = vrot.slane %v1256_v23, 4  ;;  %v1249_v0 = vrot.slane %v1248_v46, 4 }
  0xd8   : > { %v542_v40 = vrot.slane %v426_v15, %v7652_v19 }
  0xd9   : > { %v1292_v61 = vrot.slane %v1290_v42, 5  ;;  %v7779_v23 = vsel %vm7750_vm15, %v1257_v2, %v1261_v3  ;;  %v1301_v42 = vrot.slane %v1299_v6, 5  ;;  %v7805_v33 = vsel %vm7750_vm15, %v1249_v0, %v7726_v36 }
  0xda   : > { %2728 = vrot.lane.b32.xlu1 %v7617_v9, %s7378_s26  ;;  %v418_v9 = vshrl.u32 %v7613_v7, 16  ;;  %v429_v6 = vpack.i.b16 %v7539_v31, %v7527_v16  ;;  %v452_v36 = vunpack.c.l.s4 %v7380_v50  ;;  %v448_v31 = vrot.slane %v417_v22, %v7652_v19 }
  0xdb   : > { %2440 = vrot.lane.b32.xlu0 %v7605_v63, %s7377_s25  ;;  %v1295_v63 = vrot.slane %v430_v17, 4  ;;  %v1339_v50 = vshrl.u32 %v7758_v48, 16 }
  0xdc   : > { %v1284_v39 = vrot.slane %v418_v9, 4  ;;  %v453_v25 = vunpack.c.0.s8 %v452_v36  ;;  %v420_v7 = vpack.i.b16 %v419_v37, %v418_v9  ;;  %v1337_v36 = vpack.i.b16 %v7758_v48, %v7779_v23 }
  0xdd   : > { %v1296_v14 = vor.u32 %v1295_v63, %v1292_v61  ;;  %v1309_v63 = vrot.slane %v1308_v27, 4 }
  0xde   : > { %1865 = vrot.lane.b32.xlu1 %v7758_v48, %s7378_s26  ;;  %v1288_v56 = vor.u32 %v1287_v4, %v1284_v39  ;;  %v423_v4 = vpack.i.b16 %v7516_v8, %v7541_v32  ;;  %v411_v32 = vpack.i.b16 %v7571_v45, %v7591_v60  ;;  %v7847_v47 = vsub.s32 %v453_v25, %v7645_v18 }
  0xdf   : > { %2448 = vrot.lane.b32.xlu0 %v7621_v11, %s7377_s25  ;;  %v1297_v11 = vrot.slane %v1296_v14, 4  ;;  %v7800_v2 = vsel %vm7750_vm15, %v1309_v63, %v1312_v12  ;;  %v516_v14 = vrot.slane %v429_v6, %v7652_v19  ;;  %v7862_v18 = vrot.slane %v420_v7, %v7652_v19 }
  0xe0   : > { %v1289_v3 = vrot.slane %v1288_v56, 4  ;;  %v508_v13 = vrot.slane %v423_v4, %v7652_v19  ;;  %v1345_v39 = vshrl.u32 %v7775_v1, 16  ;;  %v2320_v25 = vcombine.low %v7704_v49, %v7695_v44 }
  0xe1   : > { %v7792_v41 = vsel %vm7750_vm15, %v1297_v11, %v1301_v42 }
  0xe2   : > { %1873 = vrot.lane.b32.xlu1 %v7775_v1, %s7378_s26  ;;  %v7817_v12 = vsel %vm7750_vm15, %v1289_v3, %v1292_v61  ;;  %v432_v61 = vpack.i.b16 %v431_v52, %v430_v17  ;;  %v517_v8 = vcombine.low %v508_v13, %v516_v14  ;;  %v440_v52 = vrot.slane %v411_v32, %v7652_v19 }
  0xe3   : > { %1861 = vrot.lane.b32.xlu0 %v7779_v23, %s7378_s26  ;;  %v414_v17 = vpack.i.b16 %v413_v5, %v412_v51  ;;  %v518_v27 = vcombine.high %v508_v13, %v516_v14  ;;  %v1343_v11 = vpack.i.b16 %v7775_v1, %v7792_v41  ;;  %v1344_v46 = vshrl.u32 %v7792_v41, 16 }
  0xe4   : > { %v550_v16 = vrot.slane %v432_v61, %v7652_v19  ;;  %v7859_v42 = vrot.slane %v517_v8, %v7847_v47  ;;  %v449_v37 = vcombine.low %v440_v52, %v448_v31  ;;  %v450_v56 = vcombine.high %v440_v52, %v448_v31 }
  0xe5   : > { %v7869_v9 = vrot.slane %v414_v17, %v7652_v19  ;;  %v7890_v6 = vrot.slane %v518_v27, %v7847_v47  ;;  %v1346_v13 = vpack.i.b16 %v1345_v39, %v1344_v46  ;;  %v1430_v14 = vrot.slane %v1343_v11, %v7652_v19 }
  0xe6   : > { %1863 = vrot.lane.b32.xlu1 %v7788_v53, %s7378_s26  ;;  %11635 = vst [vmem:[#allocation8_spill] sm:$0xff] %v7859_v42  ;;  %v551_v59 = vcombine.low %v542_v40, %v550_v16  ;;  %v7257_v45 = vcombine.high %v7859_v42, %v7859_v42  ;;  %v7875_v5 = vrot.slane %v449_v37, %v7847_v47 }
  0xe7   : > { %1869 = vrot.lane.b32.xlu0 %v7792_v41, %s7378_s26  ;;  %v483_v51 = vcombine.low %v7869_v9, %v7862_v18  ;;  %v552_v63 = vcombine.high %v542_v40, %v550_v16  ;;  %v1331_v15 = vpack.i.b16 %v7800_v2, %v7817_v12  ;;  %v7909_v22 = vrot.slane %v450_v56, %v7847_v47 }
  0xe8   : > { %v559_v60 = vrot.slane %v551_v59, %v7847_v47  ;;  %11636 = vst [vmem:[#allocation9_spill] sm:$0xff] %v7875_v5  ;;  %v7253_v3 = vcombine.high %v7875_v5, %v7875_v5  ;;  %v1422_v8 = vrot.slane %v1337_v36, %v7652_v19  ;;  %v1326_v40 = vshrl.u32 %v7805_v33, 16 }
  0xe9   : > { %v491_v4 = vrot.slane %v483_v51, %v7847_v47  ;;  %v7904_v61 = vrot.slane %v552_v63, %v7847_v47  ;;  %v1333_v16 = vshrl.u32 %v7800_v2, 16  ;;  %v1362_v7 = vrot.slane %v1331_v15, %v7652_v19 }
  0xea   : > { %1871 = vrot.lane.b32.xlu1 %v7800_v2, %s7378_s26  ;;  %v7258_v0 = vcombine.high %v559_v60, %v559_v60  ;;  %v6968_v17 = vcombine.low %v7909_v22, %v7909_v22  ;;  %v7925_v59 = vrot.slane %v2320_v25, %v7847_v47  ;;  %v1464_v37 = vrot.slane %v1346_v13, %v7652_v19 }
  0xeb   : > { %1859 = vrot.lane.b32.xlu0 %v7805_v33, %s7378_s26  ;;  %v6976_v52 = vcombine.low %v7904_v61, %v7904_v61  ;;  %v6972_v11 = vcombine.low %v559_v60, %v559_v60 }
  0xec   : > { %v7060_v46 = vcombine.low %v7925_v59, %v7925_v59 }
  0xee   : > { %1589 = vrot.lane.b32.xlu1 %v7758_v48, %s7377_s25  ;;  %v7254_v48 = vcombine.high %v491_v4, %v491_v4 }
  0xef   : > { %1867 = vrot.lane.b32.xlu0 %v7817_v12, %s7378_s26 }
  0xf2   : > { %1597 = vrot.lane.b32.xlu1 %v7775_v1, %s7377_s25  ;;  %v1338_v1 = vshrl.u32 %v7779_v23, 16 }
  0xf3   : > { %1585 = vrot.lane.b32.xlu0 %v7779_v23, %s7377_s25  ;;  %v6975_v23 = vcombine.low %v7890_v6, %v7890_v6 }
  0xf4   : > { %v1340_v32 = vpack.i.b16 %v1339_v50, %v1338_v1 }
  0xf6   : > { %1587 = vrot.lane.b32.xlu1 %v7788_v53, %s7377_s25  ;;  %v1456_v51 = vrot.slane %v1340_v32, %v7652_v19 }
  0xf7   : > { %1593 = vrot.lane.b32.xlu0 %v7792_v41, %s7377_s25  ;;  %v1325_v41 = vpack.i.b16 %v7788_v53, %v7805_v33 }
  0xf9   : > { %v1354_v31 = vrot.slane %v1325_v41, %v7652_v19 }
  0xfa   : > { %1595 = vrot.lane.b32.xlu1 %v7800_v2, %s7377_s25  ;;  %v1332_v2 = vshrl.u32 %v7817_v12, 16 }
  0xfb   : > { %1583 = vrot.lane.b32.xlu0 %v7805_v33, %s7377_s25  ;;  %v1431_v33 = vcombine.low %v1422_v8, %v1430_v14  ;;  %v1363_v56 = vcombine.low %v1354_v31, %v1362_v7  ;;  %v1364_v13 = vcombine.high %v1354_v31, %v1362_v7 }
  0xfc   : > { %v1334_v39 = vpack.i.b16 %v1333_v16, %v1332_v2 }
  0xfd   : > { %v7936_v63 = vrot.slane %v1431_v33, %v7847_v47  ;;  %v7946_v36 = vrot.slane %v1363_v56, %v7847_v47  ;;  %v7962_v32 = vrot.slane %v1364_v13, %v7847_v47  ;;  %v7998_v56 = vrot.slane %v2252_v38, %v7847_v47 }
  0xfe   : > { %612 = vrot.lane.b32.xlu1 %v7257_v45, %s7381_s27  ;;  %v1327_v45 = vshrl.u32 %v7788_v53, 16  ;;  %v1465_v53 = vcombine.low %v1456_v51, %v1464_v37  ;;  %v1396_v41 = vrot.slane %v1334_v39, %v7652_v19 }
  0xff   : > { %1591 = vrot.lane.b32.xlu0 %v7817_v12, %s7377_s25  ;;  %11637 = vst [vmem:[#allocation10_spill] sm:$0xff] %v7936_v63  ;;  %v7281_v60 = vcombine.high %v7936_v63, %v7936_v63  ;;  %11638 = vst [vmem:[#allocation11_spill] sm:$0xff] %v7946_v36  ;;  %v7302_v20 = vcombine.high %v7998_v56, %v7998_v56 }
 0x100   : > { %v1328_v27 = vpack.i.b16 %v1327_v45, %v1326_v40  ;;  %v1473_v1 = vrot.slane %v1465_v53, %v7847_v47  ;;  %v7010_v45 = vcombine.low %v7962_v32, %v7962_v32  ;;  %v484_v53 = vcombine.high %v7869_v9, %v7862_v18 }
 0x102   : > { %617 = vrot.lane.b32.xlu1 %v7258_v0, %s7382_s28  ;;  %v6965_v0 = vcombine.low %v491_v4, %v491_v4  ;;  %v1388_v50 = vrot.slane %v1328_v27, %v7652_v19  ;;  %v7282_v31 = vcombine.high %v1473_v1, %v1473_v1  ;;  %v8013_v38 = vrot.slane %v484_v53, %v7847_v47 }
 0x103   : > { %577 = vrot.lane.b32.xlu0 %v7253_v3, %s7381_s27  ;;  %v1432_v3 = vcombine.high %v1422_v8, %v1430_v14  ;;  %v7277_v14 = vcombine.high %v7946_v36, %v7946_v36 }
 0x104   : > { %v1397_v25 = vcombine.low %v1388_v50, %v1396_v41  ;;  %v6969_v13 = vcombine.low %v8013_v38, %v8013_v38 }
 0x106   : > { %582 = vrot.lane.b32.xlu1 %v7254_v48, %s7382_s28  ;;  %v7014_v48 = vcombine.low %v1473_v1, %v1473_v1  ;;  %v1405_v7 = vrot.slane %v1397_v25, %v7847_v47  ;;  %v1398_v1 = vcombine.high %v1388_v50, %v1396_v41 }
 0x107   : > { %622 = vrot.lane.b32.xlu0 %v6975_v23, %s7383_s29  ;;  %v1446_v23 = vrot.slane %v1432_v3, %v7847_v47 }
 0x108   : > { %v7278_v2 = vcombine.high %v1405_v7, %v1405_v7 }
 0x109   : > { %v7017_v16 = vcombine.low %v1446_v23, %v1446_v23  ;;  %v7283_v25 = vcombine.high %v1446_v23, %v1446_v23 }
 0x10a   : > { %627 = vrot.lane.b32.xlu1 %v6976_v52, %s7384_s30  ;;  %v1466_v52 = vcombine.high %v1456_v51, %v1464_v37  ;;  %v7007_v37 = vcombine.low %v1405_v7, %v1405_v7 }
 0x10b   : > { %587 = vrot.lane.b32.xlu0 %v6968_v17, %s7383_s29 }
 0x10c   : > { %v7940_v12 = vpop.permute.xlu1 %690  ;;  %v7978_v27 = vrot.slane %v1466_v52, %v7847_v47 }
 0x10e   : > { %2376 = vrot.lane.b32.xlu1 %v7060_v46, %s7385_s6  ;;  %v7992_v46 = vrot.slane %v2286_v28, %v7847_v47 }
 0x10f   : > { %607 = vrot.lane.b32.xlu0 %v6972_v11, %s7385_s6  ;;  %v7018_v11 = vcombine.low %v7978_v27, %v7978_v27 }
 0x110   : > { %11639 = vst [vmem:[#allocation12_spill] sm:$0xff] %v7992_v46  ;;  %v7305_v28 = vcombine.high %v7992_v46, %v7992_v46 }
 0x112   : > { %1526 = vrot.lane.b32.xlu1 %v7281_v60, %s7381_s27  ;;  %v7053_v60 = vcombine.low %v7998_v56, %v7998_v56 }
 0x113   : > { %572 = vrot.lane.b32.xlu0 %v6965_v0, %s7385_s6 }
 0x114   : > { %v7952_v15 = vpop.permute.xlu1 %698 }
 0x115   : > { %v7954_v4 = vpop.permute.xlu0 %686 }
 0x116   : > { %1521 = vrot.lane.b32.xlu1 %v7014_v48, %s7385_s6  ;;  %v8026_v48 = vrot.slane %v1398_v1, %v7847_v47  ;;  %v7260_v1 = vcombine.high %v7904_v61, %v7904_v61 }
 0x117   : > { %1491 = vrot.lane.b32.xlu0 %v7277_v14, %s7381_s27  ;;  %v7259_v14 = vcombine.high %v7890_v6, %v7890_v6  ;;  %v8040_v6 = vrot.slane %v2218_v43, %v7847_v47 }
 0x118   : > { %v7964_v8 = vpop.permute.xlu1 %688 }
 0x119   : > { %v7966_v40 = vpop.permute.xlu0 %694  ;;  %11640 = vst [vmem:[#allocation13_spill] sm:$0xff] %v8040_v6  ;;  %v7301_v43 = vcombine.high %v8040_v6, %v8040_v6 }
 0x11a   : > { %1531 = vrot.lane.b32.xlu1 %v7282_v31, %s7382_s28  ;;  %v720_v31 = vpack.i.b16 %v7952_v15, %v7966_v40 }
 0x11b   : > { %1536 = vrot.lane.b32.xlu0 %v7017_v16, %s7383_s29  ;;  %v7011_v16 = vcombine.low %v8026_v48, %v8026_v48 }
 0x11c   : > { %v7971_v17 = vpop.permute.xlu1 %696 }
 0x11d   : > { %v7973_v33 = vpop.permute.xlu0 %684 }
 0x11e   : > { %1496 = vrot.lane.b32.xlu1 %v7278_v2, %s7382_s28  ;;  %v714_v2 = vpack.i.b16 %v7940_v12, %v7954_v4 }
 0x11f   : > { %1501 = vrot.lane.b32.xlu0 %v7010_v45, %s7383_s29  ;;  %v7306_v45 = vcombine.high %v7925_v59, %v7925_v59 }
 0x120   : > { %v7982_v51 = vpop.permute.xlu1 %966 }
 0x121   : > { %v7984_v39 = vpop.permute.xlu0 %692 }
 0x122   : > { %1541 = vrot.lane.b32.xlu1 %v7018_v11, %s7384_s30  ;;  %v708_v7 = vpack.i.b16 %v7971_v17, %v7984_v39  ;;  %v807_v11 = vrot.slane %v720_v31, %v7652_v19 }
 0x123   : > { %1486 = vrot.lane.b32.xlu0 %v7007_v37, %s7385_s6  ;;  %v702_v37 = vpack.i.b16 %v7964_v8, %v7973_v33 }
 0x124   : > { %v8004_v0 = vpop.permute.xlu1 %974  ;;  %v8064_v53 = vrot.slane %v708_v7, %v7652_v19 }
 0x125   : > { %v8006_v3 = vpop.permute.xlu0 %962 }
 0x126   : > { %2341 = vrot.lane.b32.xlu1 %v7053_v60, %s7385_s6 }
 0x127   : > { %2381 = vrot.lane.b32.xlu0 %v7305_v28, %s7381_s27 }
 0x128   : > { %v8017_v18 = vpop.permute.xlu1 %964 }
 0x129   : > { %v8019_v9 = vpop.permute.xlu0 %970 }
 0x12a   : > { %632 = vrot.lane.b32.xlu1 %v7259_v14, %s7386_s7  ;;  %v996_v59 = vpack.i.b16 %v8004_v0, %v8019_v9  ;;  %v799_v14 = vrot.slane %v714_v2, %v7652_v19 }
 0x12b   : > { %592 = vrot.lane.b32.xlu0 %v6969_v13, %s7384_s30  ;;  %v7255_v13 = vcombine.high %v7909_v22, %v7909_v22  ;;  %v7279_v22 = vcombine.high %v7962_v32, %v7962_v32  ;;  %v8103_v32 = vrot.slane %v2287_v55, %v7847_v47 }
 0x12c   : > { %v8030_v50 = vpop.permute.xlu1 %972  ;;  %v808_v7 = vcombine.low %v799_v14, %v807_v11  ;;  %v1083_v2 = vrot.slane %v996_v59, %v7652_v19  ;;  %v809_v62 = vcombine.high %v799_v14, %v807_v11 }
 0x12d   : > { %v8032_v41 = vpop.permute.xlu0 %960 }
 0x12e   : > { %1506 = vrot.lane.b32.xlu1 %v7011_v16, %s7384_s30  ;;  %v990_v16 = vpack.i.b16 %v7982_v51, %v8006_v3  ;;  %v978_v21 = vpack.i.b16 %v8017_v18, %v8032_v41  ;;  %v8115_v24 = vrot.slane %v808_v7, %v7847_v47 }
 0x12f   : > { %1546 = vrot.lane.b32.xlu0 %v7283_v25, %s7386_s7  ;;  %v8078_v25 = vrot.slane %v702_v37, %v7652_v19 }
 0x130   : > { %v8048_v23 = vpop.permute.xlu1 %2442  ;;  %v1075_v59 = vrot.slane %v990_v16, %v7652_v19  ;;  %11641 = vst [vmem:[#allocation14_spill] sm:$0xff] %v8115_v24  ;;  %v1007_v11 = vrot.slane %v978_v21, %v7652_v19  ;;  %v7265_v7 = vcombine.high %v8115_v24, %v8115_v24 }
 0x131   : > { %v8050_v52 = vpop.permute.xlu0 %968  ;;  %v2458_v61 = vshrl.u32 %v8048_v23, 16 }
 0x132   : > { %2346 = vrot.lane.b32.xlu1 %v7301_v43, %s7381_s27  ;;  %v740_v43 = vcombine.low %v8078_v25, %v8064_v53  ;;  %v984_v37 = vpack.i.b16 %v8030_v50, %v8050_v52  ;;  %v1084_v55 = vcombine.low %v1075_v59, %v1083_v2 }
 0x133   : > { %2386 = vrot.lane.b32.xlu0 %v7306_v45, %s7382_s28  ;;  %v7284_v45 = vcombine.high %v7978_v27, %v7978_v27 }
 0x134   : > { %v8068_v28 = vpop.permute.xlu1 %2450 }
 0x135   : > { %v8070_v60 = vpop.permute.xlu0 %2438  ;;  %v2464_v27 = vshrl.u32 %v8068_v28, 16 }
 0x136   : > { %v2457_v31 = vshrl.u32 %v8070_v60, 16  ;;  %597 = vrot.lane.b32.xlu1 %v7255_v13, %s7386_s7 }
 0x137   : > { %637 = vrot.lane.b32.xlu0 %v7260_v1, %s7387_s8 }
 0x138   : > { %v8095_v1 = vpop.permute.xlu1 %2444  ;;  %v2459_v58 = vpack.i.b16 %v2458_v61, %v2457_v31  ;;  %v1015_v31 = vrot.slane %v984_v37, %v7652_v19 }
 0x139   : > { %v8097_v13 = vpop.permute.xlu0 %2446 }
 0x13a   : > { %v2463_v57 = vshrl.u32 %v8097_v13, 16  ;;  %1551 = vrot.lane.b32.xlu1 %v7284_v45, %s7387_s8  ;;  %v8125_v45 = vrot.slane %v740_v43, %v7847_v47  ;;  %v8141_v43 = vrot.slane %v809_v62, %v7847_v47  ;;  %v1016_v37 = vcombine.low %v1007_v11, %v1015_v31 }
 0x13b   : > { %1511 = vrot.lane.b32.xlu0 %v7279_v22, %s7386_s7  ;;  %v7063_v22 = vcombine.low %v8103_v32, %v8103_v32  ;;  %v721_v62 = vshrl.u32 %v7966_v40, 16  ;;  %v1017_v54 = vcombine.high %v1007_v11, %v1015_v31  ;;  %v716_v31 = vshrl.u32 %v7940_v12, 16 }
 0x13c   : > { %v2465_v10 = vpack.i.b16 %v2464_v27, %v2463_v57  ;;  %v8118_v61 = vpop.permute.xlu1 %2452  ;;  %11643 = vst [vmem:[#allocation16_spill] sm:$0xff] %v8125_v45  ;;  %v8128_v57 = vrot.slane %v2459_v58, %v7652_v19  ;;  %v1085_v58 = vcombine.high %v1075_v59, %v1083_v2  ;;  %v7261_v21 = vcombine.high %v8125_v45, %v8125_v45 }
 0x13d   : > { %v8120_v16 = vpop.permute.xlu0 %2714  ;;  %v709_v2 = vshrl.u32 %v7984_v39, 16  ;;  %v741_v59 = vcombine.high %v8078_v25, %v8064_v53  ;;  %v6989_v14 = vcombine.low %v8141_v43, %v8141_v43  ;;  %v8169_v40 = vrot.slane %v1016_v37, %v7847_v47 }
 0x13e   : > { %11642 = vst [vmem:[#allocation15_spill] sm:$0xff] %v8120_v16  ;;  %v8131_v56 = vrot.slane %v2465_v10, %v7652_v19  ;;  %2391 = vrot.lane.b32.xlu1 %v7063_v22, %s7383_s29  ;;  %v722_v22 = vshrl.u32 %v7952_v15, 16  ;;  %v715_v39 = vshrl.u32 %v7954_v4, 16  ;;  %v710_v53 = vshrl.u32 %v7971_v17, 16 }
 0x13f   : > { %2351 = vrot.lane.b32.xlu0 %v7302_v20, %s7382_s28  ;;  %v8150_v20 = vrot.slane %v1084_v55, %v7847_v47  ;;  %11648 = vst [vmem:[#allocation21_spill] sm:$0xff] %v8169_v40  ;;  %v703_v25 = vshrl.u32 %v7973_v33, 16  ;;  %v704_v11 = vshrl.u32 %v7964_v8, 16  ;;  %v997_v37 = vshrl.u32 %v8019_v9, 16 }
 0x140   : > { %v8143_v27 = vpop.permute.xlu1 %2716  ;;  %v711_v6 = vpack.i.b16 %v710_v53, %v709_v2  ;;  %v7269_v12 = vcombine.high %v8169_v40, %v8169_v40  ;;  %v1031_v33 = vrot.slane %v1017_v54, %v7847_v47  ;;  %v991_v8 = vshrl.u32 %v8006_v3, 16 }
 0x141   : > { %11644 = vst [vmem:[#allocation17_spill] sm:$0xff] %v8143_v27  ;;  %v8145_v10 = vpop.permute.xlu0 %2718  ;;  %11646 = vst [vmem:[#allocation19_spill] sm:$0xff] %v8150_v20  ;;  %v7273_v15 = vcombine.high %v8150_v20, %v8150_v20  ;;  %v985_v54 = vshrl.u32 %v8050_v52, 16 }
 0x142   : > { %11645 = vst [vmem:[#allocation18_spill] sm:$0xff] %v8145_v10  ;;  %868 = vrot.lane.b32.xlu1 %v7261_v21, %s7381_s27  ;;  %v723_v21 = vpack.i.b16 %v722_v22, %v721_v62  ;;  %v998_v22 = vshrl.u32 %v8004_v0, 16  ;;  %v992_v62 = vshrl.u32 %v7982_v51, 16  ;;  %v8196_v2 = vrot.slane %v711_v6, %v7652_v19 }
 0x143   : > { %903 = vrot.lane.b32.xlu0 %v7265_v7, %s7381_s27  ;;  %v1099_v7 = vrot.slane %v1085_v58, %v7847_v47  ;;  %v755_v58 = vrot.slane %v741_v59, %v7847_v47  ;;  %v6996_v0 = vcombine.low %v1031_v33, %v1031_v33  ;;  %v986_v51 = vshrl.u32 %v8030_v50, 16 }
 0x144   : > { %v8161_v26 = vpop.permute.xlu1 %2720  ;;  %v8192_v9 = vrot.slane %v723_v21, %v7652_v19  ;;  %v999_v59 = vpack.i.b16 %v998_v22, %v997_v37  ;;  %v979_v6 = vshrl.u32 %v8032_v41, 16 }
 0x145   : > { %v8163_v55 = vpop.permute.xlu0 %2722  ;;  %v7003_v17 = vcombine.low %v1099_v7, %v1099_v7  ;;  %v6982_v53 = vcombine.low %v755_v58, %v755_v58  ;;  %v987_v41 = vpack.i.b16 %v986_v51, %v985_v54  ;;  %v7275_v22 = vcombine.high %v1099_v7, %v1099_v7 }
 0x146   : > { %11647 = vst [vmem:[#allocation20_spill] sm:$0xff] %v8163_v55  ;;  %913 = vrot.lane.b32.xlu1 %v6989_v14, %s7383_s29  ;;  %v717_v14 = vpack.i.b16 %v716_v31, %v715_v39  ;;  %v1117_v50 = vrot.slane %v999_v59, %v7652_v19 }
 0x147   : > { %1179 = vrot.lane.b32.xlu0 %v7273_v15, %s7381_s27  ;;  %v705_v15 = vpack.i.b16 %v704_v11, %v703_v25  ;;  %v993_v11 = vpack.i.b16 %v992_v62, %v991_v8  ;;  %v1049_v7 = vrot.slane %v987_v41, %v7652_v19 }
 0x148   : > { %v8180_v46 = vpop.permute.xlu1 %2724  ;;  %v8204_v25 = vrot.slane %v717_v14, %v7652_v19  ;;  %v2470_v14 = vshrl.u32 %v8095_v1, 16 }
 0x149   : > { %v8182_v4 = vpop.permute.xlu0 %2726  ;;  %v8207_v31 = vrot.slane %v705_v15, %v7652_v19  ;;  %v1109_v62 = vrot.slane %v993_v11, %v7652_v19 }
 0x14a   : > { %11649 = vst [vmem:[#allocation22_spill] sm:$0xff] %v8182_v4  ;;  %1189 = vrot.lane.b32.xlu1 %v7003_v17, %s7383_s29  ;;  %v842_v52 = vcombine.low %v8204_v25, %v8192_v9  ;;  %v980_v17 = vshrl.u32 %v8017_v18, 16 }
 0x14b   : > { %1144 = vrot.lane.b32.xlu0 %v7269_v12, %s7381_s27  ;;  %v774_v37 = vcombine.low %v8207_v31, %v8196_v2  ;;  %v7267_v12 = vcombine.high %v8141_v43, %v8141_v43  ;;  %v7263_v43 = vcombine.high %v755_v58, %v755_v58  ;;  %v1118_v51 = vcombine.low %v1109_v62, %v1117_v50 }
 0x14c   : > { %v8199_v39 = vpop.permute.xlu1 %2728  ;;  %v850_v54 = vrot.slane %v842_v52, %v7847_v47 }
 0x14d   : > { %v8201_v3 = vpop.permute.xlu0 %2440  ;;  %v782_v59 = vrot.slane %v774_v37, %v7847_v47 }
 0x14e   : > { %v2469_v21 = vshrl.u32 %v8201_v3, 16  ;;  %1154 = vrot.lane.b32.xlu1 %v6996_v0, %s7383_s29  ;;  %v981_v0 = vpack.i.b16 %v980_v17, %v979_v6  ;;  %v6986_v52 = vcombine.low %v850_v54, %v850_v54 }
 0x14f   : > { %878 = vrot.lane.b32.xlu0 %v6982_v53, %s7383_s29  ;;  %v2476_v53 = vshrl.u32 %v8118_v61, 16  ;;  %v7262_v40 = vcombine.high %v782_v59, %v782_v59 }
 0x150   : > { %v8223_v15 = vpop.permute.xlu1 %1865  ;;  %v2471_v5 = vpack.i.b16 %v2470_v14, %v2469_v21  ;;  %v7271_v21 = vcombine.high %v1031_v33, %v1031_v33  ;;  %v1041_v17 = vrot.slane %v981_v0, %v7652_v19 }
 0x151   : > { %v8225_v8 = vpop.permute.xlu0 %2448 }
 0x152   : > { %v2475_v18 = vshrl.u32 %v8225_v8, 16  ;;  %1199 = vrot.lane.b32.xlu1 %v7275_v22, %s7386_s7  ;;  %v8241_v14 = vrot.slane %v2471_v5, %v7652_v19  ;;  %v1050_v37 = vcombine.low %v1041_v17, %v1049_v7  ;;  %v6979_v22 = vcombine.low %v782_v59, %v782_v59 }
 0x153   : > { %923 = vrot.lane.b32.xlu0 %v7267_v12, %s7386_s7  ;;  %v1126_v5 = vrot.slane %v1118_v51, %v7847_v47  ;;  %v1119_v51 = vcombine.high %v1109_v62, %v1117_v50  ;;  %v2474_v62 = vpack.i.b16 %v8118_v61, %v8225_v8 }
 0x154   : > { %v2477_v36 = vpack.i.b16 %v2476_v53, %v2475_v18  ;;  %v8235_v11 = vpop.permute.xlu1 %1873  ;;  %v7266_v18 = vcombine.high %v850_v54, %v850_v54  ;;  %v775_v54 = vcombine.high %v8207_v31, %v8196_v2  ;;  %v2468_v2 = vpack.i.b16 %v8095_v1, %v8201_v3 }
 0x155   : > { %v8237_v6 = vpop.permute.xlu0 %1861  ;;  %v7000_v53 = vcombine.low %v1126_v5, %v1126_v5  ;;  %v1133_v50 = vrot.slane %v1119_v51, %v7847_v47  ;;  %v2528_v1 = vcombine.low %v8128_v57, %v8131_v56 }
 0x156   : > { %v8244_v58 = vrot.slane %v2477_v36, %v7652_v19  ;;  %1164 = vrot.lane.b32.xlu1 %v7271_v21, %s7386_s7  ;;  %v843_v21 = vcombine.high %v8204_v25, %v8192_v9  ;;  %v7274_v9 = vcombine.high %v1126_v5, %v1126_v5  ;;  %v8300_v3 = vrot.slane %v2468_v2, %v7652_v19 }
 0x157   : > { %888 = vrot.lane.b32.xlu0 %v7263_v43, %s7386_s7  ;;  %v1058_v43 = vrot.slane %v1050_v37, %v7847_v47  ;;  %v8321_v42 = vrot.slane %v2528_v1, %v7847_v47 }
 0x158   : > { %v8250_v41 = vpop.permute.xlu1 %1863  ;;  %v857_v37 = vrot.slane %v843_v21, %v7847_v47  ;;  %v2596_v24 = vcombine.low %v8241_v14, %v8244_v58 }
 0x159   : > { %v8252_v33 = vpop.permute.xlu0 %1869  ;;  %v7270_v25 = vcombine.high %v1058_v43, %v1058_v43 }
 0x15a   : > { %863 = vrot.lane.b32.xlu1 %v6979_v22, %s7385_s6  ;;  %v1895_v61 = vpack.i.b16 %v8235_v11, %v8252_v33  ;;  %v7268_v63 = vcombine.high %v857_v37, %v857_v37 }
 0x15b   : > { %898 = vrot.lane.b32.xlu0 %v6986_v52, %s7385_s6  ;;  %v6993_v52 = vcombine.low %v1058_v43, %v1058_v43  ;;  %v8291_v43 = vrot.slane %v2474_v62, %v7652_v19 }
 0x15c   : > { %v8257_v36 = vpop.permute.xlu1 %1871 }
 0x15d   : > { %v8259_v0 = vpop.permute.xlu0 %1859 }
 0x15e   : > { %1174 = vrot.lane.b32.xlu1 %v7000_v53, %s7385_s6  ;;  %v1051_v53 = vcombine.high %v1041_v17, %v1049_v7  ;;  %v7004_v7 = vcombine.low %v1133_v50, %v1133_v50  ;;  %v789_v17 = vrot.slane %v775_v54, %v7847_v47  ;;  %v1889_v54 = vpack.i.b16 %v8223_v15, %v8237_v6 }
 0x15f   : > { %908 = vrot.lane.b32.xlu0 %v7266_v18, %s7382_s28 }
 0x160   : > { %v8266_v12 = vpop.permute.xlu1 %1589  ;;  %v1065_v5 = vrot.slane %v1051_v53, %v7847_v47  ;;  %v6983_v51 = vcombine.low %v789_v17, %v789_v17  ;;  %v2562_v53 = vcombine.low %v8300_v3, %v8291_v43  ;;  %v7264_v20 = vcombine.high %v789_v17, %v789_v17 }
 0x161   : > { %v1868_v22 = vpop.permute.xlu0 %1867 }
 0x162   : > { %1139 = vrot.lane.b32.xlu1 %v6993_v52, %s7385_s6  ;;  %v6997_v52 = vcombine.low %v1065_v5, %v1065_v5  ;;  %v1884_v62 = vshrl.u32 %v1868_v22, 16  ;;  %v8337_v17 = vrot.slane %v2562_v53, %v7847_v47  ;;  %v7276_v53 = vcombine.high %v1133_v50, %v1133_v50 }
 0x163   : > { %873 = vrot.lane.b32.xlu0 %v7262_v40, %s7382_s28  ;;  %v6990_v40 = vcombine.low %v857_v37, %v857_v37  ;;  %v8365_v50 = vrot.slane %v2596_v24, %v7847_v47 }
 0x164   : > { %v8273_v18 = vpop.permute.xlu1 %1597  ;;  %11651 = vst [vmem:[#allocation24_spill] sm:$0xff] %v8337_v17 }
 0x165   : > { %v8275_v45 = vpop.permute.xlu0 %1585 }
 0x166   : > { %1184 = vrot.lane.b32.xlu1 %v7274_v9, %s7382_s28  ;;  %v8313_v9 = vrot.slane %v1895_v61, %v7652_v19  ;;  %v1885_v61 = vshrl.u32 %v8257_v36, 16  ;;  %v1613_v37 = vpack.i.b16 %v8266_v12, %v8275_v45 }
 0x167   : > { %1149 = vrot.lane.b32.xlu0 %v7270_v25, %s7382_s28  ;;  %v1883_v25 = vpack.i.b16 %v8257_v36, %v1868_v22  ;;  %v1878_v22 = vshrl.u32 %v8259_v0, 16  ;;  %v1879_v36 = vshrl.u32 %v8250_v41, 16 }
 0x168   : > { %v8284_v31 = vpop.permute.xlu1 %1587 }
 0x169   : > { %v8286_v59 = vpop.permute.xlu0 %1593  ;;  %v1880_v10 = vpack.i.b16 %v1879_v36, %v1878_v22  ;;  %v7313_v22 = vcombine.high %v8337_v17, %v8337_v17  ;;  %v1603_v36 = vshrl.u32 %v8284_v31, 16 }
 0x16a   : > { %918 = vrot.lane.b32.xlu1 %v6990_v40, %s7384_s30  ;;  %v1619_v40 = vpack.i.b16 %v8273_v18, %v8286_v59 }
 0x16b   : > { %1194 = vrot.lane.b32.xlu0 %v7004_v7, %s7384_s30  ;;  %v8387_v27 = vrot.slane %v1880_v10, %v7652_v19 }
 0x16c   : > { %v8302_v8 = vpop.permute.xlu1 %1595 }
 0x16d   : > { %v8304_v21 = vpop.permute.xlu0 %1583 }
 0x16e   : > { %883 = vrot.lane.b32.xlu1 %v6983_v51, %s7384_s30  ;;  %v8324_v51 = vrot.slane %v1889_v54, %v7652_v19  ;;  %v1886_v54 = vpack.i.b16 %v1885_v61, %v1884_v62  ;;  %v7067_v62 = vcombine.low %v8321_v42, %v8321_v42  ;;  %v1602_v61 = vshrl.u32 %v8304_v21, 16 }
 0x16f   : > { %1159 = vrot.lane.b32.xlu0 %v6997_v52, %s7384_s30  ;;  %v1877_v52 = vpack.i.b16 %v8250_v41, %v8259_v0  ;;  %v8343_v0 = vrot.slane %v1883_v25, %v7652_v19  ;;  %v8358_v25 = vrot.slane %v1613_v37, %v7652_v19  ;;  %v1601_v17 = vpack.i.b16 %v8284_v31, %v8304_v21 }
 0x170   : > { %v8318_v2 = vpop.permute.xlu1 %612  ;;  %v1983_v1 = vcombine.low %v8324_v51, %v8313_v9  ;;  %v1604_v4 = vpack.i.b16 %v1603_v36, %v1602_v61  ;;  %v1620_v31 = vshrl.u32 %v8286_v59, 16  ;;  %v1890_v61 = vshrl.u32 %v8237_v6, 16 }
 0x171   : > { %11650 = vst [vmem:[#allocation23_spill] sm:$0xff] %v8318_v2  ;;  %v1592_v7 = vpop.permute.xlu0 %1591  ;;  %v8346_v2 = vrot.slane %v1619_v40, %v7652_v19  ;;  %v8353_v41 = vrot.slane %v1877_v52, %v7652_v19  ;;  %v1609_v40 = vshrl.u32 %v8302_v8, 16  ;;  %v8370_v52 = vrot.slane %v1886_v54, %v7652_v19 }
 0x172   : > { %928 = vrot.lane.b32.xlu1 %v7268_v63, %s7387_s8  ;;  %v1608_v16 = vshrl.u32 %v1592_v7, 16  ;;  %v8375_v37 = vrot.slane %v1983_v1, %v7847_v47  ;;  %v1607_v24 = vpack.i.b16 %v8302_v8, %v1592_v7  ;;  %v1896_v54 = vshrl.u32 %v8252_v33, 16 }
 0x173   : > { %893 = vrot.lane.b32.xlu0 %v7264_v20, %s7387_s8  ;;  %v7272_v20 = vcombine.high %v1065_v5, %v1065_v5  ;;  %v1915_v5 = vcombine.low %v8353_v41, %v8343_v0  ;;  %v1897_v1 = vshrl.u32 %v8235_v11, 16  ;;  %v1984_v8 = vcombine.high %v8324_v51, %v8313_v9 }
 0x174   : > { %v8348_v55 = vpop.permute.xlu1 %617  ;;  %11654 = vst [vmem:[#allocation27_spill] sm:$0xff] %v8375_v37  ;;  %v1949_v10 = vcombine.low %v8387_v27, %v8370_v52  ;;  %v7297_v11 = vcombine.high %v8375_v37, %v8375_v37  ;;  %v8407_v21 = vrot.slane %v1607_v24, %v7652_v19  ;;  %v1621_v59 = vshrl.u32 %v8273_v18, 16 }
 0x175   : > { %11652 = vst [vmem:[#allocation25_spill] sm:$0xff] %v8348_v55  ;;  %v8350_v63 = vpop.permute.xlu0 %577  ;;  %v8403_v33 = vrot.slane %v1915_v5, %v7847_v47  ;;  %v1898_v5 = vpack.i.b16 %v1897_v1, %v1896_v54  ;;  %v8424_v36 = vrot.slane %v1601_v17, %v7652_v19  ;;  %v8427_v24 = vrot.slane %v1604_v4, %v7652_v19 }
 0x176   : > { %11653 = vst [vmem:[#allocation26_spill] sm:$0xff] %v8350_v63  ;;  %1169 = vrot.lane.b32.xlu1 %v7272_v20, %s7387_s8  ;;  %v1707_v20 = vcombine.low %v8358_v25, %v8346_v2  ;;  %v1957_v6 = vrot.slane %v1949_v10, %v7847_v47  ;;  %v8436_v18 = vrot.slane %v1984_v8, %v7847_v47 }
 0x177   : > { %1204 = vrot.lane.b32.xlu0 %v7276_v53, %s7387_s8  ;;  %v1610_v53 = vpack.i.b16 %v1609_v40, %v1608_v16  ;;  %v7074_v16 = vcombine.low %v8365_v50, %v8365_v50  ;;  %11655 = vst [vmem:[#allocation28_spill] sm:$0xff] %v8403_v33  ;;  %v1891_v40 = vshrl.u32 %v8223_v15, 16  ;;  %v7293_v15 = vcombine.high %v8403_v33, %v8403_v33 }
 0x178   : > { %v8381_v63 = vpop.permute.xlu1 %582  ;;  %v8417_v51 = vrot.slane %v1707_v20, %v7847_v47  ;;  %v1615_v20 = vshrl.u32 %v8266_v12, 16  ;;  %v1639_v17 = vcombine.low %v8424_v36, %v8407_v21  ;;  %v2016_v8 = vrot.slane %v1898_v5, %v7652_v19 }
 0x179   : > { %v8383_v55 = vpop.permute.xlu0 %622  ;;  %v8410_v7 = vrot.slane %v1610_v53, %v7652_v19  ;;  %v1892_v1 = vpack.i.b16 %v1891_v40, %v1890_v61  ;;  %v1916_v10 = vcombine.high %v8353_v41, %v8343_v0  ;;  %v7035_v40 = vcombine.low %v1957_v6, %v1957_v6 }
 0x17a   : > { %2617 = vrot.lane.b32.xlu1 %v7067_v62, %s7385_s6  ;;  %11657 = vst [vmem:[#allocation30_spill] sm:$0xff] %v8417_v51  ;;  %v7289_v12 = vcombine.high %v8417_v51, %v8417_v51 }
 0x17b   : > { %2657 = vrot.lane.b32.xlu0 %v7313_v22, %s7381_s27  ;;  %v1614_v22 = vshrl.u32 %v8275_v45, 16  ;;  %v1622_v45 = vpack.i.b16 %v1621_v59, %v1620_v31  ;;  %v1673_v4 = vcombine.low %v8427_v24, %v8410_v7  ;;  %v2008_v5 = vrot.slane %v1892_v1, %v7652_v19 }
 0x17c   : > { %v8412_v62 = vpop.permute.xlu1 %627  ;;  %v2462_v1 = vpack.i.b16 %v8068_v28, %v8097_v13 }
 0x17d   : > { %v8414_v9 = vpop.permute.xlu0 %587  ;;  %v8456_v31 = vrot.slane %v1622_v45, %v7652_v19  ;;  %v8463_v61 = vrot.slane %v1673_v4, %v7847_v47  ;;  %v2017_v41 = vcombine.low %v2008_v5, %v2016_v8 }
 0x17e   : > { %11656 = vst [vmem:[#allocation29_spill] sm:$0xff] %v8414_v9  ;;  %2652 = vrot.lane.b32.xlu1 %v7074_v16, %s7385_s6  ;;  %v1616_v16 = vpack.i.b16 %v1615_v20, %v1614_v22  ;;  %v8466_v22 = vrot.slane %v1639_v17, %v7847_v47  ;;  %v8504_v28 = vrot.slane %v2462_v1, %v7652_v19 }
 0x17f   : > { %2078 = vrot.lane.b32.xlu0 %v7297_v11, %s7381_s27  ;;  %v7045_v11 = vcombine.low %v8436_v18, %v8436_v18  ;;  %v7021_v17 = vcombine.low %v8463_v61, %v8463_v61  ;;  %v1708_v1 = vcombine.high %v8358_v25, %v8346_v2  ;;  %v7280_v2 = vcombine.high %v8026_v48, %v8026_v48 }
 0x180   : > { %v8442_v53 = vpop.permute.xlu1 %2376  ;;  %11659 = vst [vmem:[#allocation32_spill] sm:$0xff] %v8466_v22  ;;  %v8470_v0 = vrot.slane %v1616_v16, %v7652_v19  ;;  %v7285_v4 = vcombine.high %v8466_v22, %v8466_v22  ;;  %v2018_v16 = vcombine.high %v2008_v5, %v2016_v8 }
 0x181   : > { %11658 = vst [vmem:[#allocation31_spill] sm:$0xff] %v8442_v53  ;;  %v8444_v54 = vpop.permute.xlu0 %607  ;;  %v7294_v53 = vcombine.high %v1957_v6, %v1957_v6 }
 0x182   : > { %2043 = vrot.lane.b32.xlu1 %v7293_v15, %s7381_s27  ;;  %v1741_v20 = vcombine.low %v8470_v0, %v8456_v31 }
 0x183   : > { %1802 = vrot.lane.b32.xlu0 %v7289_v12, %s7381_s27  ;;  %v8485_v12 = vrot.slane %v1916_v10, %v7847_v47  ;;  %v2025_v10 = vrot.slane %v2017_v41, %v7847_v47 }
 0x184   : > { %v8458_v59 = vpop.permute.xlu1 %1526  ;;  %v1749_v22 = vrot.slane %v1741_v20, %v7847_v47  ;;  %v8511_v20 = vrot.slane %v2018_v16, %v7847_v47 }
 0x185   : > { %v8460_v33 = vpop.permute.xlu0 %572  ;;  %v7038_v51 = vcombine.low %v8485_v12, %v8485_v12  ;;  %v7042_v5 = vcombine.low %v2025_v10, %v2025_v10 }
 0x186   : > { %2038 = vrot.lane.b32.xlu1 %v7035_v40, %s7385_s6  ;;  %v7290_v8 = vcombine.high %v1749_v22, %v1749_v22 }
 0x187   : > { %2088 = vrot.lane.b32.xlu0 %v7045_v11, %s7383_s29 }
 0x188   : > { %v8476_v15 = vpop.permute.xlu1 %1521 }
 0x189   : > { %v8478_v45 = vpop.permute.xlu0 %1491 }
 0x18a   : > { %1762 = vrot.lane.b32.xlu1 %v7021_v17, %s7385_s6  ;;  %v2456_v17 = vpack.i.b16 %v8048_v23, %v8070_v60 }
 0x18b   : > { %1767 = vrot.lane.b32.xlu0 %v7285_v4, %s7381_s27  ;;  %v7028_v4 = vcombine.low %v1749_v22, %v1749_v22 }
 0x18c   : > { %v8491_v11 = vpop.permute.xlu1 %1531  ;;  %v8514_v41 = vrot.slane %v2456_v17, %v7652_v19 }
 0x18d   : > { %v8493_v40 = vpop.permute.xlu0 %1536 }
 0x18e   : > { %2048 = vrot.lane.b32.xlu1 %v7294_v53, %s7382_s28  ;;  %v2494_v23 = vcombine.low %v8514_v41, %v8504_v28  ;;  %v7046_v53 = vcombine.low %v8511_v20, %v8511_v20 }
 0x18f   : > { %2053 = vrot.lane.b32.xlu0 %v7038_v51, %s7383_s29 }
 0x190   : > { %v8506_v13 = vpop.permute.xlu1 %1496  ;;  %v8537_v37 = vrot.slane %v2494_v23, %v7847_v47 }
 0x191   : > { %v8508_v6 = vpop.permute.xlu0 %1501 }
 0x192   : > { %1807 = vrot.lane.b32.xlu1 %v7290_v8, %s7382_s28  ;;  %v7314_v8 = vcombine.high %v8365_v50, %v8365_v50  ;;  %11662 = vst [vmem:[#allocation35_spill] sm:$0xff] %v8537_v37  ;;  %v7309_v25 = vcombine.high %v8537_v37, %v8537_v37  ;;  %v8550_v50 = vrot.slane %v1708_v1, %v7847_v47 }
 0x193   : > { %2073 = vrot.lane.b32.xlu0 %v7042_v5, %s7385_s6  ;;  %v7298_v5 = vcombine.high %v2025_v10, %v2025_v10  ;;  %v1950_v10 = vcombine.high %v8387_v27, %v8370_v52  ;;  %v11665_v1 = vcombine.high %v7704_v49, %v7695_v44  ;;  %v2563_v27 = vcombine.high %v8300_v3, %v8291_v43 }
 0x194   : > { %v8520_v60 = vpop.permute.xlu1 %1541  ;;  %v7031_v48 = vcombine.low %v8550_v50, %v8550_v50  ;;  %v11668_v44 = vcombine.high %v7677_v34, %v7680_v35  ;;  %v1742_v43 = vcombine.high %v8470_v0, %v8456_v31  ;;  %v1640_v34 = vcombine.high %v8424_v36, %v8407_v21 }
 0x195   : > { %v8522_v51 = vpop.permute.xlu0 %1486  ;;  %v7310_v36 = vcombine.high %v8321_v42, %v8321_v42  ;;  %v7307_v42 = vcombine.high %v8103_v32, %v8103_v32  ;;  %v11674_v32 = vcombine.high %v7671_v29, %v7674_v30 }
 0x196   : > { %2093 = vrot.lane.b32.xlu1 %v7046_v53, %s7384_s30  ;;  %v2233_v49 = vrot.slane %v11668_v44, %v7847_v47  ;;  %v1654_v44 = vrot.slane %v1640_v34, %v7847_v47  ;;  %v2495_v34 = vcombine.high %v8514_v41, %v8504_v28  ;;  %v1674_v28 = vcombine.high %v8427_v24, %v8410_v7 }
 0x197   : > { %1797 = vrot.lane.b32.xlu0 %v7028_v4, %s7385_s6  ;;  %v7291_v7 = vcombine.high %v8550_v50, %v8550_v50  ;;  %v11675_v50 = vcombine.high %v8128_v57, %v8131_v56  ;;  %v11678_v57 = vld [vmem:[#allocation22_spill] sm:$0xff] }
 0x198   : > { %v8530_v16 = vpop.permute.xlu1 %2341  ;;  %v2740_v56 = vshrl.u32 %v11678_v57, 16 }
 0x199   : > { %11660 = vst [vmem:[#allocation33_spill] sm:$0xff] %v8530_v16  ;;  %v8532_v17 = vpop.permute.xlu0 %2381  ;;  %v11680_v16 = vld [vmem:[#allocation18_spill] sm:$0xff] }
 0x19a   : > { %11661 = vst [vmem:[#allocation34_spill] sm:$0xff] %v8532_v17  ;;  %2662 = vrot.lane.b32.xlu1 %v7314_v8, %s7382_s28  ;;  %v7256_v8 = vcombine.high %v8013_v38, %v8013_v38  ;;  %v7299_v38 = vcombine.high %v8436_v18, %v8436_v18  ;;  %v7287_v17 = vcombine.high %v1654_v44, %v1654_v44 }
 0x19b   : > { %2083 = vrot.lane.b32.xlu0 %v7298_v5, %s7382_s28  ;;  %v8570_v5 = vrot.slane %v11665_v1, %v7847_v47  ;;  %v7056_v1 = vcombine.low %v2233_v49, %v2233_v49 }
 0x19c   : > { %v8541_v22 = vpop.permute.xlu1 %632 }
 0x19d   : > { %v8543_v53 = vpop.permute.xlu0 %592 }
 0x19e   : > { %11663 = vst [vmem:[#allocation36_spill] sm:$0xff] %v8543_v53  ;;  %1516 = vrot.lane.b32.xlu1 %v7280_v2, %s7387_s8  ;;  %v11681_v53 = vld [vmem:[#allocation20_spill] sm:$0xff] }
 0x19f   : > { %2622 = vrot.lane.b32.xlu0 %v7309_v25, %s7381_s27  ;;  %v7286_v25 = vcombine.high %v8463_v61, %v8463_v61  ;;  %v7064_v61 = vcombine.low %v8570_v5, %v8570_v5 }
 0x1a0   : > { %v8556_v23 = vpop.permute.xlu1 %1506 }
 0x1a1   : > { %11664 = vst [vmem:[#allocation37_spill] sm:$0xff] %v8556_v23  ;;  %v8558_v4 = vpop.permute.xlu0 %1546 }
 0x1a2   : > { %1812 = vrot.lane.b32.xlu1 %v7031_v48, %s7383_s29  ;;  %v8583_v48 = vrot.slane %v1950_v10, %v7847_v47 }
 0x1a3   : > { %602 = vrot.lane.b32.xlu0 %v7256_v8, %s7387_s8  ;;  %v8602_v8 = vrot.slane %v2563_v27, %v7847_v47 }
 0x1a4   : > { %v8574_v52 = vpop.permute.xlu1 %2346  ;;  %v7039_v10 = vcombine.low %v8583_v48, %v8583_v48 }
 0x1a5   : > { %11666 = vst [vmem:[#allocation38_spill] sm:$0xff] %v8574_v52  ;;  %v8576_v2 = vpop.permute.xlu0 %2386  ;;  %v7077_v0 = vcombine.low %v8602_v8, %v8602_v8 }
 0x1a6   : > { %11667 = vst [vmem:[#allocation39_spill] sm:$0xff] %v8576_v2  ;;  %2098 = vrot.lane.b32.xlu1 %v7299_v38, %s7386_s7  ;;  %v8615_v38 = vrot.slane %v1742_v43, %v7847_v47 }
 0x1a7   : > { %1772 = vrot.lane.b32.xlu0 %v7286_v25, %s7382_s28 }
 0x1a8   : > { %v8593_v3 = vpop.permute.xlu1 %597  ;;  %v7032_v21 = vcombine.low %v8615_v38, %v8615_v38 }
 0x1a9   : > { %11669 = vst [vmem:[#allocation40_spill] sm:$0xff] %v8593_v3  ;;  %v8595_v18 = vpop.permute.xlu0 %637  ;;  %v2734_v3 = vshrl.u32 %v11680_v16, 16 }
 0x1aa   : > { %2396 = vrot.lane.b32.xlu1 %v7064_v61, %s7384_s30 }
 0x1ab   : > { %2058 = vrot.lane.b32.xlu0 %v7039_v10, %s7384_s30  ;;  %v7300_v10 = vcombine.high %v8511_v20, %v8511_v20  ;;  %v11673_v20 = vcombine.high %v8241_v14, %v8244_v58 }
 0x1ac   : > { %v8608_v35 = vpop.permute.xlu1 %1551 }
 0x1ad   : > { %v8610_v31 = vpop.permute.xlu0 %1511 }
 0x1ae   : > { %11670 = vst [vmem:[#allocation41_spill] sm:$0xff] %v8610_v31  ;;  %2667 = vrot.lane.b32.xlu1 %v7077_v0, %s7383_s29  ;;  %v7024_v0 = vcombine.low %v1654_v44, %v1654_v44  ;;  %v2739_v31 = vshrl.u32 %v11681_v53, 16 }
 0x1af   : > { %2356 = vrot.lane.b32.xlu0 %v7056_v1, %s7383_s29 }
 0x1b0   : > { %v8619_v27 = vpop.permute.xlu1 %2391 }
 0x1b1   : > { %11671 = vst [vmem:[#allocation42_spill] sm:$0xff] %v8619_v27  ;;  %v8621_v25 = vpop.permute.xlu0 %2351  ;;  %v2751_v27 = vshrl.u32 %v8180_v46, 16 }
 0x1b2   : > { %11672 = vst [vmem:[#allocation43_spill] sm:$0xff] %v8621_v25  ;;  %1817 = vrot.lane.b32.xlu1 %v7032_v21, %s7384_s30  ;;  %v2746_v25 = vshrl.u32 %v8161_v26, 16 }
 0x1b3   : > { %2627 = vrot.lane.b32.xlu0 %v7310_v36, %s7382_s28  ;;  %v7295_v36 = vcombine.high %v8485_v12, %v8485_v12 }
 0x1b4   : > { %v8630_v43 = vpop.permute.xlu1 %868 }
 0x1b5   : > { %v8632_v61 = vpop.permute.xlu0 %903 }
 0x1b6   : > { %2103 = vrot.lane.b32.xlu1 %v7300_v10, %s7387_s8  ;;  %v8652_v10 = vrot.slane %v11673_v20, %v7847_v47  ;;  %v8669_v20 = vrot.slane %v2495_v34, %v7847_v47 }
 0x1b7   : > { %1777 = vrot.lane.b32.xlu0 %v7024_v0, %s7383_s29  ;;  %v2267_v0 = vrot.slane %v11674_v32, %v7847_v47  ;;  %v7303_v32 = vcombine.high %v2233_v49, %v2233_v49  ;;  %v7296_v49 = vcombine.high %v8583_v48, %v8583_v48  ;;  %v7308_v48 = vcombine.high %v8570_v5, %v8570_v5 }
 0x1b8   : > { %v8642_v1 = vpop.permute.xlu1 %913  ;;  %v7078_v14 = vcombine.low %v8652_v10, %v8652_v10  ;;  %v7070_v24 = vcombine.low %v8669_v20, %v8669_v20 }
 0x1b9   : > { %v8644_v21 = vpop.permute.xlu0 %1179  ;;  %v7057_v58 = vcombine.low %v2267_v0, %v2267_v0  ;;  %v7304_v23 = vcombine.high %v2267_v0, %v2267_v0 }
 0x1ba   : > { %2401 = vrot.lane.b32.xlu1 %v7307_v42, %s7386_s7  ;;  %v8682_v42 = vrot.slane %v1674_v28, %v7847_v47  ;;  %v2752_v28 = vshrl.u32 %v8199_v39, 16 }
 0x1bb   : > { %2063 = vrot.lane.b32.xlu0 %v7295_v36, %s7386_s7 }
 0x1bc   : > { %v8662_v41 = vpop.permute.xlu1 %1189 }
 0x1bd   : > { %v8664_v12 = vpop.permute.xlu0 %1144 }
 0x1be   : > { %2672 = vrot.lane.b32.xlu1 %v7078_v14, %s7384_s30  ;;  %v7025_v14 = vcombine.low %v8682_v42, %v8682_v42 }
 0x1bf   : > { %2361 = vrot.lane.b32.xlu0 %v7057_v58, %s7384_s30  ;;  %v2543_v58 = vrot.slane %v11675_v50, %v7847_v47  ;;  %v2753_v50 = vpack.i.b16 %v2752_v28, %v2751_v27  ;;  %v2750_v27 = vpack.i.b16 %v8199_v39, %v8180_v46  ;;  %v2738_v46 = vpack.i.b16 %v11678_v57, %v11681_v53 }
 0x1c0   : > { %v8673_v29 = vpop.permute.xlu1 %1154 }
 0x1c1   : > { %v8675_v30 = vpop.permute.xlu0 %878  ;;  %v7071_v37 = vcombine.low %v2543_v58, %v2543_v58  ;;  %v8723_v44 = vrot.slane %v2753_v50, %v7652_v19 }
 0x1c2   : > { %1822 = vrot.lane.b32.xlu1 %v7291_v7, %s7386_s7 }
 0x1c3   : > { %2632 = vrot.lane.b32.xlu0 %v7070_v24, %s7383_s29 }
 0x1c4   : > { %v8686_v34 = vpop.permute.xlu1 %1199 }
 0x1c5   : > { %v8688_v36 = vpop.permute.xlu0 %923 }
 0x1c6   : > { %2366 = vrot.lane.b32.xlu1 %v7303_v32, %s7386_s7  ;;  %v11679_v32 = vld [vmem:[#allocation17_spill] sm:$0xff] }
 0x1c7   : > { %1782 = vrot.lane.b32.xlu0 %v7025_v14, %s7384_s30  ;;  %v2745_v14 = vshrl.u32 %v11679_v32, 16 }
 0x1c8   : > { %v8699_v7 = vpop.permute.xlu1 %1164 }
 0x1c9   : > { %11676 = vst [vmem:[#allocation44_spill] sm:$0xff] %v8699_v7  ;;  %v8701_v24 = vpop.permute.xlu0 %888  ;;  %v2747_v9 = vpack.i.b16 %v2746_v25, %v2745_v14  ;;  %v2741_v7 = vpack.i.b16 %v2740_v56, %v2739_v31  ;;  %v2837_v31 = vrot.slane %v2750_v27, %v7652_v19 }
 0x1ca   : > { %11677 = vst [vmem:[#allocation45_spill] sm:$0xff] %v8701_v24  ;;  %2637 = vrot.lane.b32.xlu1 %v7071_v37, %s7384_s30  ;;  %v11682_v37 = vld [vmem:[#allocation15_spill] sm:$0xff]  ;;  %v7315_v24 = vcombine.high %v8602_v8, %v8602_v8 }
 0x1cb   : > { %2068 = vrot.lane.b32.xlu0 %v7296_v49, %s7387_s8  ;;  %v2733_v49 = vshrl.u32 %v11682_v37, 16  ;;  %v8730_v14 = vrot.slane %v2747_v9, %v7652_v19  ;;  %v8737_v39 = vrot.slane %v2741_v7, %v7652_v19  ;;  %v7316_v9 = vcombine.high %v8652_v10, %v8652_v10 }
 0x1cc   : > { %v8711_v2 = vpop.permute.xlu1 %863  ;;  %v2732_v53 = vpack.i.b16 %v11680_v16, %v11682_v37  ;;  %v7312_v16 = vcombine.high %v2543_v58, %v2543_v58  ;;  %v11683_v37 = vld [vmem:[#allocation14_spill] sm:$0xff] }
 0x1cd   : > { %v899_v52 = vpop.permute.xlu0 %898  ;;  %v2735_v25 = vpack.i.b16 %v2734_v3, %v2733_v49  ;;  %v2872_v3 = vcombine.low %v8730_v14, %v8723_v44 }
 0x1ce   : > { %1787 = vrot.lane.b32.xlu1 %v7287_v17, %s7386_s7  ;;  %v2744_v17 = vpack.i.b16 %v8161_v26, %v11679_v32  ;;  %v7311_v32 = vcombine.high %v8669_v20, %v8669_v20  ;;  %v947_v49 = vsel %vm639_vm0, %v11683_v37, %v899_v52 }
 0x1cf   : > { %2406 = vrot.lane.b32.xlu0 %v7308_v48, %s7387_s8  ;;  %v8753_v0 = vrot.slane %v2735_v25, %v7652_v19  ;;  %v2880_v50 = vrot.slane %v2872_v3, %v7847_v47  ;;  %v2761_v48 = vrot.slane %v2732_v53, %v7652_v19  ;;  %v11684_v25 = vld [vmem:[#allocation8_spill] sm:$0xff]  ;;  %v949_v52 = vsel %vm643_vm1, %v947_v49, %v8632_v61  ;;  %v11685_v53 = vld [vmem:[#allocation19_spill] sm:$0xff] }
 0x1d0   : > { %v1175_v28 = vpop.permute.xlu1 %1174  ;;  %v2829_v7 = vrot.slane %v2744_v17, %v7652_v19  ;;  %v663_v17 = vsel %vm639_vm0, %v11684_v25, %v8444_v54  ;;  %v11687_v54 = vld [vmem:[#allocation23_spill] sm:$0xff] }
 0x1d1   : > { %v909_v5 = vpop.permute.xlu0 %908  ;;  %v2804_v10 = vcombine.low %v8753_v0, %v8737_v39  ;;  %v665_v61 = vsel %vm643_vm1, %v663_v17, %v11687_v54 }
 0x1d2   : > { %2371 = vrot.lane.b32.xlu1 %v7304_v23, %s7387_s8  ;;  %v7292_v23 = vcombine.high %v8615_v38, %v8615_v38  ;;  %v2838_v57 = vcombine.low %v2829_v7, %v2837_v31 }
 0x1d3   : > { %2677 = vrot.lane.b32.xlu0 %v7315_v24, %s7386_s7  ;;  %v8759_v24 = vrot.slane %v2738_v46, %v7652_v19  ;;  %v8778_v20 = vrot.slane %v2804_v10, %v7847_v47  ;;  %v2839_v10 = vcombine.high %v2829_v7, %v2837_v31 }
 0x1d4   : > { %v8742_v8 = vpop.permute.xlu1 %1139  ;;  %v8775_v58 = vrot.slane %v2838_v57, %v7847_v47  ;;  %v1223_v57 = vsel %vm639_vm0, %v11685_v53, %v1175_v28  ;;  %v7322_v53 = vcombine.high %v2880_v50, %v2880_v50 }
 0x1d5   : > { %v8744_v26 = vpop.permute.xlu0 %873  ;;  %v2770_v27 = vcombine.low %v2761_v48, %v8759_v24  ;;  %v1225_v28 = vsel %vm643_vm1, %v1223_v57, %v8644_v21  ;;  %v7081_v49 = vcombine.low %v8778_v20, %v8778_v20  ;;  %v2771_v25 = vcombine.high %v2761_v48, %v8759_v24 }
 0x1d6   : > { %2682 = vrot.lane.b32.xlu1 %v7316_v9, %s7387_s8  ;;  %v7088_v9 = vcombine.low %v2880_v50, %v2880_v50  ;;  %v7321_v7 = vcombine.high %v8775_v58, %v8775_v58  ;;  %v2805_v24 = vcombine.high %v8753_v0, %v8737_v39 }
 0x1d7   : > { %1827 = vrot.lane.b32.xlu0 %v7292_v23, %s7387_s8  ;;  %v7288_v23 = vcombine.high %v8682_v42, %v8682_v42  ;;  %v8798_v42 = vrot.slane %v2770_v27, %v7847_v47  ;;  %v2785_v50 = vrot.slane %v2771_v25, %v7847_v47 }
 0x1d8   : > { %v1185_v38 = vpop.permute.xlu1 %1184  ;;  %v2819_v25 = vrot.slane %v2805_v24, %v7847_v47 }
 0x1d9   : > { %v8763_v56 = vpop.permute.xlu0 %1149  ;;  %v1227_v21 = vsel %vm646_vm2, %v1225_v28, %v1185_v38  ;;  %v7317_v57 = vcombine.high %v8798_v42, %v8798_v42 }
 0x1da   : > { %2647 = vrot.lane.b32.xlu1 %v7312_v16, %s7387_s8  ;;  %v951_v16 = vsel %vm646_vm2, %v949_v52, %v909_v5  ;;  %v1229_v38 = vsel %vm649_vm4, %v1227_v21, %v8662_v41 }
 0x1db   : > { %2642 = vrot.lane.b32.xlu0 %v7311_v32, %s7386_s7  ;;  %v11686_v32 = vld [vmem:[#allocation10_spill] sm:$0xff]  ;;  %v953_v5 = vsel %vm649_vm4, %v951_v16, %v8642_v1  ;;  %v11688_v1 = vld [vmem:[#allocation25_spill] sm:$0xff] }
 0x1dc   : > { %v919_v46 = vpop.permute.xlu1 %918  ;;  %v1570_v37 = vsel %vm639_vm0, %v11686_v32, %v8476_v15  ;;  %v667_v52 = vsel %vm646_vm2, %v665_v61, %v11688_v1  ;;  %v7085_v1 = vcombine.low %v2819_v25, %v2819_v25 }
 0x1dd   : > { %v1195_v3 = vpop.permute.xlu0 %1194  ;;  %v1572_v27 = vsel %vm643_vm1, %v1570_v37, %v8458_v59  ;;  %v955_v17 = vsel %vm652_vm6, %v953_v5, %v919_v46  ;;  %v2873_v59 = vcombine.high %v8730_v14, %v8723_v44  ;;  %v669_v44 = vsel %vm649_vm4, %v667_v52, %v8383_v55 }
 0x1de   : > { %2928 = vrot.lane.b32.xlu1 %v7088_v9, %s7385_s6  ;;  %v1574_v9 = vsel %vm646_vm2, %v1572_v27, %v8491_v11  ;;  %v957_v11 = vsel %vm655_vm8, %v955_v17, %v8688_v36  ;;  %v1231_v14 = vsel %vm652_vm6, %v1229_v38, %v1195_v3  ;;  %v7318_v55 = vcombine.high %v8778_v20, %v8778_v20 }
 0x1df   : > { %1792 = vrot.lane.b32.xlu0 %v7288_v23, %s7387_s8  ;;  %v2853_v23 = vrot.slane %v2839_v10, %v7847_v47  ;;  %v1576_v39 = vsel %vm649_vm4, %v1574_v9, %v8493_v40  ;;  %v2887_v3 = vrot.slane %v2873_v59, %v7847_v47  ;;  %v671_v10 = vsel %vm652_vm6, %v669_v44, %v8412_v62 }
 0x1e0   : > { %v8804_v31 = vpop.permute.xlu1 %883  ;;  %v1578_v0 = vsel %vm652_vm6, %v1576_v39, %v8520_v60  ;;  %v1233_v37 = vsel %vm655_vm8, %v1231_v14, %v8686_v34  ;;  %v7319_v59 = vcombine.high %v2785_v50, %v2785_v50 }
 0x1e1   : > { %v8806_v15 = vpop.permute.xlu0 %1159  ;;  %v7091_v36 = vcombine.low %v2853_v23, %v2853_v23  ;;  %v1580_v40 = vsel %vm655_vm8, %v1578_v0, %v8558_v4  ;;  %v673_v4 = vsel %vm655_vm8, %v671_v10, %v8541_v22  ;;  %v7092_v22 = vcombine.low %v2887_v3, %v2887_v3  ;;  %v11689_v0 = vld [vmem:[#allocation16_spill] sm:$0xff] }
 0x1e2   : > { %2933 = vrot.lane.b32.xlu1 %v7321_v7, %s7381_s27  ;;  %v1582_v60 = vsel %vm658_vm10, %v1580_v40, %v8608_v35  ;;  %v675_v61 = vsel %vm658_vm10, %v673_v4, %v8595_v18  ;;  %v7084_v7 = vcombine.low %v2785_v50, %v2785_v50  ;;  %v7323_v17 = vcombine.high %v2853_v23, %v2853_v23  ;;  %v11690_v50 = vld [vmem:[#allocation21_spill] sm:$0xff] }
 0x1e3   : > { %2893 = vrot.lane.b32.xlu0 %v7081_v49, %s7385_s6  ;;  %v3001_v35 = vrot.slane %v1582_v60, 2  ;;  %v7324_v24 = vcombine.high %v2887_v3, %v2887_v3  ;;  %v7320_v23 = vcombine.high %v2819_v25, %v2819_v25  ;;  %v1208_v40 = vsel %vm639_vm0, %v11690_v50, %v8742_v8  ;;  %v11696_v25 = vld [vmem:[#allocation44_spill] sm:$0xff] }
 0x1e4   : > { %v929_v48 = vpop.permute.xlu1 %928  ;;  %v1210_v8 = vsel %vm643_vm1, %v1208_v40, %v8664_v12 }
 0x1e5   : > { %v8832_v46 = vpop.permute.xlu0 %893  ;;  %v959_v41 = vsel %vm658_vm10, %v957_v11, %v929_v48  ;;  %v3046_v11 = vld [vmem:[%s11484_s2] sm:$0xff] }
 0x1e6   : > { %2938 = vrot.lane.b32.xlu1 %v7322_v53, %s7382_s28  ;;  %v2993_v16 = vrot.slane %v959_v41, 6 }
 0x1e7   : > { %2898 = vrot.lane.b32.xlu0 %v7317_v57, %s7381_s27 }
 0x1e8   : > { %v8856_v32 = vpop.permute.xlu1 %1169  ;;  %v3018_v34 = vsel %vm3014_vm11, %v675_v61, %v2993_v16  ;;  %v11691_v16 = vld [vmem:[#allocation11_spill] sm:$0xff] }
 0x1e9   : > { %v1205_v54 = vpop.permute.xlu0 %1204 }
 0x1ea   : > { %v1235_v20 = vsel %vm658_vm10, %v1233_v37, %v1205_v54  ;;  %2943 = vrot.lane.b32.xlu1 %v7091_v36, %s7383_s29  ;;  %v932_v36 = vsel %vm639_vm0, %v11689_v0, %v8711_v2  ;;  %v11692_v37 = vld [vmem:[#allocation9_spill] sm:$0xff] }
 0x1eb   : > { %v2997_v62 = vrot.slane %v1235_v20, 4  ;;  %2903 = vrot.lane.b32.xlu0 %v7318_v55, %s7382_s28  ;;  %v1555_v55 = vsel %vm639_vm0, %v11691_v16, %v8522_v51  ;;  %v934_v3 = vsel %vm643_vm1, %v932_v36, %v8630_v43  ;;  %v642_v54 = vsel %vm639_vm0, %v11692_v37, %v8460_v33  ;;  %v11693_v43 = vld [vmem:[#allocation26_spill] sm:$0xff] }
 0x1ec   : > { %v8868_v28 = vpop.permute.xlu1 %2617  ;;  %v936_v2 = vsel %vm646_vm2, %v934_v3, %v8744_v26  ;;  %v1557_v4 = vsel %vm643_vm1, %v1555_v55, %v8478_v45  ;;  %v1212_v51 = vsel %vm646_vm2, %v1210_v8, %v8763_v56  ;;  %v645_v20 = vsel %vm643_vm1, %v642_v54, %v11693_v43 }
 0x1ed   : > { %v8870_v5 = vpop.permute.xlu0 %2657  ;;  %v3023_v49 = vsel %vm11521_vm13, %v3018_v34, %v2997_v62  ;;  %v938_v61 = vsel %vm649_vm4, %v936_v2, %v8675_v30  ;;  %v1559_v26 = vsel %vm646_vm2, %v1557_v4, %v8506_v13  ;;  %v1214_v45 = vsel %vm649_vm4, %v1212_v51, %v8673_v29  ;;  %v11694_v34 = vld [vmem:[#allocation45_spill] sm:$0xff] }
 0x1ee   : > { %v3029_v18 = vsel %vm3024_vm14, %v3023_v49, %v3001_v35  ;;  %2948 = vrot.lane.b32.xlu1 %v7092_v22, %s7384_s30  ;;  %v940_v12 = vsel %vm652_vm6, %v938_v61, %v8804_v31  ;;  %v1216_v56 = vsel %vm652_vm6, %v1214_v45, %v8806_v15  ;;  %v648_v35 = vsel %vm646_vm2, %v645_v20, %v8381_v63  ;;  %v11695_v49 = vld [vmem:[#allocation37_spill] sm:$0xff] }
 0x1ef   : > { %2908 = vrot.lane.b32.xlu0 %v7084_v7, %s7383_s29  ;;  %3060 = vmatprep.subr.bf16.mxu0 %v3029_v18  ;;  %v1561_v30 = vsel %vm649_vm4, %v1559_v26, %v8508_v6  ;;  %v942_v22 = vsel %vm655_vm8, %v940_v12, %v11694_v34  ;;  %v1218_v15 = vsel %vm655_vm8, %v1216_v56, %v11696_v25  ;;  %v11697_v18 = vld [vmem:[#allocation29_spill] sm:$0xff] }
 0x1f0   : > { %v8877_v27 = vpop.permute.xlu1 %2652  ;;  %v1563_v31 = vsel %vm652_vm6, %v1561_v30, %v11695_v49  ;;  %v944_v29 = vsel %vm658_vm10, %v942_v22, %v8832_v46  ;;  %v651_v63 = vsel %vm649_vm4, %v648_v35, %v11697_v18 }
 0x1f1   : > { %v8879_v21 = vpop.permute.xlu0 %2078  ;;  %v2992_v0 = vrot.slane %v944_v29, 6 }
 0x1f2   : > { %2953 = vrot.lane.b32.xlu1 %v7323_v17, %s7386_s7  ;;  %v11698_v17 = vld [vmem:[#allocation41_spill] sm:$0xff] }
 0x1f3   : > { %2913 = vrot.lane.b32.xlu0 %v7085_v1, %s7384_s30  ;;  %v1565_v6 = vsel %vm655_vm8, %v1563_v31, %v11698_v17  ;;  %v1220_v1 = vsel %vm658_vm10, %v1218_v15, %v8856_v32  ;;  %v11701_v31 = vld [vmem:[#allocation27_spill] sm:$0xff]  ;;  %v11702_v17 = vld [vmem:[#allocation30_spill] sm:$0xff] }
 0x1f4   : > { %v8883_v52 = vpop.permute.xlu1 %2043  ;;  %v2996_v40 = vrot.slane %v1220_v1, 4  ;;  %v11703_v1 = vld [vmem:[#allocation31_spill] sm:$0xff] }
 0x1f5   : > { %v8885_v9 = vpop.permute.xlu0 %1802 }
 0x1f6   : > { %2958 = vrot.lane.b32.xlu1 %v7324_v24, %s7387_s8  ;;  %v11699_v24 = vld [vmem:[#allocation36_spill] sm:$0xff] }
 0x1f7   : > { %2918 = vrot.lane.b32.xlu0 %v7319_v59, %s7386_s7  ;;  %v654_v59 = vsel %vm652_vm6, %v651_v63, %v11699_v24  ;;  %v11704_v24 = vld [vmem:[#allocation12_spill] sm:$0xff] }
 0x1f8   : > { %v8889_v38 = vpop.permute.xlu1 %2038 }
 0x1f9   : > { %v8891_v48 = vpop.permute.xlu0 %2088 }
 0x1fb   : > { %2923 = vrot.lane.b32.xlu0 %v7320_v23, %s7387_s8 }
 0x1fc   : > { %v8897_v53 = vpop.permute.xlu1 %1762 }
 0x1fd   : > { %v8899_v57 = vpop.permute.xlu0 %1767 }
 0x1ff   : > { %3049 = vperm.xlu0 %7362, %v3046_v11   ;;  %v11700_v11 = vld [vmem:[#allocation40_spill] sm:$0xff] }
 0x200   : > { %v8901_v39 = vpop.permute.xlu1 %2048  ;;  %v657_v46 = vsel %vm655_vm8, %v654_v59, %v11700_v11  ;;  %v2425_v59 = vsel %vm639_vm0, %v11704_v24, %v11703_v1  ;;  %v11714_v1 = vld [vmem:[#allocation32_spill] sm:$0xff] }
 0x201   : > { %v8903_v44 = vpop.permute.xlu0 %2053  ;;  %v1831_v24 = vsel %vm639_vm0, %v11714_v1, %v8897_v53 }
 0x204   : > { %v8905_v14 = vpop.permute.xlu1 %1807 }
 0x205   : > { %v8907_v41 = vpop.permute.xlu0 %2073 }
 0x206   : > { %v2122_v29 = vsel %vm639_vm0, %v11701_v31, %v8907_v41 }
 0x207   : > { %v2124_v25 = vsel %vm643_vm1, %v2122_v29, %v8879_v21  ;;  %v11712_v29 = vld [vmem:[#allocation43_spill] sm:$0xff] }
 0x208   : > { %v8920_v10 = vpop.permute.xlu1 %2093 }
 0x209   : > { %v1798_v60 = vpop.permute.xlu0 %1797 }
 0x20c   : > { %v8937_v62 = vpop.permute.xlu1 %2662 }
 0x20d   : > { %v2084_v33 = vpop.permute.xlu0 %2083 }
 0x20e   : > { %v2126_v63 = vsel %vm646_vm2, %v2124_v25, %v2084_v33 }
 0x210   : > { %v1517_v7 = vpop.permute.xlu1 %1516 }
 0x211   : > { %v8953_v13 = vpop.permute.xlu0 %2622  ;;  %v1567_v23 = vsel %vm658_vm10, %v1565_v6, %v1517_v7  ;;  %v1846_v6 = vsel %vm639_vm0, %v11702_v17, %v1798_v60 }
 0x212   : > { %v3000_v55 = vrot.slane %v1567_v23, 2  ;;  %v2128_v23 = vsel %vm649_vm4, %v2126_v63, %v8891_v48  ;;  %v11713_v63 = vld [vmem:[#allocation28_spill] sm:$0xff] }
 0x213   : > { %v2107_v17 = vsel %vm639_vm0, %v11713_v63, %v8889_v38 }
 0x214   : > { %v1813_v36 = vpop.permute.xlu1 %1812  ;;  %v2109_v53 = vsel %vm643_vm1, %v2107_v17, %v8883_v52  ;;  %v1833_v52 = vsel %vm643_vm1, %v1831_v24, %v8899_v57 }
 0x215   : > { %v603_v50 = vpop.permute.xlu0 %602 }
 0x216   : > { %v660_v16 = vsel %vm658_vm10, %v657_v46, %v603_v50  ;;  %v11705_v46 = vld [vmem:[#allocation33_spill] sm:$0xff]  ;;  %v11707_v50 = vld [vmem:[#allocation34_spill] sm:$0xff] }
 0x217   : > { %v3016_v3 = vsel %vm3014_vm11, %v660_v16, %v2992_v0  ;;  %v11706_v0 = vld [vmem:[#allocation13_spill] sm:$0xff]  ;;  %v2427_v33 = vsel %vm643_vm1, %v2425_v59, %v11707_v50  ;;  %v11709_v16 = vld [vmem:[#allocation38_spill] sm:$0xff]  ;;  %v11715_v50 = vld [vmem:[#allocation35_spill] sm:$0xff] }
 0x218   : > { %v3021_v37 = vsel %vm11521_vm13, %v3016_v3, %v2996_v40  ;;  %v2099_v32 = vpop.permute.xlu1 %2098  ;;  %v2410_v21 = vsel %vm639_vm0, %v11706_v0, %v11705_v46  ;;  %v11708_v40 = vld [vmem:[#allocation24_spill] sm:$0xff]  ;;  %v11710_v3 = vld [vmem:[#allocation39_spill] sm:$0xff] }
 0x219   : > { %v8975_v54 = vpop.permute.xlu0 %1772  ;;  %v3026_v2 = vsel %vm3024_vm14, %v3021_v37, %v3000_v55  ;;  %v2701_v60 = vsel %vm639_vm0, %v11708_v40, %v8877_v27  ;;  %v2412_v55 = vsel %vm643_vm1, %v2410_v21, %v11709_v16  ;;  %v2429_v48 = vsel %vm646_vm2, %v2427_v33, %v11710_v3 }
 0x21a   : > { %3061 = vmatpush1.bf16.msra.mxu0 %v3026_v2  ;;  %v1848_v37 = vsel %vm643_vm1, %v1846_v6, %v8885_v9  ;;  %v11711_v2 = vld [vmem:[#allocation42_spill] sm:$0xff]  ;;  %v2414_v25 = vsel %vm646_vm2, %v2412_v55, %v11712_v29  ;;  %v2130_v27 = vsel %vm652_vm6, %v2128_v23, %v8920_v10  ;;  %v2703_v9 = vsel %vm643_vm1, %v2701_v60, %v8870_v5 }
 0x21b   : > { %v2431_v31 = vsel %vm649_vm4, %v2429_v48, %v11711_v2  ;;  %v2132_v6 = vsel %vm655_vm8, %v2130_v27, %v2099_v32  ;;  %v2705_v21 = vsel %vm646_vm2, %v2703_v9, %v8937_v62  ;;  %v1850_v38 = vsel %vm646_vm2, %v1848_v37, %v8905_v14 }
 0x21c   : > { %v2397_v8 = vpop.permute.xlu1 %2396  ;;  %v1852_v5 = vsel %vm649_vm4, %v1850_v38, %v1813_v36  ;;  %v2686_v62 = vsel %vm639_vm0, %v11715_v50, %v8868_v28  ;;  %v2111_v14 = vsel %vm646_vm2, %v2109_v53, %v8901_v39 }
 0x21d   : > { %v8978_v4 = vpop.permute.xlu0 %2058  ;;  %v2433_v59 = vsel %vm652_vm6, %v2431_v31, %v2397_v8  ;;  %v2688_v28 = vsel %vm643_vm1, %v2686_v62, %v8953_v13 }
 0x220   : > { %v2668_v51 = vpop.permute.xlu1 %2667 }
 0x221   : > { %v8980_v43 = vpop.permute.xlu0 %2356  ;;  %v2707_v32 = vsel %vm649_vm4, %v2705_v21, %v2668_v51 }
 0x222   : > { %v2416_v3 = vsel %vm649_vm4, %v2414_v25, %v8980_v43 }
 0x224   : > { %v1818_v20 = vpop.permute.xlu1 %1817 }
 0x225   : > { %v2628_v61 = vpop.permute.xlu0 %2627 }
 0x226   : > { %v2690_v57 = vsel %vm646_vm2, %v2688_v28, %v2628_v61 }
 0x228   : > { %v2104_v26 = vpop.permute.xlu1 %2103 }
 0x229   : > { %v8982_v12 = vpop.permute.xlu0 %1777  ;;  %v2134_v10 = vsel %vm658_vm10, %v2132_v6, %v2104_v26  ;;  %v1854_v26 = vsel %vm652_vm6, %v1852_v5, %v1818_v20 }
 0x22a   : > { %v3005_v33 = vrot.slane %v2134_v10, 6 }
 0x22c   : > { %v2402_v45 = vpop.permute.xlu1 %2401 }
 0x22d   : > { %v8984_v56 = vpop.permute.xlu0 %2063  ;;  %v2435_v23 = vsel %vm655_vm8, %v2433_v59, %v2402_v45 }
 0x230   : > { %v2673_v35 = vpop.permute.xlu1 %2672 }
 0x231   : > { %v8986_v30 = vpop.permute.xlu0 %2361  ;;  %v2709_v45 = vsel %vm652_vm6, %v2707_v32, %v2673_v35  ;;  %v2113_v35 = vsel %vm649_vm4, %v2111_v14, %v8903_v44 }
 0x232   : > { %v2115_v55 = vsel %vm652_vm6, %v2113_v35, %v8978_v4  ;;  %v2418_v44 = vsel %vm652_vm6, %v2416_v3, %v8986_v30  ;;  %v1835_v4 = vsel %vm646_vm2, %v1833_v52, %v8975_v54 }
 0x233   : > { %v2117_v37 = vsel %vm655_vm8, %v2115_v55, %v8984_v56  ;;  %v1837_v56 = vsel %vm649_vm4, %v1835_v4, %v8982_v12 }
 0x234   : > { %v1823_v34 = vpop.permute.xlu1 %1822 }
 0x235   : > { %v2633_v22 = vpop.permute.xlu0 %2632  ;;  %v1856_v36 = vsel %vm655_vm8, %v1854_v26, %v1823_v34 }
 0x236   : > { %v2692_v13 = vsel %vm649_vm4, %v2690_v57, %v2633_v22 }
 0x238   : > { %v8988_v7 = vpop.permute.xlu1 %2366 }
 0x239   : > { %v8990_v49 = vpop.permute.xlu0 %1782  ;;  %v2420_v43 = vsel %vm655_vm8, %v2418_v44, %v8988_v7 }
 0x23c   : > { %v2638_v15 = vpop.permute.xlu1 %2637 }
 0x23d   : > { %v2069_v18 = vpop.permute.xlu0 %2068  ;;  %v2694_v61 = vsel %vm652_vm6, %v2692_v13, %v2638_v15  ;;  %v1839_v15 = vsel %vm652_vm6, %v1837_v56, %v8990_v49 }
 0x23e   : > { %v2119_v22 = vsel %vm658_vm10, %v2117_v37, %v2069_v18 }
 0x23f   : > { %v3004_v17 = vrot.slane %v2119_v22, 6 }
 0x240   : > { %v9005_v11 = vpop.permute.xlu1 %1787 }
 0x241   : > { %v2407_v41 = vpop.permute.xlu0 %2406  ;;  %v1841_v54 = vsel %vm655_vm8, %v1839_v15, %v9005_v11 }
 0x242   : > { %v2437_v8 = vsel %vm658_vm10, %v2435_v23, %v2407_v41 }
 0x243   : > { %v3009_v60 = vrot.slane %v2437_v8, 4 }
 0x244   : > { %v2372_v46 = vpop.permute.xlu1 %2371 }
 0x245   : > { %v2678_v0 = vpop.permute.xlu0 %2677  ;;  %v2422_v30 = vsel %vm658_vm10, %v2420_v43, %v2372_v46 }
 0x246   : > { %v2711_v51 = vsel %vm655_vm8, %v2709_v45, %v2678_v0  ;;  %v3008_v18 = vrot.slane %v2422_v30, 4 }
 0x248   : > { %v2683_v41 = vpop.permute.xlu1 %2682 }
 0x249   : > { %v1828_v40 = vpop.permute.xlu0 %1827  ;;  %v2713_v39 = vsel %vm658_vm10, %v2711_v51, %v2683_v41 }
 0x24a   : > { %v1858_v20 = vsel %vm658_vm10, %v1856_v36, %v1828_v40  ;;  %v3013_v16 = vrot.slane %v2713_v39, 2  ;;  %v3045_v39 = vld [vmem:[%s11483_s1] sm:$0xf] }
 0x24b   : > { %v3034_v34 = vsel %vm3014_vm11, %v1858_v20, %v3005_v33 }
 0x24c   : > { %v3038_v48 = vsel %vm11521_vm13, %v3034_v34, %v3009_v60  ;;  %v2648_v2 = vpop.permute.xlu1 %2647 }
 0x24d   : > { %v2643_v31 = vpop.permute.xlu0 %2642  ;;  %v3043_v29 = vsel %vm3024_vm14, %v3038_v48, %v3013_v16 }
 0x24e   : > { %v2696_v25 = vsel %vm655_vm8, %v2694_v61, %v2643_v31  ;;  %3062 = vmatprep.subr.bf16.mxu0 %v3043_v29 }
 0x24f   : > { %v2698_v63 = vsel %vm658_vm10, %v2696_v25, %v2648_v2 }
 0x250   : > { %v2929_v7 = vpop.permute.xlu1 %2928  ;;  %v3012_v24 = vrot.slane %v2698_v63, 2 }
 0x251   : > { %v1793_v27 = vpop.permute.xlu0 %1792  ;;  %v2977_v23 = vsel %vm639_vm0, %v8775_v58, %v2929_v7 }
 0x252   : > { %v1843_v1 = vsel %vm658_vm10, %v1841_v54, %v1793_v27 }
 0x253   : > { %v3032_v9 = vsel %vm3014_vm11, %v1843_v1, %v3004_v17 }
 0x254   : > { %v3036_v12 = vsel %vm11521_vm13, %v3032_v9, %v3008_v18  ;;  %v2934_v6 = vpop.permute.xlu1 %2933 }
 0x255   : > { %v2894_v59 = vpop.permute.xlu0 %2893  ;;  %v3040_v49 = vsel %vm3024_vm14, %v3036_v12, %v3012_v24  ;;  %v2979_v53 = vsel %vm643_vm1, %v2977_v23, %v2934_v6  ;;  %vm3052_vm14 = vcmask 293888  }
 0x256   : > { %3063 = vmatpush1.bf16.msra.mxu0 %v3040_v49  ;;  %v2962_v62 = vsel %vm639_vm0, %v8798_v42, %v2894_v59 }
 0x258   : > { %v2939_v46 = vpop.permute.xlu1 %2938 }
 0x259   : > { %v2899_v0 = vpop.permute.xlu0 %2898  ;;  %v2981_v8 = vsel %vm646_vm2, %v2979_v53, %v2939_v46 }
 0x25a   : > { %v2964_v26 = vsel %vm643_vm1, %v2962_v62, %v2899_v0 }
 0x25c   : > { %v2944_v21 = vpop.permute.xlu1 %2943 }
 0x25d   : > { %v2904_v38 = vpop.permute.xlu0 %2903  ;;  %v2983_v50 = vsel %vm649_vm4, %v2981_v8, %v2944_v21 }
 0x25e   : > { %v2966_v58 = vsel %vm646_vm2, %v2964_v26, %v2904_v38 }
 0x260   : > { %v2949_v11 = vpop.permute.xlu1 %2948 }
 0x261   : > { %v2909_v10 = vpop.permute.xlu0 %2908  ;;  %v2985_v14 = vsel %vm652_vm6, %v2983_v50, %v2949_v11 }
 0x262   : > { %v2968_v51 = vsel %vm649_vm4, %v2966_v58, %v2909_v10 }
 0x264   : > { %v2954_v5 = vpop.permute.xlu1 %2953 }
 0x265   : > { %v2914_v32 = vpop.permute.xlu0 %2913  ;;  %v2987_v45 = vsel %vm655_vm8, %v2985_v14, %v2954_v5 }
 0x266   : > { %v2970_v41 = vsel %vm652_vm6, %v2968_v51, %v2914_v32 }
 0x268   : > { %v2959_v52 = vpop.permute.xlu1 %2958 }
 0x269   : > { %v2919_v33 = vpop.permute.xlu0 %2918  ;;  %v2989_v36 = vsel %vm658_vm10, %v2987_v45, %v2959_v52 }
 0x26a   : > { %7095 = vmatprep.subr.msk.bf16.mxu0 %vm3014_vm11, %v2989_v36  ;;  %v2972_v42 = vsel %vm655_vm8, %v2970_v41, %v2919_v33 }
 0x26d   : > { %v2924_v40 = vpop.permute.xlu0 %2923 }
 0x26e   : > { %v2974_v28 = vsel %vm658_vm10, %v2972_v42, %v2924_v40 }
 0x26f   : > { %v3056_v60 = vsel %vm3014_vm11, %v2974_v28, 0 }
 0x270   : > { %3065 = vmatpush1.bf16.msra.mxu0 %v3056_v60 }
 0x273   : > { %7096 = vmatmul.mubr.msk.bf16.vlgmr.msra.gmra.mrb[0].mxu0 %vm3052_vm14, %v3045_v39 }
 0x27e   : > { %v3050_v20 = vpop.permute.xlu0 %3049 }
 0x346   : > { %v3094_v35 = vpop.f32.mrb[0].mxu0 }
 0x347   : > { %v3095_v57 = vadd.f32 %v3094_v35, %v3050_v20  ;;  %v3096_v16 = vpop.f32.mrb[1].mxu0 }
 0x348   : > { %v3098_v34 = vpop.f32.mrb[2].mxu0  ;;  %v3097_v48 = vadd.f32 %v3096_v16, %v3050_v20 }
 0x349   : > { %vm3101_vm13 = vcmp.gt.f32.partialorder %v3095_v57, 0.0  ;;  %v3103_v55 = vmul.f32 0.01, %v3095_v57  ;;  %v3099_v3 = vpop.f32.mrb[3].mxu0 }
 0x34a   : > { %v3104_v37 = vmul.f32 0.01, %v3097_v48  ;;  %vm3102_vm11 = vcmp.gt.f32.partialorder %v3097_v48, 0.0 }
 0x34b   : > { %v3105_v13 = vsel %vm3101_vm13, %v3095_v57, %v3103_v55 }
 0x34c   : > { %3114 = vrot.lane.b32.xlu0 %v3105_v13, %s7384_s30  ;;  %3108 = vrot.lane.b32.xlu1 %v3105_v13, %s7387_s8  ;;  %v3106_v44 = vsel %vm3102_vm11, %v3097_v48, %v3104_v37 }
 0x350   : > { %3120 = vrot.lane.b32.xlu0 %v3105_v13, %s7382_s28  ;;  %3111 = vrot.lane.b32.xlu1 %v3105_v13, %s7386_s7 }
 0x354   : > { %3126 = vrot.lane.b32.xlu0 %v3105_v13, %s7385_s6  ;;  %3117 = vrot.lane.b32.xlu1 %v3105_v13, %s7383_s29 }
 0x358   : > { %3133 = vrot.lane.b32.xlu0 %v3106_v44, %s7386_s7  ;;  %3123 = vrot.lane.b32.xlu1 %v3105_v13, %s7381_s27 }
 0x35c   : > { %3139 = vrot.lane.b32.xlu0 %v3106_v44, %s7383_s29  ;;  %3130 = vrot.lane.b32.xlu1 %v3106_v44, %s7387_s8 }
 0x360   : > { %3145 = vrot.lane.b32.xlu0 %v3106_v44, %s7381_s27  ;;  %3136 = vrot.lane.b32.xlu1 %v3106_v44, %s7384_s30 }
 0x364   : > { %3142 = vrot.lane.b32.xlu1 %v3106_v44, %s7382_s28 }
 0x368   : > { %3148 = vrot.lane.b32.xlu1 %v3106_v44, %s7385_s6 }
 0x3be   : > { %v3115_v61 = vpop.permute.xlu0 %3114  ;;  %v3109_v2 = vpop.permute.xlu1 %3108 }
 0x3bf   : > { %v3167_v43 = vcombine.low %v3109_v2, %v3115_v61  ;;  %v3168_v30 = vcombine.high %v3109_v2, %v3115_v61 }
 0x3c1   : > { %v3175_v54 = vrot.slane %v3167_v43, %v7652_v19  ;;  %v3182_v9 = vrot.slane %v3168_v30, %v7652_v19 }
 0x3c2   : > { %v3121_v31 = vpop.permute.xlu0 %3120  ;;  %v3112_v29 = vpop.permute.xlu1 %3111 }
 0x3c3   : > { %v3151_v4 = vcombine.low %v3105_v13, %v3112_v29  ;;  %v3152_v22 = vcombine.high %v3105_v13, %v3112_v29 }
 0x3c5   : > { %v3159_v15 = vrot.slane %v3151_v4, %v7652_v19  ;;  %v3166_v7 = vrot.slane %v3152_v22, %v7652_v19 }
 0x3c6   : > { %v3127_v25 = vpop.permute.xlu0 %3126  ;;  %v3118_v56 = vpop.permute.xlu1 %3117 }
 0x3c7   : > { %v3199_v63 = vcombine.low %v3121_v31, %v3127_v25  ;;  %v3200_v17 = vcombine.high %v3121_v31, %v3127_v25  ;;  %v3215_v12 = vcombine.low %v3159_v15, %v3175_v54  ;;  %v3216_v6 = vcombine.high %v3159_v15, %v3175_v54 }
 0x3c8   : > { %v3231_v21 = vcombine.low %v3166_v7, %v3182_v9  ;;  %v3232_v38 = vcombine.high %v3166_v7, %v3182_v9 }
 0x3c9   : > { %v3207_v59 = vrot.slane %v3199_v63, %v7652_v19  ;;  %v3214_v49 = vrot.slane %v3200_v17, %v7652_v19  ;;  %v3223_v50 = vrot.slane %v3215_v12, %v7847_v47  ;;  %v3230_v62 = vrot.slane %v3216_v6, %v7847_v47 }
 0x3ca   : > { %v3134_v27 = vpop.permute.xlu0 %3133  ;;  %v3124_v18 = vpop.permute.xlu1 %3123  ;;  %v3239_v58 = vrot.slane %v3231_v21, %v7847_v47  ;;  %v3246_v36 = vrot.slane %v3232_v38, %v7847_v47 }
 0x3cb   : > { %v3183_v1 = vcombine.low %v3118_v56, %v3124_v18  ;;  %v3184_v24 = vcombine.high %v3118_v56, %v3124_v18  ;;  %v3287_v11 = vcombine.low %v3106_v44, %v3134_v27  ;;  %v3288_v14 = vcombine.high %v3106_v44, %v3134_v27 }
 0x3cd   : > { %v3191_v46 = vrot.slane %v3183_v1, %v7652_v19  ;;  %v3198_v0 = vrot.slane %v3184_v24, %v7652_v19  ;;  %v3295_v51 = vrot.slane %v3287_v11, %v7652_v19  ;;  %v3302_v20 = vrot.slane %v3288_v14, %v7652_v19 }
 0x3ce   : > { %v3140_v10 = vpop.permute.xlu0 %3139  ;;  %v3131_v23 = vpop.permute.xlu1 %3130 }
 0x3cf   : > { %v3247_v53 = vcombine.low %v3191_v46, %v3207_v59  ;;  %v3248_v5 = vcombine.high %v3191_v46, %v3207_v59  ;;  %v3263_v32 = vcombine.low %v3198_v0, %v3214_v49  ;;  %v3264_v8 = vcombine.high %v3198_v0, %v3214_v49 }
 0x3d1   : > { %v3255_v26 = vrot.slane %v3247_v53, %v7847_v47  ;;  %v3262_v45 = vrot.slane %v3248_v5, %v7847_v47  ;;  %v3271_v52 = vrot.slane %v3263_v32, %v7847_v47  ;;  %v3278_v33 = vrot.slane %v3264_v8, %v7847_v47 }
 0x3d2   : > { %v3146_v41 = vpop.permute.xlu0 %3145  ;;  %v3137_v42 = vpop.permute.xlu1 %3136 }
 0x3d3   : > { %v3279_v40 = vcombine.low %v3223_v50, %v3255_v26  ;;  %v3280_v28 = vcombine.high %v3223_v50, %v3255_v26  ;;  %v3281_v60 = vcombine.low %v3230_v62, %v3262_v45  ;;  %v3282_v39 = vcombine.high %v3230_v62, %v3262_v45 }
 0x3d4   : > { %v3283_v35 = vcombine.low %v3239_v58, %v3271_v52  ;;  %v3284_v57 = vcombine.high %v3239_v58, %v3271_v52  ;;  %v9150_v16 = vcombine.low %v3246_v36, %v3278_v33  ;;  %v3319_v34 = vcombine.low %v3140_v10, %v3146_v41 }
 0x3d5   : > { %v3320_v55 = vcombine.high %v3140_v10, %v3146_v41  ;;  %v3303_v3 = vcombine.low %v3131_v23, %v3137_v42  ;;  %v3304_v13 = vcombine.high %v3131_v23, %v3137_v42  ;;  %v3286_v48 = vcombine.high %v3246_v36, %v3278_v33 }
 0x3d6   : > { %v3143_v37 = vpop.permute.xlu1 %3142  ;;  %v7327_v44 = vpack.c.bf16 %v3280_v28, %v3280_v28  ;;  %v7325_v61 = vpack.c.bf16 %v3279_v40, %v3279_v40  ;;  %v7331_v2 = vpack.c.bf16 %v3282_v39, %v3282_v39  ;;  %v3327_v31 = vrot.slane %v3319_v34, %v7652_v19 }
 0x3d7   : > { %v3311_v29 = vrot.slane %v3303_v3, %v7652_v19  ;;  %v3318_v4 = vrot.slane %v3304_v13, %v7652_v19  ;;  %v7329_v43 = vpack.c.bf16 %v3281_v60, %v3281_v60  ;;  %v3334_v22 = vrot.slane %v3320_v55, %v7652_v19 }
 0x3d8   : > { %v3489_v25 = vshrl.u32 %v7327_v44, 16  ;;  %v3492_v56 = vshll.u32 %v7327_v44, 16  ;;  %v3472_v30 = vshrl.u32 %v7325_v61, 16  ;;  %v3475_v1 = vshll.u32 %v7325_v61, 16 }
 0x3d9   : > { %v3351_v15 = vcombine.low %v3295_v51, %v3311_v29  ;;  %v3352_v63 = vcombine.high %v3295_v51, %v3311_v29  ;;  %v3367_v17 = vcombine.low %v3302_v20, %v3318_v4  ;;  %v3368_v54 = vcombine.high %v3302_v20, %v3318_v4 }
 0x3da   : > { %v3149_v7 = vpop.permute.xlu1 %3148  ;;  %v9156_v27 = vrot.slane %v3489_v25, 7  ;;  %v9158_v18 = vrot.slane %v3472_v30, 7  ;;  %v3523_v24 = vshrl.u32 %v7331_v2, 16  ;;  %v3526_v59 = vshll.u32 %v7331_v2, 16 }
 0x3db   : > { %v3359_v9 = vrot.slane %v3351_v15, %v7847_v47  ;;  %v3366_v12 = vrot.slane %v3352_v63, %v7847_v47  ;;  %v3375_v6 = vrot.slane %v3367_v17, %v7847_v47  ;;  %v3335_v49 = vcombine.low %v3143_v37, %v3149_v7 }
 0x3dc   : > { %v3336_v46 = vcombine.high %v3143_v37, %v3149_v7  ;;  %v3494_v0 = vor.u32 %v3492_v56, %v9156_v27  ;;  %v3477_v21 = vor.u32 %v3475_v1, %v9158_v18  ;;  %v3382_v38 = vrot.slane %v3368_v54, %v7847_v47 }
 0x3dd   : > { %v9166_v11 = vrot.slane %v3523_v24, 7  ;;  %v3506_v10 = vshrl.u32 %v7329_v43, 16  ;;  %v7335_v23 = vpack.c.bf16 %v3284_v57, %v3284_v57  ;;  %v3343_v53 = vrot.slane %v3335_v49, %v7652_v19 }
 0x3de   : > { %v3350_v5 = vrot.slane %v3336_v46, %v7652_v19  ;;  %3613 = vrot.lane.b32.xlu1 %v3494_v0, %s7376_s24  ;;  %3607 = vrot.lane.b32.xlu0 %v3477_v21, %s7376_s24  ;;  %v3509_v32 = vshll.u32 %v7329_v43, 16  ;;  %v7333_v8 = vpack.c.bf16 %v3283_v35, %v3283_v35  ;;  %v7339_v57 = vpack.c.bf16 %v3286_v48, %v3286_v48 }
 0x3df   : > { %v3528_v50 = vor.u32 %v3526_v59, %v9166_v11  ;;  %v9173_v62 = vrot.slane %v3506_v10, 7  ;;  %v3557_v14 = vshrl.u32 %v7335_v23, 16  ;;  %v3560_v26 = vshll.u32 %v7335_v23, 16 }
 0x3e0   : > { %v3383_v45 = vcombine.low %v3327_v31, %v3343_v53  ;;  %v3384_v52 = vcombine.high %v3327_v31, %v3343_v53  ;;  %v3399_v33 = vcombine.low %v3334_v22, %v3350_v5  ;;  %v3400_v58 = vcombine.high %v3334_v22, %v3350_v5 }
 0x3e1   : > { %v3511_v36 = vor.u32 %v3509_v32, %v9173_v62  ;;  %v9176_v51 = vrot.slane %v3557_v14, 7  ;;  %v3540_v41 = vshrl.u32 %v7333_v8, 16  ;;  %v3543_v42 = vshll.u32 %v7333_v8, 16 }
 0x3e2   : > { %v3391_v40 = vrot.slane %v3383_v45, %v7847_v47  ;;  %v3398_v28 = vrot.slane %v3384_v52, %v7847_v47  ;;  %v3407_v60 = vrot.slane %v3399_v33, %v7847_v47  ;;  %v3414_v39 = vrot.slane %v3400_v58, %v7847_v47  ;;  %3625 = vrot.lane.b32.xlu1 %v3528_v50, %s7376_s24 }
 0x3e3   : > { %3619 = vrot.lane.b32.xlu0 %v3511_v36, %s7376_s24  ;;  %v3562_v20 = vor.u32 %v3560_v26, %v9176_v51  ;;  %v9185_v35 = vrot.slane %v3540_v41, 7  ;;  %v7337_v34 = vpack.c.bf16 %v9150_v16, %v9150_v16  ;;  %v3591_v4 = vshrl.u32 %v7339_v57, 16 }
 0x3e4   : > { %v3415_v55 = vcombine.low %v3359_v9, %v3391_v40  ;;  %v3416_v3 = vcombine.high %v3359_v9, %v3391_v40  ;;  %v3417_v13 = vcombine.low %v3366_v12, %v3398_v28  ;;  %v3418_v37 = vcombine.high %v3366_v12, %v3398_v28 }
 0x3e5   : > { %v3419_v44 = vcombine.low %v3375_v6, %v3407_v60  ;;  %v3420_v61 = vcombine.high %v3375_v6, %v3407_v60  ;;  %v3421_v2 = vcombine.low %v3382_v38, %v3414_v39  ;;  %v3422_v31 = vcombine.high %v3382_v38, %v3414_v39 }
 0x3e6   : > { %3637 = vrot.lane.b32.xlu1 %v3562_v20, %s7376_s24  ;;  %v3545_v29 = vor.u32 %v3543_v42, %v9185_v35  ;;  %v3574_v43 = vshrl.u32 %v7337_v34, 16  ;;  %v3594_v22 = vshll.u32 %v7339_v57, 16  ;;  %v7328_v25 = vpack.c.bf16 %v3416_v3, %v3416_v3 }
 0x3e7   : > { %v7326_v48 = vpack.c.bf16 %v3415_v55, %v3415_v55  ;;  %v7332_v56 = vpack.c.bf16 %v3418_v37, %v3418_v37  ;;  %v9192_v16 = vrot.slane %v3591_v4, 7  ;;  %v3577_v15 = vshll.u32 %v7337_v34, 16 }
 0x3e8   : > { %3631 = vrot.lane.b32.xlu0 %v3545_v29, %s7376_s24  ;;  %v9194_v30 = vrot.slane %v3574_v43, 7  ;;  %v7330_v63 = vpack.c.bf16 %v3417_v13, %v3417_v13  ;;  %v3497_v17 = vshrl.u32 %v7328_v25, 16  ;;  %v7336_v1 = vpack.c.bf16 %v3420_v61, %v3420_v61 }
 0x3e9   : > { %v3480_v54 = vshrl.u32 %v7326_v48, 16  ;;  %v3531_v7 = vshrl.u32 %v7332_v56, 16  ;;  %v3596_v24 = vor.u32 %v3594_v22, %v9192_v16  ;;  %v7334_v6 = vpack.c.bf16 %v3419_v44, %v3419_v44 }
 0x3ea   : > { %v3579_v9 = vor.u32 %v3577_v15, %v9194_v30  ;;  %v3514_v12 = vshrl.u32 %v7330_v63, 16  ;;  %v3499_v59 = vrot.slane %v3497_v17, 7  ;;  %v3565_v38 = vshrl.u32 %v7336_v1, 16 }
 0x3eb   : > { %v3482_v49 = vrot.slane %v3480_v54, 7  ;;  %3649 = vrot.lane.b32.xlu1 %v3596_v24, %s7376_s24  ;;  %v3533_v21 = vrot.slane %v3531_v7, 7  ;;  %v3548_v23 = vshrl.u32 %v7334_v6, 16  ;;  %v7340_v53 = vpack.c.bf16 %v3422_v31, %v3422_v31 }
 0x3ec   : > { %3643 = vrot.lane.b32.xlu0 %v3579_v9, %s7376_s24  ;;  %v3504_v46 = vrot.slane %v3499_v59, 4  ;;  %v3516_v10 = vrot.slane %v3514_v12, 7  ;;  %v7338_v5 = vpack.c.bf16 %v3421_v2, %v3421_v2  ;;  %v3567_v8 = vrot.slane %v3565_v38, 7  ;;  %v3686_v9 = vld [vmem:[#allocation2 + $0xc] sm:$0xf] }
 0x3ed   : > { %v3487_v0 = vrot.slane %v3482_v49, 4  ;;  %v3538_v32 = vrot.slane %v3533_v21, 4  ;;  %v3550_v14 = vrot.slane %v3548_v23, 7  ;;  %v3599_v26 = vshrl.u32 %v7340_v53, 16  ;;  %v3707_v23 = vld [vmem:[#allocation2 + $0x30] sm:$0xf] }
 0x3ee   : > { %v3521_v50 = vrot.slane %v3516_v10, 4  ;;  %v3582_v45 = vshrl.u32 %v7338_v5, 16  ;;  %v3572_v52 = vrot.slane %v3567_v8, 4  ;;  %v3500_v41 = vshll.u32 %v7328_v25, 16 }
 0x3ef   : > { %3617 = vrot.lane.b32.xlu1 %v3504_v46, %s7376_s24  ;;  %v3555_v33 = vrot.slane %v3550_v14, 4  ;;  %v3601_v58 = vrot.slane %v3599_v26, 7  ;;  %v3483_v42 = vshll.u32 %v7326_v48, 16  ;;  %v3495_v20 = vrot.slane %v9156_v27, 4  ;;  %v3693_v46 = vld [vmem:[#allocation2 + $0x18] sm:$0xf] }
 0x3f0   : > { %3611 = vrot.lane.b32.xlu0 %v3487_v0, %s7376_s24  ;;  %v3584_v36 = vrot.slane %v3582_v45, 7  ;;  %v3502_v60 = vor.u32 %v3500_v41, %v3499_v59  ;;  %v3478_v57 = vrot.slane %v9158_v18, 4  ;;  %v3534_v34 = vshll.u32 %v7332_v56, 16  ;;  %v3721_v26 = vld [vmem:[#allocation2 + $0x48] sm:$0xf] }
 0x3f1   : > { %v3606_v40 = vrot.slane %v3601_v58, 4  ;;  %v3485_v39 = vor.u32 %v3483_v42, %v3482_v49  ;;  %v3517_v55 = vshll.u32 %v7330_v63, 16  ;;  %v3529_v2 = vrot.slane %v9166_v11, 4  ;;  %v3728_v45 = vld [vmem:[#allocation2 + $0x54] sm:$0xf] }
 0x3f2   : > { %v3589_v28 = vrot.slane %v3584_v36, 4  ;;  %v3503_v13 = vsel %vm7469_vm3, %v3495_v20, %v3502_v60  ;;  %v3536_v44 = vor.u32 %v3534_v34, %v3533_v21  ;;  %v3512_v27 = vrot.slane %v9173_v62, 4 }
 0x3f3   : > { %3629 = vrot.lane.b32.xlu1 %v3538_v32, %s7376_s24  ;;  %v3486_v37 = vsel %vm7469_vm3, %v3478_v57, %v3485_v39  ;;  %v3519_v61 = vor.u32 %v3517_v55, %v3516_v10  ;;  %v3568_v31 = vshll.u32 %v7336_v1, 16  ;;  %v3551_v18 = vshll.u32 %v7334_v6, 16  ;;  %v3679_v1 = vld [vmem:[#allocation2] sm:$0xf]  ;;  %v3714_v10 = vld [vmem:[#allocation2 + $0x3c] sm:$0xf] }
 0x3f4   : > { %3623 = vrot.lane.b32.xlu0 %v3521_v50, %s7376_s24  ;;  %v3537_v29 = vsel %vm7469_vm3, %v3529_v2, %v3536_v44  ;;  %v3563_v25 = vrot.slane %v9176_v51, 4  ;;  %v3546_v11 = vrot.slane %v9185_v35, 4  ;;  %v3602_v48 = vshll.u32 %v7340_v53, 16  ;;  %v3690_v39 = vld [vmem:[#allocation2 + $0x14] sm:$0x1] }
 0x3f5   : > { %v3520_v4 = vsel %vm7469_vm3, %v3512_v27, %v3519_v61  ;;  %v3570_v43 = vor.u32 %v3568_v31, %v3567_v8  ;;  %v3553_v22 = vor.u32 %v3551_v18, %v3550_v14  ;;  %v3585_v62 = vshll.u32 %v7338_v5, 16  ;;  %v3697_v44 = vld [vmem:[#allocation2 + $0x20] sm:$0x1]  ;;  %v3704_v2 = vld [vmem:[#allocation2 + $0x2c] sm:$0x1] }
 0x3f6   : > { %v3604_v63 = vor.u32 %v3602_v48, %v3601_v58  ;;  %v3597_v54 = vrot.slane %v9192_v16, 4  ;;  %v3580_v51 = vrot.slane %v9194_v30, 4  ;;  %v3700_v30 = vld [vmem:[#allocation2 + $0x24] sm:$0xf] }
 0x3f7   : > { %3641 = vrot.lane.b32.xlu1 %v3572_v52, %s7376_s24  ;;  %v3571_v56 = vsel %vm7469_vm3, %v3563_v25, %v3570_v43  ;;  %v3554_v15 = vsel %vm7469_vm3, %v3546_v11, %v3553_v22  ;;  %v3587_v17 = vor.u32 %v3585_v62, %v3584_v36  ;;  %v3711_v22 = vld [vmem:[#allocation2 + $0x38] sm:$0x1]  ;;  %v3718_v25 = vld [vmem:[#allocation2 + $0x44] sm:$0x1] }
 0x3f8   : > { %3635 = vrot.lane.b32.xlu0 %v3555_v33, %s7376_s24  ;;  %v3605_v35 = vsel %vm7469_vm3, %v3597_v54, %v3604_v63 }
 0x3f9   : > { %v3588_v7 = vsel %vm7469_vm3, %v3580_v51, %v3587_v17  ;;  %vm11905_vm3 = vcmask 1043456  }
 0x3fa   : > { %vm11953_vm13 = vmmov %vm11905_vm3 }
 0x3fb   : > { %3653 = vrot.lane.b32.xlu1 %v3606_v40, %s7376_s24 }
 0x3fc   : > { %3647 = vrot.lane.b32.xlu0 %v3589_v28, %s7376_s24  ;;  %v3683_v28 = vld [vmem:[#allocation2 + $0x8] sm:$0x1] }
 0x3ff   : > { %3609 = vrot.lane.b32.xlu1 %v3486_v37, %s7376_s24 }
 0x400   : > { %3615 = vrot.lane.b32.xlu0 %v3503_v13, %s7376_s24 }
 0x403   : > { %3621 = vrot.lane.b32.xlu1 %v3520_v4, %s7376_s24 }
 0x404   : > { %3627 = vrot.lane.b32.xlu0 %v3537_v29, %s7376_s24 }
 0x407   : > { %3633 = vrot.lane.b32.xlu1 %v3554_v15, %s7376_s24 }
 0x408   : > { %3639 = vrot.lane.b32.xlu0 %v3571_v56, %s7376_s24 }
 0x40b   : > { %3645 = vrot.lane.b32.xlu1 %v3588_v7, %s7376_s24 }
 0x40c   : > { %3651 = vrot.lane.b32.xlu0 %v3605_v35, %s7376_s24 }
 0x450   : > { %v3608_v24 = vpop.permute.xlu0 %3607  ;;  %v3614_v12 = vpop.permute.xlu1 %3613 }
 0x451   : > { %v3680_v59 = vsel %vm7502_vm7, %v3608_v24, %v3679_v1  ;;  %v3687_v16 = vsel %vm7502_vm7, %v3614_v12, %v3686_v9  ;;  %v3725_v9 = vld [vmem:[#allocation2 + $0x50] sm:$0x1]  ;;  %v3732_v12 = vld [vmem:[#allocation2 + $0x5c] sm:$0x1] }
 0x452   : > { %3681 = vst [vmem:[#allocation2] sm:$0xf] %v3680_v59  ;;  %3688 = vst [vmem:[#allocation2 + $0xc] sm:$0xf] %v3687_v16 }
 0x454   : > { %v3626_v49 = vpop.permute.xlu1 %3625 }
 0x455   : > { %v3620_v0 = vpop.permute.xlu0 %3619  ;;  %v3701_v21 = vsel %vm7502_vm7, %v3626_v49, %v3700_v30 }
 0x456   : > { %v3694_v38 = vsel %vm7502_vm7, %v3620_v0, %v3693_v46  ;;  %3702 = vst [vmem:[#allocation2 + $0x24] sm:$0xf] %v3701_v21 }
 0x457   : > { %3695 = vst [vmem:[#allocation2 + $0x18] sm:$0xf] %v3694_v38 }
 0x458   : > { %v3638_v53 = vpop.permute.xlu1 %3637 }
 0x459   : > { %v3715_v5 = vsel %vm7502_vm7, %v3638_v53, %v3714_v10  ;;  %v9250_v32 = vld [vmem:[#allocation2] sm:$0xf]  ;;  %v9252_v8 = vld [vmem:[#allocation2 + $0xc] sm:$0xf] }
 0x45a   : > { %v3632_v50 = vpop.permute.xlu0 %3631  ;;  %3716 = vst [vmem:[#allocation2 + $0x3c] sm:$0xf] %v3715_v5  ;;  %4037 = vrot.lane.b32.xlu0 %v9250_v32, %s7377_s25  ;;  %4359 = vrot.lane.b32.xlu1 %v9252_v8, %s7378_s26  ;;  %v4682_v35 = vshrl.u32 %v9250_v32, 16  ;;  %v4685_v7 = vshll.u32 %v9250_v32, 16  ;;  %v4706_v16 = vshrl.u32 %v9252_v8, 16  ;;  %v4709_v30 = vshll.u32 %v9252_v8, 16 }
 0x45b   : > { %v3708_v14 = vsel %vm7502_vm7, %v3632_v50, %v3707_v23  ;;  %v9324_v38 = vld [vmem:[#allocation2] sm:$0xe] }
 0x45c   : > { %3709 = vst [vmem:[#allocation2 + $0x30] sm:$0xf] %v3708_v14  ;;  %v4684_v10 = vrot.slane %v4682_v35, 4  ;;  %v4687_v23 = vrot.slane %v4685_v7, 5  ;;  %v4708_v50 = vrot.slane %v4706_v16, 4  ;;  %v4711_v14 = vrot.slane %v4709_v30, 5 }
 0x45d   : > { %v9260_v52 = vld [vmem:[#allocation2 + $0x24] sm:$0xf]  ;;  %v3650_v58 = vpop.permute.xlu1 %3649 }
 0x45e   : > { %v3644_v33 = vpop.permute.xlu0 %3643  ;;  %4041 = vrot.lane.b32.xlu0 %v9252_v8, %s7377_s25  ;;  %4367 = vrot.lane.b32.xlu1 %v9260_v52, %s7378_s26  ;;  %v3729_v41 = vsel %vm7502_vm7, %v3650_v58, %v3728_v45  ;;  %v9270_v42 = vld [vmem:[#allocation2 + $0x18] sm:$0xf] }
 0x45f   : > { %v3722_v36 = vsel %vm7502_vm7, %v3644_v33, %v3721_v26  ;;  %3730 = vst [vmem:[#allocation2 + $0x54] sm:$0xf] %v3729_v41  ;;  %v4730_v53 = vshrl.u32 %v9270_v42, 16  ;;  %v4733_v5 = vshll.u32 %v9270_v42, 16  ;;  %v4754_v33 = vshrl.u32 %v9260_v52, 16  ;;  %vm11925_vm7 = vmmov %vm11905_vm3 }
 0x460   : > { %3723 = vst [vmem:[#allocation2 + $0x48] sm:$0xf] %v3722_v36  ;;  %v7197_v41 = vrot.slane %v9324_v38, 9 }
 0x461   : > { %v9272_v40 = vld [vmem:[#allocation2 + $0x3c] sm:$0xf]  ;;  %v3618_v20 = vpop.permute.xlu1 %3617  ;;  %v4732_v34 = vrot.slane %v4730_v53, 4 }
 0x462   : > { %v3612_v60 = vpop.permute.xlu0 %3611  ;;  %4045 = vrot.lane.b32.xlu0 %v9270_v42, %s7377_s25  ;;  %4375 = vrot.lane.b32.xlu1 %v9272_v40, %s7378_s26  ;;  %v3785_v57 = vcombine.low %v9252_v8, %v9272_v40  ;;  %v3691_v3 = vsel %vm7523_vm9, %v3618_v20, %v3690_v39  ;;  %v9328_v8 = vld [vmem:[#allocation2 + $0xc] sm:$0xe]  ;;  %v4802_v53 = vshrl.u32 %v9272_v40, 16 }
 0x463   : > { %v3684_v55 = vsel %vm7523_vm9, %v3612_v60, %v3683_v28  ;;  %v9284_v13 = vld [vmem:[#allocation2 + $0x30] sm:$0xf]  ;;  %3692 = vst [vmem:[#allocation2 + $0x14] sm:$0x1] %v3691_v3  ;;  %v4757_v28 = vshll.u32 %v9260_v52, 16  ;;  %v7198_v20 = vrot.slane %v9328_v8, 9 }
 0x464   : > { %3685 = vst [vmem:[#allocation2 + $0x8] sm:$0x1] %v3684_v55  ;;  %v3751_v37 = vcombine.low %v9250_v32, %v9284_v13  ;;  %v3792_v48 = vrot.slane %v3785_v57, %v7652_v19  ;;  %v4688_v57 = vor.u32 %v4687_v23, %v4684_v10  ;;  %v4735_v55 = vrot.slane %v4733_v5, 5  ;;  %v9346_v3 = vld [vmem:[#allocation2 + $0x18] sm:$0xe] }
 0x465   : > { %v3630_v27 = vpop.permute.xlu1 %3629  ;;  %v9372_v35 = vld [vmem:[#allocation2 + $0x30] sm:$0xe] }
 0x466   : > { %v3624_v61 = vpop.permute.xlu0 %3623  ;;  %4049 = vrot.lane.b32.xlu0 %v9260_v52, %s7377_s25  ;;  %v3705_v18 = vsel %vm7523_vm9, %v3630_v27, %v3704_v2  ;;  %v9294_v29 = vld [vmem:[#allocation2 + $0x54] sm:$0xf]  ;;  %v3758_v63 = vrot.slane %v3751_v37, %v7652_v19  ;;  %v9348_v37 = vld [vmem:[#allocation2 + $0x24] sm:$0xe]  ;;  %v7201_v5 = vrot.slane %v9372_v35, 9 }
 0x467   : > { %v3698_v31 = vsel %vm7523_vm9, %v3624_v61, %v3697_v44  ;;  %v9296_v4 = vld [vmem:[#allocation2 + $0x48] sm:$0xf]  ;;  %3706 = vst [vmem:[#allocation2 + $0x2c] sm:$0x1] %v3705_v18  ;;  %4383 = vrot.lane.b32.xlu1 %v9294_v29, %s7378_s26  ;;  %v3793_v43 = vcombine.low %v9260_v52, %v9294_v29  ;;  %v4712_v44 = vor.u32 %v4711_v14, %v4708_v50  ;;  %v9406_v14 = vld [vmem:[#allocation2 + $0x54] sm:$0xe] }
 0x468   : > { %3699 = vst [vmem:[#allocation2 + $0x20] sm:$0x1] %v3698_v31  ;;  %v3759_v11 = vcombine.low %v9270_v42, %v9296_v4  ;;  %v4756_v31 = vrot.slane %v4754_v33, 4  ;;  %v9374_v7 = vld [vmem:[#allocation2 + $0x48] sm:$0xe] }
 0x469   : > { %v3800_v62 = vrot.slane %v3793_v43, %v7652_v19  ;;  %v3642_v15 = vpop.permute.xlu1 %3641  ;;  %v7203_v50 = vrot.slane %v9374_v7, 9 }
 0x46a   : > { %v3636_v56 = vpop.permute.xlu0 %3635  ;;  %4053 = vrot.lane.b32.xlu0 %v9284_v13, %s7377_s25  ;;  %v3766_v17 = vrot.slane %v3759_v11, %v7652_v19  ;;  %v3719_v51 = vsel %vm7523_vm9, %v3642_v15, %v3718_v25  ;;  %v9358_v25 = vld [vmem:[#allocation2 + $0x3c] sm:$0xe]  ;;  %v4759_v11 = vrot.slane %v4757_v28, 5 }
 0x46b   : > { %v3712_v54 = vsel %vm7523_vm9, %v3636_v56, %v3711_v22  ;;  %v3801_v1 = vcombine.low %v3792_v48, %v3800_v62  ;;  %v3802_v24 = vcombine.high %v3792_v48, %v3800_v62  ;;  %3720 = vst [vmem:[#allocation2 + $0x44] sm:$0x1] %v3719_v51  ;;  %v11723_v62 = vmov 0  }
 0x46c   : > { %3713 = vst [vmem:[#allocation2 + $0x38] sm:$0x1] %v3712_v54  ;;  %v3767_v6 = vcombine.low %v3758_v63, %v3766_v17  ;;  %v3768_v59 = vcombine.high %v3758_v63, %v3766_v17  ;;  %v7199_v63 = vrot.slane %v9346_v3, 9  ;;  %v7200_v17 = vrot.slane %v9348_v37, 9 }
 0x46d   : > { %v3654_v46 = vpop.permute.xlu1 %3653  ;;  %v9337_v36 = vrot.slane %v3801_v1, %v7847_v47  ;;  %v3816_v39 = vrot.slane %v3802_v24, %v7847_v47  ;;  %v4689_v54 = vrot.slane %v4688_v57, 4  ;;  %v4736_v51 = vor.u32 %v4735_v55, %v4732_v34 }
 0x46e   : > { %v3648_v49 = vpop.permute.xlu0 %3647  ;;  %4057 = vrot.lane.b32.xlu0 %v9272_v40, %s7377_s25  ;;  %v3733_v21 = vsel %vm7523_vm9, %v3654_v46, %v3732_v12  ;;  %v9334_v58 = vrot.slane %v3767_v6, %v7847_v47  ;;  %v3782_v60 = vrot.slane %v3768_v59, %v7847_v47  ;;  %v4778_v1 = vshrl.u32 %v9284_v13, 16 }
 0x46f   : > { %v3726_v0 = vsel %vm7523_vm9, %v3648_v49, %v3725_v9  ;;  %3734 = vst [vmem:[#allocation2 + $0x5c] sm:$0x1] %v3733_v21  ;;  %11720 = vst [vmem:[#allocation17_spill] sm:$0xff] %v9337_v36  ;;  %v3891_v2 = vshrl.u32 %v9337_v36, 16  ;;  %v3903_v43 = vshrl.u32 %v3816_v39, 16  ;;  %v9368_v15 = vcombine.high %v9337_v36, %v11723_v62 }
 0x470   : > { %3727 = vst [vmem:[#allocation2 + $0x50] sm:$0x1] %v3726_v0  ;;  %11719 = vst [vmem:[#allocation22_spill] sm:$0xff] %v9334_v58  ;;  %v3890_v61 = vshrl.u32 %v9334_v58, 16  ;;  %v3902_v18 = vshrl.u32 %v3782_v60, 16  ;;  %v9354_v22 = vpack.i.b16 %v3816_v39, %v3782_v60  ;;  %v9364_v56 = vcombine.high %v9334_v58, %v11723_v62 }
 0x471   : > { %v3610_v45 = vpop.permute.xlu1 %3609  ;;  %v4781_v24 = vshll.u32 %v9284_v13, 16  ;;  %v7202_v49 = vrot.slane %v9358_v25, 9  ;;  %v4713_v46 = vrot.slane %v4712_v44, 4  ;;  %v9392_v0 = vcombine.high %v3782_v60, %v11723_v62  ;;  %vm11929_vm9 = vmmov %vm11905_vm3 }
 0x472   : > { %v3616_v26 = vpop.permute.xlu0 %3615  ;;  %4061 = vrot.lane.b32.xlu0 %v9296_v4, %s7377_s25  ;;  %3682 = vst.msk [vmem:[#allocation2 + $0x4] sm:$0xf] %vm367_vm5, %v3610_v45  ;;  %11721 = vst [vmem:[#allocation18_spill] sm:$0xff] %v9354_v22  ;;  %v9360_v48 = vpack.i.b16 %v3891_v2, %v3890_v61  ;;  %v9378_v9 = vpack.i.b16 %v3903_v43, %v3902_v18  ;;  %v9382_v12 = vpack.i.b16 %v9368_v15, %v9364_v56 }
 0x473   : > { %3689 = vst.msk [vmem:[#allocation2 + $0x10] sm:$0xf] %vm367_vm5, %v3616_v26  ;;  %v9395_v21 = vcombine.high %v3816_v39, %v11723_v62  ;;  %v4760_v23 = vor.u32 %v4759_v11, %v4756_v31  ;;  %v4737_v26 = vrot.slane %v4736_v51, 4  ;;  %v4805_v45 = vshll.u32 %v9272_v40, 16 }
 0x474   : > { %11722 = vst [vmem:[#allocation20_spill] sm:$0xff] %v9360_v48  ;;  %11724 = vst [vmem:[#allocation15_spill] sm:$0xff] %v9378_v9  ;;  %v4780_v33 = vrot.slane %v4778_v1, 4  ;;  %v4783_v28 = vrot.slane %v4781_v24, 5  ;;  %v4826_v60 = vshrl.u32 %v9296_v4, 16  ;;  %v4829_v39 = vshll.u32 %v9296_v4, 16 }
 0x475   : > { %v3622_v52 = vpop.permute.xlu1 %3621  ;;  %11725 = vst [vmem:[#allocation14_spill] sm:$0xff] %v9382_v12  ;;  %v7204_v18 = vrot.slane %v9406_v14, 9  ;;  %v4761_v43 = vrot.slane %v4760_v23, 4 }
 0x476   : > { %v3628_v27 = vpop.permute.xlu0 %3627  ;;  %4065 = vrot.lane.b32.xlu0 %v9294_v29, %s7377_s25  ;;  %3696 = vst.msk [vmem:[#allocation2 + $0x1c] sm:$0xf] %vm367_vm5, %v3622_v52  ;;  %v9647_v22 = vld [vmem:[#allocation2 + $0x5c] sm:$0x1] }
 0x477   : > { %3703 = vst.msk [vmem:[#allocation2 + $0x28] sm:$0xf] %vm367_vm5, %v3628_v27  ;;  %v9423_v27 = vpack.i.b16 %v9395_v21, %v9392_v0 }
 0x479   : > { %v3634_v59 = vpop.permute.xlu1 %3633  ;;  %v9384_v16 = vld [vmem:[#allocation2 + $0x4] sm:$0xf]  ;;  %11726 = vst [vmem:[#allocation8_spill] sm:$0xff] %v9423_v27 }
 0x47a   : > { %v3640_v6 = vpop.permute.xlu0 %3639  ;;  %4355 = vrot.lane.b32.xlu0 %v9250_v32, %s7378_s26  ;;  %v9388_v30 = vld [vmem:[#allocation2 + $0x10] sm:$0xf]  ;;  %3710 = vst.msk [vmem:[#allocation2 + $0x34] sm:$0xf] %vm367_vm5, %v3634_v59  ;;  %4039 = vrot.lane.b32.xlu1 %v9384_v16, %s7377_s25  ;;  %v4691_v32 = vshll.u32 %v9384_v16, 16  ;;  %v4831_v59 = vrot.slane %v4829_v39, 5 }
 0x47b   : > { %3717 = vst.msk [vmem:[#allocation2 + $0x40] sm:$0xf] %vm367_vm5, %v3640_v6  ;;  %v4715_v10 = vshll.u32 %v9388_v30, 16  ;;  %v11525_v31 = vrot.slane %v9388_v30, 5  ;;  %v4828_v6 = vrot.slane %v4826_v60, 4  ;;  %v4804_v60 = vrot.slane %v4802_v53, 4 }
 0x47c   : > { %v9417_v61 = vrot.slane %v4691_v32, 5  ;;  %v4850_v32 = vshrl.u32 %v9294_v29, 16 }
 0x47d   : > { %v3646_v34 = vpop.permute.xlu1 %3645  ;;  %v9413_v55 = vld [vmem:[#allocation2 + $0x1c] sm:$0xf]  ;;  %v9419_v2 = vrot.slane %v4715_v10, 5  ;;  %v4853_v10 = vshll.u32 %v9294_v29, 16  ;;  %v4832_v29 = vor.u32 %v4831_v59, %v4828_v6 }
 0x47e   : > { %v3652_v57 = vpop.permute.xlu0 %3651  ;;  %4363 = vrot.lane.b32.xlu0 %v9270_v42, %s7378_s26  ;;  %v9415_v44 = vld [vmem:[#allocation2 + $0x28] sm:$0xf]  ;;  %3724 = vst.msk [vmem:[#allocation2 + $0x4c] sm:$0xf] %vm367_vm5, %v3646_v34  ;;  %4043 = vrot.lane.b32.xlu1 %v9388_v30, %s7377_s25  ;;  %v11522_v42 = vrot.slane %v9384_v16, 5  ;;  %v9437_v51 = vsel %vm7750_vm15, %v4689_v54, %v9417_v61  ;;  %v4739_v35 = vshll.u32 %v9413_v55, 16  ;;  %v9480_v34 = vsel %vm7534_vm12, %v7198_v20, %v11525_v31 }
 0x47f   : > { %3731 = vst.msk [vmem:[#allocation2 + $0x58] sm:$0xf] %vm367_vm5, %v3652_v57  ;;  %11728 = vst [vmem:[#allocation19_spill] sm:$0xff] %v9437_v51  ;;  %v9443_v1 = vsel %vm7750_vm15, %v4713_v46, %v9419_v2  ;;  %v4763_v24 = vshll.u32 %v9415_v44, 16  ;;  %v4784_v57 = vor.u32 %v4783_v28, %v4780_v33  ;;  %v11528_v38 = vrot.slane %v9413_v55, 5 }
 0x480   : > { %11729 = vst [vmem:[#allocation10_spill] sm:$0xff] %v9443_v1  ;;  %v9454_v14 = vrot.slane %v4739_v35, 5  ;;  %v9472_v28 = vsel %vm7534_vm12, %v7197_v41, %v11522_v42  ;;  %v11529_v8 = vrot.slane %v9415_v44, 5  ;;  %v4852_v53 = vrot.slane %v4850_v32, 4  ;;  %vm11918_vm5 = vmmov %vm11905_vm3 }
 0x481   : > { %v9450_v54 = vld [vmem:[#allocation2 + $0x34] sm:$0xf]  ;;  %v9456_v46 = vrot.slane %v4763_v24, 5 }
 0x482   : > { %4371 = vrot.lane.b32.xlu0 %v9284_v13, %s7378_s26  ;;  %v9452_v23 = vld [vmem:[#allocation2 + $0x40] sm:$0xf]  ;;  %4047 = vrot.lane.b32.xlu1 %v9413_v55, %s7377_s25  ;;  %v11523_v13 = vrot.slane %v9450_v54, 5  ;;  %v9485_v35 = vsel %vm7750_vm15, %v4737_v26, %v9454_v14  ;;  %v4787_v24 = vshll.u32 %v9450_v54, 16  ;;  %v9553_v40 = vsel %vm7534_vm12, %v7200_v17, %v11529_v8 }
 0x483   : > { %v11524_v39 = vrot.slane %v9452_v23, 5  ;;  %11731 = vst [vmem:[#allocation23_spill] sm:$0xff] %v9485_v35  ;;  %v9519_v25 = vsel %vm7750_vm15, %v4761_v43, %v9456_v46  ;;  %v4807_v43 = vrot.slane %v4805_v45, 5  ;;  %v9616_v8 = vld [vmem:[#allocation2 + $0x20] sm:$0x1]  ;;  %v4815_v48 = vshrl.u32 %v9452_v23, 16 }
 0x484   : > { %v9493_v41 = vsel %vm7534_vm12, %v7201_v5, %v11523_v13  ;;  %v9514_v13 = vrot.slane %v4787_v24, 5  ;;  %11732 = vst [vmem:[#allocation25_spill] sm:$0xff] %v9519_v25  ;;  %v4785_v24 = vrot.slane %v4784_v57, 4 }
 0x485   : > { %v9502_v20 = vsel %vm7534_vm12, %v7202_v49, %v11524_v39  ;;  %v9506_v26 = vld [vmem:[#allocation2 + $0x4c] sm:$0xf]  ;;  %v5891_v5 = vcombine.low %v9472_v28, %v9493_v41  ;;  %v9639_v49 = vld [vmem:[#allocation2 + $0x44] sm:$0x1] }
 0x486   : > { %4379 = vrot.lane.b32.xlu0 %v9296_v4, %s7378_s26  ;;  %v9508_v52 = vld [vmem:[#allocation2 + $0x58] sm:$0xf]  ;;  %v5925_v42 = vcombine.low %v9480_v34, %v9502_v20  ;;  %4051 = vrot.lane.b32.xlu1 %v9415_v44, %s7377_s25  ;;  %v11526_v39 = vrot.slane %v9506_v26, 5  ;;  %v9537_v4 = vsel %vm7534_vm12, %v7199_v63, %v11528_v38  ;;  %v9572_v37 = vsel %vm7750_vm15, %v4785_v24, %v9514_v13 }
 0x487   : > { %v11527_v31 = vrot.slane %v9508_v52, 5  ;;  %11733 = vst [vmem:[#allocation16_spill] sm:$0xff] %v9572_v37  ;;  %v4835_v17 = vshll.u32 %v9506_v26, 16  ;;  %v9576_v45 = vrot.slane %v5891_v5, %v7652_v19  ;;  %v4808_v24 = vor.u32 %v4807_v43, %v4804_v60 }
 0x488   : > { %v9545_v57 = vsel %vm7534_vm12, %v7203_v50, %v11526_v39  ;;  %v4855_v50 = vrot.slane %v4853_v10, 5  ;;  %v9582_v6 = vrot.slane %v5925_v42, %v7652_v19  ;;  %v4833_v39 = vrot.slane %v4832_v29, 4  ;;  %v9614_v42 = vld [vmem:[#allocation2 + $0x8] sm:$0x1]  ;;  %v9633_v29 = vld [vmem:[#allocation2 + $0x38] sm:$0x1] }
 0x489   : > { %v9559_v3 = vsel %vm7534_vm12, %v7204_v18, %v11527_v31  ;;  %v5899_v63 = vcombine.low %v9537_v4, %v9545_v57  ;;  %v9587_v31 = vrot.slane %v4835_v17, 5  ;;  %v4811_v38 = vshll.u32 %v9452_v23, 16  ;;  %v9612_v17 = vld [vmem:[#allocation2 + $0x14] sm:$0x1]  ;;  %11735 = vst [vmem:[#allocation11_spill] sm:$0xff] %v9614_v42 }
 0x48a   : > { %4357 = vrot.lane.b32.xlu0 %v9384_v16, %s7378_s26  ;;  %v5933_v7 = vcombine.low %v9553_v40, %v9559_v3  ;;  %4055 = vrot.lane.b32.xlu1 %v9450_v54, %s7377_s25  ;;  %v4856_v5 = vor.u32 %v4855_v50, %v4852_v53  ;;  %v4809_v43 = vrot.slane %v4808_v24, 4  ;;  %v4719_v24 = vshrl.u32 %v9388_v30, 16 }
 0x48b   : > { %v9579_v18 = vrot.slane %v5899_v63, %v7652_v19  ;;  %v9605_v60 = vsel %vm7750_vm15, %v4833_v39, %v9587_v31  ;;  %v4813_v63 = vrot.slane %v4811_v38, 5  ;;  %v9625_v38 = vld [vmem:[#allocation2 + $0x2c] sm:$0x1]  ;;  %v4797_v9 = vshll.u32 %v9633_v29, 16 }
 0x48c   : > { %v9585_v59 = vrot.slane %v5933_v7, %v7652_v19  ;;  %11734 = vst [vmem:[#allocation21_spill] sm:$0xff] %v9605_v60  ;;  %v4859_v7 = vshll.u32 %v9508_v52, 16  ;;  %v4857_v53 = vrot.slane %v4856_v5, 4  ;;  %v4749_v5 = vshll.u32 %v9616_v8, 16 }
 0x48d   : > { %v9620_v39 = vsel %vm7750_vm15, %v4809_v43, %v4813_v63  ;;  %v4701_v43 = vshll.u32 %v9614_v42, 16  ;;  %v4721_v27 = vrot.slane %v4719_v24, 4  ;;  %v4773_v12 = vshll.u32 %v9625_v38, 16 }
 0x48e   : > { %4365 = vrot.lane.b32.xlu0 %v9413_v55, %s7378_s26  ;;  %4059 = vrot.lane.b32.xlu1 %v9452_v23, %s7377_s25  ;;  %11736 = vst [vmem:[#allocation9_spill] sm:$0xff] %v9620_v39  ;;  %v4861_v50 = vrot.slane %v4859_v7, 5  ;;  %v4725_v7 = vshll.u32 %v9612_v17, 16  ;;  %v4767_v10 = vshrl.u32 %v9415_v44, 16  ;;  %v4863_v58 = vshrl.u32 %v9508_v52, 16 }
 0x48f   : > { %v9655_v36 = vrot.slane %v4701_v43, 5  ;;  %v9657_v24 = vrot.slane %v4749_v5, 5  ;;  %v4821_v1 = vshll.u32 %v9639_v49, 16  ;;  %v4722_v51 = vor.u32 %v4721_v27, %v9419_v2 }
 0x490   : > { %v9629_v32 = vsel %vm7750_vm15, %v4857_v53, %v4861_v50  ;;  %v4727_v53 = vrot.slane %v4725_v7, 5  ;;  %v4769_v37 = vrot.slane %v4767_v10, 4  ;;  %v4817_v42 = vrot.slane %v4815_v48, 4 }
 0x491   : > { %11737 = vst [vmem:[#allocation26_spill] sm:$0xff] %v9629_v32  ;;  %11738 = vst [vmem:[#allocation45_spill] sm:$0xff] %v9655_v36  ;;  %v9663_v32 = vld [vmem:[#allocation2 + $0x50] sm:$0x1]  ;;  %v4775_v35 = vrot.slane %v4773_v12, 5  ;;  %v4865_v60 = vrot.slane %v4863_v58, 4  ;;  %v11739_v58 = vcombine.low %v9384_v16, %v9450_v54  ;;  %v11740_v27 = vcombine.low %v9413_v55, %v9506_v26 }
 0x492   : > { %4373 = vrot.lane.b32.xlu0 %v9450_v54, %s7378_s26  ;;  %4063 = vrot.lane.b32.xlu1 %v9506_v26, %s7377_s25  ;;  %v4869_v43 = vshll.u32 %v9647_v22, 16  ;;  %v9668_v5 = vrot.slane %v4797_v9, 5  ;;  %v4723_v7 = vrot.slane %v4722_v51, 4  ;;  %v4770_v39 = vor.u32 %v4769_v37, %v9456_v46 }
 0x493   : > { %v4818_v36 = vor.u32 %v4817_v42, %v4813_v63  ;;  %v4823_v48 = vrot.slane %v4821_v1, 5  ;;  %v4866_v2 = vor.u32 %v4865_v60, %v4861_v50  ;;  %v3826_v12 = vrot.slane %v11739_v58, %v7652_v19 }
 0x494   : > { %v3834_v9 = vrot.slane %v11740_v27, %v7652_v19  ;;  %v9685_v37 = vsel %vm7750_vm15, %v4723_v7, %v4727_v53  ;;  %v4771_v1 = vrot.slane %v4770_v39, 4  ;;  %v4871_v60 = vrot.slane %v4869_v43, 5 }
 0x495   : > { %11741 = vst [vmem:[#allocation37_spill] sm:$0xff] %v9685_v37  ;;  %v4819_v10 = vrot.slane %v4818_v36, 4  ;;  %v4867_v42 = vrot.slane %v4866_v2, 4  ;;  %v11743_v27 = vcombine.low %v9388_v30, %v9452_v23  ;;  %v11744_v36 = vcombine.low %v9415_v44, %v9508_v52 }
 0x496   : > { %4381 = vrot.lane.b32.xlu0 %v9506_v26, %s7378_s26  ;;  %4067 = vrot.lane.b32.xlu1 %v9508_v52, %s7377_s25  ;;  %v3836_v63 = vcombine.high %v3826_v12, %v3834_v9  ;;  %v9692_v58 = vsel %vm7750_vm15, %v4771_v1, %v4775_v35  ;;  %v4695_v43 = vshrl.u32 %v9384_v16, 16  ;;  %v3835_v25 = vcombine.low %v3826_v12, %v3834_v9 }
 0x497   : > { %11742 = vst [vmem:[#allocation44_spill] sm:$0xff] %v9692_v58  ;;  %v3860_v53 = vrot.slane %v11743_v27, %v7652_v19  ;;  %v3868_v39 = vrot.slane %v11744_v36, %v7652_v19  ;;  %v9707_v7 = vsel %vm7750_vm15, %v4819_v10, %v4823_v48  ;;  %v9711_v35 = vsel %vm7750_vm15, %v4867_v42, %v4871_v60 }
 0x498   : > { %11745 = vst [vmem:[#allocation29_spill] sm:$0xff] %v9707_v7  ;;  %11746 = vst [vmem:[#allocation41_spill] sm:$0xff] %v9711_v35  ;;  %v3850_v2 = vrot.slane %v3836_v63, %v7847_v47  ;;  %v4991_v1 = vcombine.low %v9685_v37, %v9707_v7  ;;  %v4999_v27 = vcombine.low %v9692_v58, %v9711_v35  ;;  %v4839_v60 = vshrl.u32 %v9506_v26, 16 }
 0x499   : > { %v3870_v36 = vcombine.high %v3860_v53, %v3868_v39  ;;  %v11747_v46 = vcombine.high %v9576_v45, %v9579_v18  ;;  %v11748_v10 = vcombine.high %v9582_v6, %v9585_v59  ;;  %v3869_v63 = vcombine.low %v3860_v53, %v3868_v39 }
 0x49a   : > { %6161 = vrot.lane.b32.xlu0 %v9472_v28, %s7377_s25  ;;  %4361 = vrot.lane.b32.xlu1 %v9388_v30, %s7378_s26  ;;  %v9734_v12 = vrot.slane %v4991_v1, %v7652_v19  ;;  %v9737_v9 = vrot.slane %v4999_v27, %v7652_v19  ;;  %v9741_v51 = vrot.slane %v3835_v25, %v7847_v47  ;;  %v3896_v1 = vshrl.u32 %v9364_v56, 16 }
 0x49b   : > { %v9722_v48 = vrot.slane %v11747_v46, %v7847_v47  ;;  %v9728_v42 = vrot.slane %v11748_v10, %v7847_v47  ;;  %v3884_v46 = vrot.slane %v3870_v36, %v7847_v47  ;;  %v4743_v10 = vshrl.u32 %v9413_v55, 16 }
 0x49c   : > { %11749 = vst [vmem:[#allocation36_spill] sm:$0xff] %v9734_v12  ;;  %11750 = vst [vmem:[#allocation40_spill] sm:$0xff] %v9737_v9  ;;  %v9747_v53 = vrot.slane %v3869_v63, %v7847_v47  ;;  %v3852_v39 = vcombine.high %v3850_v2, %v11723_v62  ;;  %v3851_v50 = vcombine.high %v9741_v51, %v11723_v62  ;;  %v3897_v7 = vshrl.u32 %v9368_v15, 16 }
 0x49d   : > { %11751 = vst [vmem:[#allocation27_spill] sm:$0xff] %v9741_v51  ;;  %v9755_v25 = vpack.i.b16 %v3884_v46, %v3850_v2  ;;  %v3886_v63 = vcombine.high %v3884_v46, %v11723_v62  ;;  %v3908_v56 = vshrl.u32 %v9392_v0, 16  ;;  %v11754_v27 = vrot.slane %v9388_v30, 5 }
 0x49e   : > { %6169 = vrot.lane.b32.xlu0 %v9537_v4, %s7377_s25  ;;  %4369 = vrot.lane.b32.xlu1 %v9415_v44, %s7378_s26  ;;  %11752 = vst [vmem:[#allocation30_spill] sm:$0xff] %v9747_v53  ;;  %v3885_v35 = vcombine.high %v9747_v53, %v11723_v62  ;;  %v4841_v58 = vrot.slane %v4839_v60, 4  ;;  %v3909_v37 = vshrl.u32 %v9395_v21, 16  ;;  %v9776_v15 = vpack.i.b16 %v3897_v7, %v3896_v1 }
 0x49f   : > { %11753 = vst [vmem:[#allocation31_spill] sm:$0xff] %v9755_v25  ;;  %v5830_v36 = vrot.slane %v11754_v27, 4  ;;  %v4791_v25 = vshrl.u32 %v9450_v54, 16  ;;  %v9774_v12 = vpack.i.b16 %v3886_v63, %v3852_v39  ;;  %v3914_v0 = vshrl.u32 %v9741_v51, 16 }
 0x4a0   : > { %v9772_v9 = vpack.i.b16 %v3885_v35, %v3851_v50  ;;  %11757 = vst [vmem:[#allocation13_spill] sm:$0xff] %v9776_v15  ;;  %v3915_v30 = vshrl.u32 %v9747_v53, 16  ;;  %v9784_v60 = vpack.i.b16 %v9728_v42, %v9722_v48  ;;  %v3926_v21 = vshrl.u32 %v3850_v2, 16 }
 0x4a1   : > { %11756 = vst [vmem:[#allocation33_spill] sm:$0xff] %v9774_v12  ;;  %v11759_v27 = vcombine.low %v9576_v45, %v9579_v18  ;;  %v11761_v7 = vrot.slane %v9415_v44, 5  ;;  %v4745_v15 = vrot.slane %v4743_v10, 4  ;;  %v3927_v12 = vshrl.u32 %v3884_v46, 16 }
 0x4a2   : > { %6177 = vrot.lane.b32.xlu0 %v9493_v41, %s7377_s25  ;;  %4377 = vrot.lane.b32.xlu1 %v9452_v23, %s7378_s26  ;;  %11755 = vst [vmem:[#allocation12_spill] sm:$0xff] %v9772_v9  ;;  %11758 = vst [vmem:[#allocation34_spill] sm:$0xff] %v9784_v60  ;;  %v4793_v2 = vrot.slane %v4791_v25, 4  ;;  %v9802_v60 = vpack.i.b16 %v3915_v30, %v3914_v0  ;;  %v6042_v45 = vshrl.u32 %v9722_v48, 16  ;;  %v6043_v18 = vshrl.u32 %v9728_v42, 16 }
 0x4a3   : > { %v9790_v9 = vrot.slane %v11759_v27, %v7847_v47  ;;  %v5844_v1 = vrot.slane %v11761_v7, 4  ;;  %v9807_v44 = vpack.i.b16 %v3927_v12, %v3926_v21  ;;  %v3920_v46 = vshrl.u32 %v3851_v50, 16 }
 0x4a4   : > { %v11764_v10 = vrot.slane %v9413_v55, 5  ;;  %v3932_v25 = vshrl.u32 %v3852_v39, 16  ;;  %v4746_v0 = vor.u32 %v4745_v15, %v9454_v14  ;;  %v9814_v30 = vpack.i.b16 %v6043_v18, %v6042_v45 }
 0x4a5   : > { %11760 = vst [vmem:[#allocation24_spill] sm:$0xff] %v9790_v9  ;;  %v4794_v50 = vor.u32 %v4793_v2, %v9514_v13  ;;  %v5923_v55 = vcombine.high %v9790_v9, %v11723_v62  ;;  %v11765_v14 = vrot.slane %v9508_v52, 5  ;;  %v11767_v2 = vrot.slane %v9452_v23, 5 }
 0x4a6   : > { %6185 = vrot.lane.b32.xlu0 %v9545_v57, %s7377_s25  ;;  %4385 = vrot.lane.b32.xlu1 %v9508_v52, %s7378_s26  ;;  %v5837_v27 = vrot.slane %v11764_v10, 4  ;;  %v11768_v18 = vrot.slane %v9450_v54, 5  ;;  %v11770_v54 = vrot.slane %v9612_v17, 5  ;;  %v11774_v17 = vrot.slane %v9663_v32, 5 }
 0x4a7   : > { %v6036_v15 = vshrl.u32 %v5923_v55, 16  ;;  %v5858_v45 = vrot.slane %v11767_v2, 4  ;;  %v4795_v10 = vrot.slane %v4794_v50, 4  ;;  %v11773_v50 = vrot.slane %v9384_v16, 5 }
 0x4a8   : > { %v9856_v23 = vsel %vm7534_vm12, %v5830_v36, %v11770_v54 }
 0x4aa   : > { %6479 = vrot.lane.b32.xlu0 %v9472_v28, %s7378_s26  ;;  %6165 = vrot.lane.b32.xlu1 %v9480_v34, %s7377_s25  ;;  %v9779_v28 = vpack.i.b16 %v3909_v37, %v3908_v56  ;;  %v11762_v37 = vcombine.low %v9582_v6, %v9585_v59  ;;  %v4697_v6 = vrot.slane %v4695_v43, 4  ;;  %v4842_v59 = vor.u32 %v4841_v58, %v9587_v31 }
 0x4ab   : > { %v6030_v31 = vshrl.u32 %v9790_v9, 16  ;;  %v5872_v58 = vrot.slane %v11765_v14, 4  ;;  %v11777_v14 = vrot.slane %v9633_v29, 5 }
 0x4ac   : > { %v9800_v56 = vrot.slane %v11762_v37, %v7847_v47  ;;  %v3933_v37 = vshrl.u32 %v3886_v63, 16  ;;  %v4698_v39 = vor.u32 %v4697_v6, %v9417_v61  ;;  %v4843_v63 = vrot.slane %v4842_v59, 4 }
 0x4ad   : > { %v11769_v61 = vshll.u32 %v9663_v32, 16  ;;  %v11776_v32 = vrot.slane %v9616_v8, 5  ;;  %v11781_v8 = vld [vmem:[#allocation25_spill] sm:$0xff] }
 0x4ae   : > { %6483 = vrot.lane.b32.xlu0 %v9480_v34, %s7378_s26  ;;  %11763 = vst [vmem:[#allocation38_spill] sm:$0xff] %v9800_v56  ;;  %6173 = vrot.lane.b32.xlu1 %v9553_v40, %s7377_s25  ;;  %v3921_v34 = vshrl.u32 %v3885_v35, 16  ;;  %v5957_v43 = vcombine.high %v9800_v56, %v11723_v62  ;;  %v11766_v35 = vrot.slane %v9506_v26, 5  ;;  %v6031_v13 = vshrl.u32 %v9800_v56, 16 }
 0x4af   : > { %v4747_v26 = vrot.slane %v4746_v0, 4  ;;  %v4847_v6 = vrot.slane %v11769_v61, 5  ;;  %v11772_v0 = vrot.slane %v9647_v22, 5  ;;  %v5924_v22 = vcombine.high %v9722_v48, %v11723_v62  ;;  %v11788_v61 = vld [vmem:[#allocation45_spill] sm:$0xff] }
 0x4b0   : > { %v9816_v7 = vpack.i.b16 %v3921_v34, %v3920_v46  ;;  %v5865_v12 = vrot.slane %v11766_v35, 4  ;;  %v6037_v21 = vshrl.u32 %v5957_v43, 16  ;;  %v5851_v46 = vrot.slane %v11768_v18, 4  ;;  %v11779_v35 = vld [vmem:[#allocation23_spill] sm:$0xff] }
 0x4b1   : > { %v9840_v52 = vpack.i.b16 %v6031_v13, %v6030_v31  ;;  %v9842_v34 = vpack.i.b16 %v5957_v43, %v5923_v55  ;;  %v5823_v55 = vrot.slane %v11773_v50, 4  ;;  %v11775_v43 = vrot.slane %v9639_v49, 5  ;;  %v11778_v49 = vld [vmem:[#allocation21_spill] sm:$0xff]  ;;  %v11780_v13 = vld [vmem:[#allocation26_spill] sm:$0xff] }
 0x4b2   : > { %6487 = vrot.lane.b32.xlu0 %v9537_v4, %s7378_s26  ;;  %6181 = vrot.lane.b32.xlu1 %v9502_v20, %s7377_s25  ;;  %v9832_v4 = vpack.i.b16 %v3933_v37, %v3932_v25  ;;  %v9848_v59 = vpack.i.b16 %v6037_v21, %v6036_v15  ;;  %v11771_v25 = vrot.slane %v9625_v38, 5  ;;  %v9868_v37 = vsel %vm7534_vm12, %v5872_v58, %v11772_v0 }
 0x4b3   : > { %v9876_v36 = vsel %vm7534_vm12, %v5865_v12, %v11774_v17  ;;  %v4699_v38 = vrot.slane %v4698_v39, 4  ;;  %v9888_v16 = vsel %vm7534_vm12, %v5858_v45, %v11775_v43  ;;  %v5839_v31 = vsel %vm7534_vm12, %v5837_v27, %v11776_v32  ;;  %v11785_v45 = vld [vmem:[#allocation19_spill] sm:$0xff] }
 0x4b4   : > { %v9898_v58 = vsel %vm7534_vm12, %v5851_v46, %v11777_v14  ;;  %v5958_v48 = vcombine.high %v9728_v42, %v11723_v62  ;;  %v4897_v12 = vcombine.low %v11779_v35, %v11778_v49  ;;  %v4931_v39 = vcombine.low %v11781_v8, %v11780_v13  ;;  %v11786_v46 = vld [vmem:[#allocation9_spill] sm:$0xff] }
 0x4b5   : > { %v9911_v29 = vsel %vm7750_vm15, %v4747_v26, %v9657_v24  ;;  %v9916_v27 = vsel %vm7750_vm15, %v4795_v10, %v9668_v5  ;;  %v5967_v42 = vcombine.low %v5839_v31, %v9876_v36  ;;  %v11782_v24 = vld [vmem:[#allocation11_spill] sm:$0xff]  ;;  %v11784_v5 = vld [vmem:[#allocation16_spill] sm:$0xff]  ;;  %v11787_v26 = vld [vmem:[#allocation10_spill] sm:$0xff]  ;;  %v5993_v54 = vcombine.low %v9856_v23, %v9888_v16 }
 0x4b6   : > { %6491 = vrot.lane.b32.xlu0 %v9553_v40, %s7378_s26  ;;  %6189 = vrot.lane.b32.xlu1 %v9559_v3, %s7377_s25  ;;  %v9862_v40 = vsel %vm7534_vm12, %v5844_v1, %v11771_v25  ;;  %v9880_v1 = vsel %vm7750_vm15, %v4843_v63, %v4847_v6  ;;  %v9925_v15 = vpack.i.b16 %v5958_v48, %v5924_v22  ;;  %v11783_v21 = vrot.slane %v11782_v24, 5 }
 0x4b7   : > { %v4965_v63 = vcombine.low %v9911_v29, %v9880_v1  ;;  %v4889_v18 = vcombine.low %v11785_v45, %v11784_v5  ;;  %v4923_v10 = vcombine.low %v11787_v26, %v11786_v46  ;;  %v9938_v6 = vsel %vm7750_vm15, %v4699_v38, %v11788_v61  ;;  %vm11944_vm15 = vmmov %vm11905_vm3 }
 0x4b8   : > { %v5825_v2 = vsel %vm7534_vm12, %v5823_v55, %v11783_v21  ;;  %v4957_v33 = vcombine.low %v9938_v6, %v9916_v27  ;;  %v9948_v0 = vrot.slane %v4897_v12, %v7652_v19  ;;  %v9951_v50 = vrot.slane %v4931_v39, %v7652_v19  ;;  %vm11938_vm12 = vmmov %vm11905_vm3 }
 0x4b9   : > { %v5959_v25 = vcombine.low %v5825_v2, %v9898_v58  ;;  %v9959_v55 = vrot.slane %v5967_v42, %v7652_v19  ;;  %v9962_v17 = vrot.slane %v4965_v63, %v7652_v19  ;;  %v9968_v38 = vrot.slane %v4923_v10, %v7652_v19 }
 0x4ba   : > { %6495 = vrot.lane.b32.xlu0 %v9493_v41, %s7378_s26  ;;  %6167 = vrot.lane.b32.xlu1 %v9856_v23, %s7377_s25  ;;  %v6001_v41 = vcombine.low %v9862_v40, %v9868_v37  ;;  %v6048_v43 = vshrl.u32 %v5924_v22, 16  ;;  %v6049_v32 = vshrl.u32 %v5958_v48, 16  ;;  %v9971_v14 = vrot.slane %v5993_v54, %v7652_v19  ;;  %v11795_v54 = vld [vmem:[#allocation40_spill] sm:$0xff] }
 0x4bb   : > { %v9974_v12 = vrot.slane %v5959_v25, %v7652_v19  ;;  %v9977_v39 = vrot.slane %v4957_v33, %v7652_v19  ;;  %v4939_v42 = vcombine.low %v9968_v38, %v9951_v50 }
 0x4bc   : > { %v9956_v11 = vrot.slane %v6001_v41, %v7652_v19  ;;  %v9985_v22 = vpack.i.b16 %v6049_v32, %v6048_v43 }
 0x4bd   : > { %v5975_v63 = vcombine.low %v9974_v12, %v9959_v55  ;;  %v10001_v21 = vrot.slane %v4939_v42, %v7847_v47 }
 0x4be   : > { %6499 = vrot.lane.b32.xlu0 %v9502_v20, %s7378_s26  ;;  %6175 = vrot.lane.b32.xlu1 %v9862_v40, %s7377_s25  ;;  %v9965_v20 = vrot.slane %v4889_v18, %v7652_v19  ;;  %v6009_v48 = vcombine.low %v9971_v14, %v9956_v11 }
 0x4bf   : > { %11790 = vst [vmem:[#allocation42_spill] sm:$0xff] %v10001_v21  ;;  %v10009_v10 = vrot.slane %v5975_v63, %v7847_v47 }
 0x4c0   : > { %v4905_v41 = vcombine.low %v9965_v20, %v9948_v0  ;;  %v10004_v18 = vrot.slane %v6009_v48, %v7847_v47 }
 0x4c1   : > { %11792 = vst [vmem:[#allocation28_spill] sm:$0xff] %v10009_v10 }
 0x4c2   : > { %6503 = vrot.lane.b32.xlu0 %v9545_v57, %s7378_s26  ;;  %6183 = vrot.lane.b32.xlu1 %v9888_v16, %s7377_s25  ;;  %v4973_v57 = vcombine.low %v9977_v39, %v9962_v17  ;;  %v9998_v24 = vrot.slane %v4905_v41, %v7847_v47  ;;  %11791 = vst [vmem:[#allocation43_spill] sm:$0xff] %v10004_v18 }
 0x4c4   : > { %11789 = vst [vmem:[#allocation39_spill] sm:$0xff] %v9998_v24  ;;  %v10012_v61 = vrot.slane %v4973_v57, %v7847_v47 }
 0x4c6   : > { %6507 = vrot.lane.b32.xlu0 %v9559_v3, %s7378_s26  ;;  %6191 = vrot.lane.b32.xlu1 %v9868_v37, %s7377_s25  ;;  %11793 = vst [vmem:[#allocation32_spill] sm:$0xff] %v10012_v61  ;;  %v11794_v3 = vld [vmem:[#allocation36_spill] sm:$0xff] }
 0x4c7   : > { %v11796_v25 = vcombine.low %v11794_v3, %v11795_v54 }
 0x4c9   : > { %v10018_v33 = vrot.slane %v11796_v25, %v7847_v47 }
 0x4ca   : > { %6163 = vrot.lane.b32.xlu0 %v5825_v2, %s7377_s25  ;;  %6481 = vrot.lane.b32.xlu1 %v5825_v2, %s7378_s26 }
 0x4cb   : > { %11797 = vst [vmem:[#allocation35_spill] sm:$0xff] %v10018_v33 }
 0x4cc   : > { %v4038_v63 = vpop.permute.xlu0 %4037  ;;  %v4360_v2 = vpop.permute.xlu1 %4359 }
 0x4ce   : > { %6171 = vrot.lane.b32.xlu0 %v5839_v31, %s7377_s25  ;;  %6485 = vrot.lane.b32.xlu1 %v9856_v23, %s7378_s26 }
 0x4d0   : > { %v4042_v57 = vpop.permute.xlu0 %4041  ;;  %v4368_v43 = vpop.permute.xlu1 %4367 }
 0x4d2   : > { %6179 = vrot.lane.b32.xlu0 %v9898_v58, %s7377_s25  ;;  %6489 = vrot.lane.b32.xlu1 %v5839_v31, %s7378_s26 }
 0x4d4   : > { %v4046_v25 = vpop.permute.xlu0 %4045 }
 0x4d6   : > { %6187 = vrot.lane.b32.xlu0 %v9876_v36, %s7377_s25  ;;  %6493 = vrot.lane.b32.xlu1 %v9862_v40, %s7378_s26  ;;  %v4376_v40 = vpop.permute.xlu1 %4375 }
 0x4d8   : > { %v4050_v42 = vpop.permute.xlu0 %4049 }
 0x4da   : > { %5477 = vrot.lane.b32.xlu0 %v11785_v45, %s7378_s26  ;;  %6497 = vrot.lane.b32.xlu1 %v9898_v58, %s7378_s26  ;;  %v4384_v53 = vpop.permute.xlu1 %4383 }
 0x4dc   : > { %v4054_v23 = vpop.permute.xlu0 %4053 }
 0x4dd   : > { %v4085_v41 = vcombine.low %v4038_v63, %v4054_v23 }
 0x4de   : > { %5485 = vrot.lane.b32.xlu0 %v11779_v35, %s7378_s26  ;;  %6501 = vrot.lane.b32.xlu1 %v9888_v16, %s7378_s26 }
 0x4df   : > { %v10062_v56 = vrot.slane %v4085_v41, %v7652_v19 }
 0x4e0   : > { %v4058_v31 = vpop.permute.xlu0 %4057 }
 0x4e1   : > { %v4119_v58 = vcombine.low %v4042_v57, %v4058_v31  ;;  %11799 = vst [vmem:[#allocation4_spill] sm:$0xff] %v10062_v56  ;;  %v4437_v31 = vcombine.low %v4360_v2, %v4376_v40 }
 0x4e2   : > { %5493 = vrot.lane.b32.xlu0 %v11784_v5, %s7378_s26  ;;  %6505 = vrot.lane.b32.xlu1 %v9876_v36, %s7378_s26 }
 0x4e3   : > { %v10067_v36 = vrot.slane %v4119_v58, %v7652_v19 }
 0x4e4   : > { %v4062_v48 = vpop.permute.xlu0 %4061 }
 0x4e5   : > { %v4093_v32 = vcombine.low %v4046_v25, %v4062_v48  ;;  %11800 = vst [vmem:[#allocation5_spill] sm:$0xff] %v10067_v36 }
 0x4e6   : > { %5501 = vrot.lane.b32.xlu0 %v11778_v49, %s7378_s26  ;;  %6509 = vrot.lane.b32.xlu1 %v9868_v37, %s7378_s26 }
 0x4e7   : > { %v10059_v16 = vrot.slane %v4093_v32, %v7652_v19 }
 0x4e8   : > { %v4066_v51 = vpop.permute.xlu0 %4065 }
 0x4e9   : > { %11798 = vst [vmem:[#allocation3_spill] sm:$0xff] %v10059_v16  ;;  %v4127_v9 = vcombine.low %v4050_v42, %v4066_v51  ;;  %v4101_v37 = vcombine.low %v10062_v56, %v10059_v16 }
 0x4ea   : > { %5159 = vrot.lane.b32.xlu0 %v11785_v45, %s7377_s25  ;;  %5481 = vrot.lane.b32.xlu1 %v11787_v26, %s7378_s26 }
 0x4eb   : > { %v10070_v48 = vrot.slane %v4127_v9, %v7652_v19  ;;  %v10086_v9 = vrot.slane %v4101_v37, %v7847_v47 }
 0x4ec   : > { %v4356_v32 = vpop.permute.xlu0 %4355  ;;  %v4040_v41 = vpop.permute.xlu1 %4039 }
 0x4ed   : > { %v4135_v51 = vcombine.low %v10067_v36, %v10070_v48  ;;  %11802 = vst [vmem:[#allocation6_spill] sm:$0xff] %v10086_v9  ;;  %v10102_v9 = vrot.slane %v4437_v31, %v7652_v19 }
 0x4ee   : > { %5167 = vrot.lane.b32.xlu0 %v11779_v35, %s7377_s25  ;;  %5489 = vrot.lane.b32.xlu1 %v11781_v8, %s7378_s26  ;;  %v4445_v35 = vcombine.low %v4368_v43, %v4384_v53 }
 0x4ef   : > { %v10081_v45 = vrot.slane %v4135_v51, %v7847_v47  ;;  %11804 = vst [vmem:[#allocation23_spill] sm:$0xff] %v10102_v9 }
 0x4f0   : > { %v4364_v42 = vpop.permute.xlu0 %4363  ;;  %v4044_v63 = vpop.permute.xlu1 %4043  ;;  %v10099_v37 = vrot.slane %v4445_v35, %v7652_v19 }
 0x4f1   : > { %11801 = vst [vmem:[#allocation7_spill] sm:$0xff] %v10081_v45  ;;  %v11815_v45 = vld [vmem:[#allocation31_spill] sm:$0xff] }
 0x4f2   : > { %5175 = vrot.lane.b32.xlu0 %v11784_v5, %s7377_s25  ;;  %5497 = vrot.lane.b32.xlu1 %v11786_v46, %s7378_s26  ;;  %11803 = vst [vmem:[#allocation21_spill] sm:$0xff] %v10099_v37  ;;  %v4453_v43 = vcombine.low %v10102_v9, %v10099_v37 }
 0x4f4   : > { %v4372_v25 = vpop.permute.xlu0 %4371  ;;  %v4048_v23 = vpop.permute.xlu1 %4047 }
 0x4f5   : > { %v4403_v58 = vcombine.low %v4356_v32, %v4372_v25 }
 0x4f6   : > { %5183 = vrot.lane.b32.xlu0 %v11778_v49, %s7377_s25  ;;  %5505 = vrot.lane.b32.xlu1 %v11780_v13, %s7378_s26 }
 0x4f7   : > { %v10107_v53 = vrot.slane %v4403_v58, %v7652_v19 }
 0x4f8   : > { %v4380_v5 = vpop.permute.xlu0 %4379  ;;  %v4052_v51 = vpop.permute.xlu1 %4051 }
 0x4f9   : > { %v4411_v57 = vcombine.low %v4364_v42, %v4380_v5  ;;  %11805 = vst [vmem:[#allocation26_spill] sm:$0xff] %v10107_v53 }
 0x4fa   : > { %5479 = vrot.lane.b32.xlu0 %v9938_v6, %s7378_s26  ;;  %5163 = vrot.lane.b32.xlu1 %v11787_v26, %s7377_s25 }
 0x4fb   : > { %v10110_v49 = vrot.slane %v4411_v57, %v7652_v19  ;;  %v10126_v57 = vrot.slane %v4453_v43, %v7847_v47 }
 0x4fc   : > { %v4358_v2 = vpop.permute.xlu0 %4357  ;;  %v4056_v32 = vpop.permute.xlu1 %4055 }
 0x4fd   : > { %11806 = vst [vmem:[#allocation25_spill] sm:$0xff] %v10110_v49  ;;  %v4419_v40 = vcombine.low %v10107_v53, %v10110_v49  ;;  %11808 = vst [vmem:[#allocation16_spill] sm:$0xff] %v10126_v57 }
 0x4fe   : > { %5487 = vrot.lane.b32.xlu0 %v9911_v29, %s7378_s26  ;;  %5171 = vrot.lane.b32.xlu1 %v11781_v8, %s7377_s25  ;;  %v4153_v8 = vcombine.low %v4040_v41, %v4056_v32 }
 0x4ff   : > { %v10121_v42 = vrot.slane %v4419_v40, %v7847_v47 }
 0x500   : > { %v4366_v26 = vpop.permute.xlu0 %4365  ;;  %v4060_v35 = vpop.permute.xlu1 %4059 }
 0x501   : > { %11807 = vst [vmem:[#allocation11_spill] sm:$0xff] %v10121_v42  ;;  %v4187_v43 = vcombine.low %v4044_v63, %v4060_v35 }
 0x502   : > { %5495 = vrot.lane.b32.xlu0 %v9916_v27, %s7378_s26  ;;  %5179 = vrot.lane.b32.xlu1 %v11786_v46, %s7377_s25  ;;  %v10144_v46 = vrot.slane %v4153_v8, %v7652_v19  ;;  %v11813_v8 = vld [vmem:[#allocation29_spill] sm:$0xff] }
 0x503   : > { %v10149_v41 = vrot.slane %v4187_v43, %v7652_v19 }
 0x504   : > { %v4374_v31 = vpop.permute.xlu0 %4373  ;;  %v4064_v58 = vpop.permute.xlu1 %4063 }
 0x505   : > { %v4161_v5 = vcombine.low %v4048_v23, %v4064_v58  ;;  %v11809_v23 = vld [vmem:[#allocation37_spill] sm:$0xff] }
 0x506   : > { %5503 = vrot.lane.b32.xlu0 %v9880_v1, %s7378_s26  ;;  %5187 = vrot.lane.b32.xlu1 %v11780_v13, %s7377_s25 }
 0x507   : > { %v10139_v9 = vrot.slane %v4161_v5, %v7652_v19 }
 0x508   : > { %v4382_v40 = vpop.permute.xlu0 %4381  ;;  %v4068_v37 = vpop.permute.xlu1 %4067 }
 0x509   : > { %v4195_v25 = vcombine.low %v4052_v51, %v4068_v37  ;;  %v4169_v32 = vcombine.low %v10144_v46, %v10139_v9  ;;  %v11810_v51 = vld [vmem:[#allocation44_spill] sm:$0xff]  ;;  %v4479_v57 = vcombine.low %v4366_v26, %v4382_v40 }
 0x50a   : > { %5161 = vrot.lane.b32.xlu0 %v9938_v6, %s7377_s25  ;;  %5483 = vrot.lane.b32.xlu1 %v11809_v23, %s7378_s26 }
 0x50b   : > { %v10152_v13 = vrot.slane %v4195_v25, %v7652_v19  ;;  %v10166_v25 = vrot.slane %v4169_v32, %v7847_v47  ;;  %v11814_v32 = vld [vmem:[#allocation41_spill] sm:$0xff]  ;;  %v10181_v56 = vrot.slane %v4479_v57, %v7652_v19 }
 0x50c   : > { %v6162_v63 = vpop.permute.xlu0 %6161  ;;  %v4362_v37 = vpop.permute.xlu1 %4361 }
 0x50d   : > { %v4203_v6 = vcombine.low %v10149_v41, %v10152_v13  ;;  %11812 = vst [vmem:[#allocation9_spill] sm:$0xff] %v10166_v25 }
 0x50e   : > { %5169 = vrot.lane.b32.xlu0 %v9911_v29, %s7377_s25  ;;  %5491 = vrot.lane.b32.xlu1 %v11810_v51, %s7378_s26 }
 0x50f   : > { %v10163_v35 = vrot.slane %v4203_v6, %v7847_v47  ;;  %v4471_v6 = vcombine.low %v4358_v2, %v4374_v31 }
 0x510   : > { %v6170_v58 = vpop.permute.xlu0 %6169  ;;  %v4370_v5 = vpop.permute.xlu1 %4369 }
 0x511   : > { %11811 = vst [vmem:[#allocation19_spill] sm:$0xff] %v10163_v35  ;;  %v10185_v26 = vrot.slane %v4471_v6, %v7652_v19  ;;  %v11821_v35 = vld [vmem:[#allocation33_spill] sm:$0xff] }
 0x512   : > { %5177 = vrot.lane.b32.xlu0 %v9916_v27, %s7377_s25  ;;  %5499 = vrot.lane.b32.xlu1 %v11813_v8, %s7378_s26  ;;  %v7123_v27 = vcombine.low %v11815_v45, %v11815_v45 }
 0x514   : > { %v6178_v43 = vpop.permute.xlu0 %6177  ;;  %v4378_v42 = vpop.permute.xlu1 %4377 }
 0x515   : > { %v4505_v53 = vcombine.low %v4362_v37, %v4378_v42  ;;  %v11816_v42 = vld [vmem:[#allocation20_spill] sm:$0xff]  ;;  %v11818_v37 = vld [vmem:[#allocation15_spill] sm:$0xff] }
 0x516   : > { %5185 = vrot.lane.b32.xlu0 %v9880_v1, %s7377_s25  ;;  %5507 = vrot.lane.b32.xlu1 %v11814_v32, %s7378_s26  ;;  %v7113_v57 = vcombine.low %v11816_v42, %v11816_v42  ;;  %v11820_v42 = vld [vmem:[#allocation12_spill] sm:$0xff] }
 0x517   : > { %v10190_v1 = vrot.slane %v4505_v53, %v7652_v19 }
 0x518   : > { %v6186_v49 = vpop.permute.xlu0 %6185  ;;  %v4386_v16 = vpop.permute.xlu1 %4385 }
 0x519   : > { %v4513_v29 = vcombine.low %v4370_v5, %v4386_v16  ;;  %v4487_v16 = vcombine.low %v10185_v26, %v10181_v56  ;;  %v7117_v5 = vcombine.low %v11818_v37, %v11818_v37  ;;  %v6209_v37 = vcombine.low %v6162_v63, %v6178_v43  ;;  %v11825_v43 = vld [vmem:[#allocation13_spill] sm:$0xff] }
 0x51a   : > { %3977 = vrot.lane.b32.xlu0 %v7123_v27, %s7383_s29  ;;  %5165 = vrot.lane.b32.xlu1 %v11809_v23, %s7377_s25 }
 0x51b   : > { %v10193_v2 = vrot.slane %v4513_v29, %v7652_v19  ;;  %v10214_v29 = vrot.slane %v4487_v16, %v7847_v47  ;;  %v10235_v63 = vrot.slane %v6209_v37, %v7652_v19 }
 0x51c   : > { %v10195_v45 = vpop.permute.xlu0 %6479  ;;  %v6166_v31 = vpop.permute.xlu1 %6165 }
 0x51d   : > { %v4521_v40 = vcombine.low %v10190_v1, %v10193_v2  ;;  %11819 = vst [vmem:[#allocation45_spill] sm:$0xff] %v10214_v29  ;;  %v11823_v29 = vld [vmem:[#allocation18_spill] sm:$0xff]  ;;  %11824 = vst [vmem:[#allocation40_spill] sm:$0xff] %v10235_v63 }
 0x51e   : > { %3937 = vrot.lane.b32.xlu0 %v7113_v57, %s7385_s6  ;;  %5173 = vrot.lane.b32.xlu1 %v11810_v51, %s7377_s25  ;;  %v7121_v57 = vcombine.low %v11820_v42, %v11820_v42  ;;  %v7116_v42 = vcombine.low %v11823_v29, %v11823_v29 }
 0x51f   : > { %v10207_v53 = vrot.slane %v4521_v40, %v7847_v47  ;;  %v6217_v40 = vcombine.low %v6170_v58, %v6186_v49 }
 0x520   : > { %v10209_v23 = vpop.permute.xlu0 %6483  ;;  %v6174_v6 = vpop.permute.xlu1 %6173 }
 0x521   : > { %11817 = vst [vmem:[#allocation10_spill] sm:$0xff] %v10207_v53  ;;  %v10229_v36 = vrot.slane %v6217_v40, %v7652_v19 }
 0x522   : > { %3953 = vrot.lane.b32.xlu0 %v7117_v5, %s7384_s30  ;;  %5181 = vrot.lane.b32.xlu1 %v11813_v8, %s7377_s25  ;;  %v7125_v8 = vcombine.low %v11821_v35, %v11821_v35 }
 0x523   : > { %11822 = vst [vmem:[#allocation36_spill] sm:$0xff] %v10229_v36 }
 0x524   : > { %v6488_v27 = vpop.permute.xlu0 %6487  ;;  %v6182_v25 = vpop.permute.xlu1 %6181 }
 0x525   : > { %v6243_v16 = vcombine.low %v6166_v31, %v6182_v25  ;;  %v6225_v31 = vcombine.low %v10235_v63, %v10229_v36  ;;  %v6025_v63 = vcombine.high %v10004_v18, %v11723_v62 }
 0x526   : > { %3969 = vrot.lane.b32.xlu0 %v7121_v57, %s7381_s27  ;;  %5189 = vrot.lane.b32.xlu1 %v11814_v32, %s7377_s25  ;;  %v7115_v32 = vcombine.low %v11825_v43, %v11825_v43 }
 0x527   : > { %v10239_v58 = vrot.slane %v6243_v16, %v7652_v19  ;;  %v7119_v16 = vcombine.low %v9779_v28, %v9779_v28 }
 0x528   : > { %v6492_v5 = vpop.permute.xlu0 %6491  ;;  %v6190_v51 = vpop.permute.xlu1 %6189 }
 0x529   : > { %v6251_v49 = vcombine.low %v6174_v6, %v6190_v51  ;;  %v11826_v6 = vld [vmem:[#allocation14_spill] sm:$0xff] }
 0x52a   : > { %3985 = vrot.lane.b32.xlu0 %v7125_v8, %s7386_s7  ;;  %3949 = vrot.lane.b32.xlu1 %v7116_v42, %s7383_s29  ;;  %v7114_v51 = vcombine.low %v11826_v6, %v11826_v6  ;;  %v10262_v8 = vrot.slane %v6225_v31, %v7847_v47  ;;  %v5991_v31 = vcombine.high %v10009_v10, %v11723_v62 }
 0x52b   : > { %v10242_v35 = vrot.slane %v6251_v49, %v7652_v19  ;;  %v11829_v49 = vld [vmem:[#allocation8_spill] sm:$0xff] }
 0x52c   : > { %v6496_v25 = vpop.permute.xlu0 %6495  ;;  %v10248_v29 = vpop.permute.xlu1 %6167  ;;  %11828 = vst [vmem:[#allocation44_spill] sm:$0xff] %v10262_v8  ;;  %v7118_v43 = vcombine.low %v11829_v49, %v11829_v49 }
 0x52d   : > { %v6259_v57 = vcombine.low %v10239_v58, %v10242_v35  ;;  %v6527_v6 = vcombine.low %v10195_v45, %v6496_v25  ;;  %v4940_v45 = vcombine.high %v9968_v38, %v9951_v50  ;;  %v6010_v25 = vcombine.high %v9971_v14, %v9956_v11 }
 0x52e   : > { %3945 = vrot.lane.b32.xlu0 %v7115_v32, %s7382_s28  ;;  %3941 = vrot.lane.b32.xlu1 %v7114_v51, %s7381_s27  ;;  %v4906_v32 = vcombine.high %v9965_v20, %v9948_v0  ;;  %v7209_v50 = vcombine.low %v9814_v30, %v9814_v30  ;;  %v6059_v20 = vpack.i.b16 %v6025_v63, %v5991_v31 }
 0x52f   : > { %v10257_v40 = vrot.slane %v6259_v57, %v7847_v47  ;;  %v11830_v57 = vld [vmem:[#allocation34_spill] sm:$0xff]  ;;  %v7124_v11 = vcombine.low %v9807_v44, %v9807_v44  ;;  %v10304_v14 = vrot.slane %v4940_v45, %v7847_v47 }
 0x530   : > { %v6500_v37 = vpop.permute.xlu0 %6499  ;;  %v10264_v42 = vpop.permute.xlu1 %6175  ;;  %v7208_v28 = vcombine.low %v11830_v57, %v11830_v57  ;;  %v5976_v57 = vcombine.high %v9974_v12, %v9959_v55  ;;  %v10301_v55 = vrot.slane %v4906_v32, %v7847_v47  ;;  %v7213_v32 = vcombine.low %v6059_v20, %v6059_v20 }
 0x531   : > { %11827 = vst [vmem:[#allocation37_spill] sm:$0xff] %v10257_v40  ;;  %v6561_v8 = vcombine.low %v10209_v23, %v6500_v37  ;;  %v10308_v23 = vrot.slane %v6010_v25, %v7847_v47  ;;  %v6060_v25 = vshrl.u32 %v5991_v31, 16 }
 0x532   : > { %3961 = vrot.lane.b32.xlu0 %v7119_v16, %s7387_s8  ;;  %3957 = vrot.lane.b32.xlu1 %v7118_v43, %s7386_s7  ;;  %v7120_v43 = vcombine.low %v9802_v60, %v9802_v60  ;;  %v6534_v60 = vrot.slane %v6527_v6, %v7652_v19  ;;  %v10311_v30 = vrot.slane %v5976_v57, %v7847_v47 }
 0x534   : > { %v6504_v51 = vpop.permute.xlu0 %6503  ;;  %v10279_v49 = vpop.permute.xlu1 %6183 }
 0x535   : > { %v6535_v16 = vcombine.low %v6488_v27, %v6504_v51 }
 0x536   : > { %6089 = vrot.lane.b32.xlu0 %v7208_v28, %s7383_s29  ;;  %3965 = vrot.lane.b32.xlu1 %v7120_v43, %s7385_s6 }
 0x537   : > { %v6542_v27 = vrot.slane %v6535_v16, %v7652_v19  ;;  %v7122_v16 = vcombine.low %v9816_v7, %v9816_v7  ;;  %v10336_v7 = vcombine.high %v10308_v23, %v11723_v62 }
 0x538   : > { %v6508_v0 = vpop.permute.xlu0 %6507  ;;  %v6192_v38 = vpop.permute.xlu1 %6191 }
 0x539   : > { %v6569_v51 = vcombine.low %v6492_v5, %v6508_v0  ;;  %v6544_v12 = vcombine.high %v6534_v60, %v6542_v27  ;;  %v6568_v5 = vrot.slane %v6561_v8, %v7652_v19  ;;  %v5039_v8 = vpack.i.b16 %v10304_v14, %v10301_v55 }
 0x53a   : > { %6093 = vrot.lane.b32.xlu0 %v7209_v50, %s7384_s30  ;;  %3981 = vrot.lane.b32.xlu1 %v7124_v11, %s7384_s30  ;;  %v6061_v0 = vshrl.u32 %v6025_v63, 16  ;;  %v10332_v50 = vcombine.high %v10311_v30, %v11723_v62  ;;  %v6543_v20 = vcombine.low %v6534_v60, %v6542_v27  ;;  %v7207_v11 = vcombine.low %v9848_v59, %v9848_v59 }
 0x53b   : > { %v6576_v37 = vrot.slane %v6569_v51, %v7652_v19  ;;  %v10321_v43 = vrot.slane %v6544_v12, %v7847_v47  ;;  %v7126_v12 = vcombine.low %v9832_v4, %v9832_v4  ;;  %v7158_v59 = vcombine.low %v5039_v8, %v5039_v8 }
 0x53c   : > { %v6164_v44 = vpop.permute.xlu0 %6163  ;;  %v10316_v28 = vpop.permute.xlu1 %6481  ;;  %v6062_v60 = vpack.i.b16 %v6061_v0, %v6060_v25  ;;  %v6073_v4 = vshrl.u32 %v10336_v7, 16  ;;  %v7205_v25 = vcombine.low %v9840_v52, %v9840_v52 }
 0x53d   : > { %v6578_v6 = vcombine.high %v6568_v5, %v6576_v37  ;;  %v6577_v45 = vcombine.low %v6568_v5, %v6576_v37  ;;  %v6678_v37 = vshrl.u32 %v10321_v43, 16  ;;  %v6560_v27 = vcombine.high %v10321_v43, %v11723_v62 }
 0x53e   : > { %6109 = vrot.lane.b32.xlu0 %v7213_v32, %s7381_s27  ;;  %3973 = vrot.lane.b32.xlu1 %v7122_v16, %s7382_s28  ;;  %v6072_v32 = vshrl.u32 %v10332_v50, 16  ;;  %v6319_v16 = vcombine.low %v10264_v42, %v6192_v38 }
 0x53f   : > { %v10327_v57 = vrot.slane %v6578_v6, %v7847_v47  ;;  %v10346_v5 = vrot.slane %v6577_v45, %v7847_v47  ;;  %v10356_v6 = vrot.slane %v6543_v20, %v7847_v47  ;;  %v6684_v20 = vshrl.u32 %v6560_v27, 16 }
 0x540   : > { %v6172_v51 = vpop.permute.xlu0 %6171  ;;  %v10340_v31 = vpop.permute.xlu1 %6485  ;;  %v6074_v52 = vpack.i.b16 %v6073_v4, %v6072_v32 }
 0x541   : > { %v6679_v63 = vshrl.u32 %v10327_v57, 16  ;;  %11831 = vst [vmem:[#allocation29_spill] sm:$0xff] %v10356_v6  ;;  %v6594_v36 = vcombine.high %v10327_v57, %v11723_v62 }
 0x542   : > { %6085 = vrot.lane.b32.xlu0 %v7207_v11, %s7382_s28  ;;  %3989 = vrot.lane.b32.xlu1 %v7126_v12, %s7387_s8  ;;  %v6311_v12 = vcombine.low %v10248_v29, %v10279_v49  ;;  %v5028_v29 = vshrl.u32 %v9998_v24, 16  ;;  %v10377_v49 = vrot.slane %v6319_v16, %v7652_v19 }
 0x543   : > { %v10359_v11 = vpack.i.b16 %v6679_v63, %v6678_v37  ;;  %v10370_v0 = vpack.i.b16 %v6594_v36, %v6560_v27  ;;  %v6685_v42 = vshrl.u32 %v6594_v36, 16  ;;  %v7214_v37 = vcombine.low %v6062_v60, %v6062_v60 }
 0x544   : > { %v6180_v45 = vpop.permute.xlu0 %6179  ;;  %v10365_v8 = vpop.permute.xlu1 %6489  ;;  %v6065_v60 = vpack.i.b16 %v10308_v23, %v10311_v30  ;;  %v10391_v16 = vrot.slane %v6311_v12, %v7652_v19 }
 0x545   : > { %11832 = vst [vmem:[#allocation41_spill] sm:$0xff] %v10359_v11  ;;  %11833 = vst [vmem:[#allocation31_spill] sm:$0xff] %v10370_v0  ;;  %v6277_v63 = vcombine.low %v6164_v44, %v6180_v45  ;;  %v10380_v40 = vpack.i.b16 %v6685_v42, %v6684_v20  ;;  %v7206_v44 = vcombine.low %v9842_v34, %v9842_v34 }
 0x546   : > { %5087 = vrot.lane.b32.xlu0 %v7158_v59, %s7383_s29  ;;  %6077 = vrot.lane.b32.xlu1 %v7205_v25, %s7385_s6  ;;  %v5029_v59 = vshrl.u32 %v10001_v21, 16  ;;  %v4974_v45 = vcombine.high %v9977_v39, %v9962_v17  ;;  %v10403_v34 = vcombine.high %v9998_v24, %v11723_v62  ;;  %v10407_v17 = vcombine.high %v10001_v21, %v11723_v62 }
 0x547   : > { %11834 = vst [vmem:[#allocation20_spill] sm:$0xff] %v10380_v40  ;;  %v10395_v32 = vrot.slane %v6277_v63, %v7652_v19  ;;  %v6327_v39 = vcombine.low %v10391_v16, %v10377_v49  ;;  %v7215_v42 = vcombine.low %v6065_v60, %v6065_v60  ;;  %v6054_v63 = vshrl.u32 %v10009_v10, 16 }
 0x548   : > { %v6188_v11 = vpop.permute.xlu0 %6187  ;;  %v10382_v27 = vpop.permute.xlu1 %6493  ;;  %v5030_v12 = vpack.i.b16 %v5029_v59, %v5028_v29  ;;  %v6067_v10 = vshrl.u32 %v10308_v23, 16  ;;  %v6071_v24 = vpack.i.b16 %v10336_v7, %v10332_v50 }
 0x549   : > { %v6285_v36 = vcombine.low %v6172_v51, %v6188_v11  ;;  %v7218_v11 = vcombine.low %v6074_v52, %v6074_v52  ;;  %v5033_v52 = vpack.i.b16 %v10407_v17, %v10403_v34  ;;  %v10434_v59 = vrot.slane %v6327_v39, %v7847_v47 }
 0x54a   : > { %6113 = vrot.lane.b32.xlu0 %v7214_v37, %s7382_s28  ;;  %6081 = vrot.lane.b32.xlu1 %v7206_v44, %s7381_s27  ;;  %v6055_v37 = vshrl.u32 %v10004_v18, 16  ;;  %v11835_v44 = vcombine.high %v11794_v3, %v11795_v54  ;;  %v5052_v3 = vshrl.u32 %v10012_v61, 16  ;;  %v5053_v54 = vshrl.u32 %v10018_v33, 16 }
 0x54b   : > { %v10398_v4 = vrot.slane %v6285_v36, %v7652_v19  ;;  %v10418_v36 = vrot.slane %v4974_v45, %v7847_v47  ;;  %v7155_v45 = vcombine.low %v5030_v12, %v5030_v12  ;;  %v7156_v23 = vcombine.low %v5033_v52, %v5033_v52 }
 0x54c   : > { %v10411_v51 = vpop.permute.xlu0 %5477  ;;  %v6498_v20 = vpop.permute.xlu1 %6497  ;;  %v10424_v38 = vrot.slane %v11835_v44, %v7847_v47  ;;  %v10470_v52 = vcombine.high %v10301_v55, %v11723_v62 }
 0x54d   : > { %v6293_v25 = vcombine.low %v10395_v32, %v10398_v4  ;;  %v10447_v39 = vcombine.high %v10418_v36, %v11723_v62 }
 0x54e   : > { %6129 = vrot.lane.b32.xlu0 %v7218_v11, %s7387_s8  ;;  %6117 = vrot.lane.b32.xlu1 %v7215_v42, %s7383_s29  ;;  %v7210_v11 = vcombine.low %v9925_v15, %v9925_v15  ;;  %v6066_v42 = vshrl.u32 %v10311_v30, 16  ;;  %v10451_v12 = vcombine.high %v10424_v38, %v11723_v62  ;;  %v6595_v15 = vcombine.low %v10316_v28, %v6498_v20 }
 0x54f   : > { %v10428_v29 = vrot.slane %v6293_v25, %v7847_v47  ;;  %v6056_v25 = vpack.i.b16 %v6055_v37, %v6054_v63  ;;  %v5054_v63 = vpack.i.b16 %v5053_v54, %v5052_v3  ;;  %v5034_v28 = vshrl.u32 %v10403_v34, 16 }
 0x550   : > { %v10436_v60 = vpop.permute.xlu0 %5485  ;;  %v6502_v44 = vpop.permute.xlu1 %6501  ;;  %v6068_v40 = vpack.i.b16 %v6067_v10, %v6066_v42  ;;  %v5069_v18 = vpack.i.b16 %v10451_v12, %v10447_v39  ;;  %v5035_v20 = vshrl.u32 %v10407_v17, 16  ;;  %v10474_v10 = vcombine.high %v10304_v14, %v11723_v62 }
 0x551   : > { %11836 = vst [vmem:[#allocation15_spill] sm:$0xff] %v10428_v29  ;;  %v6629_v50 = vcombine.low %v10340_v31, %v6502_v44  ;;  %v7162_v34 = vcombine.low %v5054_v63, %v5054_v63  ;;  %v7217_v42 = vcombine.low %v6071_v24, %v6071_v24  ;;  %v5040_v24 = vshrl.u32 %v10301_v55, 16 }
 0x552   : > { %5075 = vrot.lane.b32.xlu0 %v7155_v45, %s7385_s6  ;;  %6097 = vrot.lane.b32.xlu1 %v7210_v11, %s7386_s7  ;;  %v7212_v45 = vcombine.low %v6056_v25, %v6056_v25  ;;  %v7216_v17 = vcombine.low %v6068_v40, %v6068_v40  ;;  %v5047_v31 = vshrl.u32 %v10474_v10, 16  ;;  %v7167_v40 = vcombine.low %v5069_v18, %v5069_v18 }
 0x553   : > { %v5036_v63 = vpack.i.b16 %v5035_v20, %v5034_v28  ;;  %v5070_v18 = vshrl.u32 %v10447_v39, 16  ;;  %v5071_v28 = vshrl.u32 %v10451_v12, 16  ;;  %v4204_v20 = vcombine.high %v10149_v41, %v10152_v13 }
 0x554   : > { %v10457_v30 = vpop.permute.xlu0 %5493  ;;  %v6506_v37 = vpop.permute.xlu1 %6505  ;;  %v4170_v39 = vcombine.high %v10144_v46, %v10139_v9  ;;  %v4522_v9 = vcombine.high %v10190_v1, %v10193_v2  ;;  %v4488_v1 = vcombine.high %v10185_v26, %v10181_v56 }
 0x555   : > { %v6603_v0 = vcombine.low %v10365_v8, %v6506_v37  ;;  %v10477_v8 = vrot.slane %v6595_v15, %v7652_v19  ;;  %v5046_v15 = vshrl.u32 %v10470_v52, 16  ;;  %v7157_v55 = vcombine.low %v5036_v63, %v5036_v63 }
 0x556   : > { %5079 = vrot.lane.b32.xlu0 %v7156_v23, %s7381_s27  ;;  %6105 = vrot.lane.b32.xlu1 %v7212_v45, %s7385_s6  ;;  %v5063_v45 = vpack.i.b16 %v10424_v38, %v10418_v36  ;;  %v10521_v63 = vrot.slane %v4204_v20, %v7847_v47  ;;  %v10555_v56 = vrot.slane %v4522_v9, %v7847_v47 }
 0x557   : > { %v6610_v7 = vrot.slane %v6603_v0, %v7652_v19  ;;  %v6636_v0 = vrot.slane %v6629_v50, %v7652_v19  ;;  %v5048_v50 = vpack.i.b16 %v5047_v31, %v5046_v15 }
 0x558   : > { %v10481_v3 = vpop.permute.xlu0 %5501  ;;  %v6510_v54 = vpop.permute.xlu1 %6509  ;;  %v7165_v21 = vcombine.low %v5063_v45, %v5063_v45 }
 0x559   : > { %v6612_v11 = vcombine.high %v10477_v8, %v6610_v7  ;;  %v6637_v25 = vcombine.low %v10382_v27, %v6510_v54  ;;  %v6611_v12 = vcombine.low %v10477_v8, %v6610_v7  ;;  %v7161_v31 = vcombine.low %v5048_v50, %v5048_v50 }
 0x55a   : > { %5103 = vrot.lane.b32.xlu0 %v7162_v34, %s7385_s6  ;;  %6121 = vrot.lane.b32.xlu1 %v7216_v17, %s7384_s30  ;;  %v5041_v34 = vshrl.u32 %v10304_v14, 16  ;;  %v5533_v8 = vcombine.low %v10436_v60, %v10481_v3  ;;  %v10537_v50 = vrot.slane %v4170_v39, %v7847_v47  ;;  %v5045_v60 = vpack.i.b16 %v10474_v10, %v10470_v52  ;;  %v11840_v3 = vld [vmem:[#allocation5_spill] sm:$0xff] }
 0x55b   : > { %v6644_v44 = vrot.slane %v6637_v25, %v7652_v19  ;;  %v6626_v37 = vrot.slane %v6612_v11, %v7847_v47  ;;  %v10542_v2 = vrot.slane %v6611_v12, %v7847_v47  ;;  %v4989_v10 = vcombine.high %v10012_v61, %v11723_v62 }
 0x55c   : > { %v10491_v23 = vpop.permute.xlu0 %5159  ;;  %v10494_v27 = vpop.permute.xlu1 %5481  ;;  %v4259_v52 = vpack.i.b16 %v10521_v63, %v10537_v50  ;;  %v10574_v39 = vrot.slane %v4488_v1, %v7847_v47  ;;  %v7160_v1 = vcombine.low %v5045_v60, %v5045_v60 }
 0x55d   : > { %v6646_v54 = vcombine.high %v6636_v0, %v6644_v44  ;;  %v6645_v17 = vcombine.low %v6636_v0, %v6644_v44  ;;  %v6628_v15 = vcombine.high %v6626_v37, %v11723_v62  ;;  %v5072_v0 = vpack.i.b16 %v5071_v28, %v5070_v18 }
 0x55e   : > { %5123 = vrot.lane.b32.xlu0 %v7167_v40, %s7386_s7  ;;  %6125 = vrot.lane.b32.xlu1 %v7217_v42, %s7386_s7  ;;  %v7211_v40 = vcombine.low %v9985_v22, %v9985_v22  ;;  %v5042_v42 = vpack.i.b16 %v5041_v34, %v5040_v24  ;;  %v6702_v44 = vshrl.u32 %v6626_v37, 16  ;;  %v4136_v18 = vcombine.high %v11840_v3, %v10070_v48 }
 0x55f   : > { %v6660_v11 = vrot.slane %v6646_v54, %v7847_v47  ;;  %v10526_v46 = vrot.slane %v6645_v17, %v7847_v47  ;;  %v6708_v34 = vshrl.u32 %v6628_v15, 16  ;;  %v5525_v28 = vcombine.low %v10411_v51, %v10457_v30 }
 0x560   : > { %v10507_v25 = vpop.permute.xlu0 %5167  ;;  %v5490_v14 = vpop.permute.xlu1 %5489  ;;  %v7168_v20 = vcombine.low %v5072_v0, %v5072_v0  ;;  %v10565_v51 = vrot.slane %v5533_v8, %v7652_v19  ;;  %v7159_v30 = vcombine.low %v5042_v42, %v5042_v42  ;;  %v11845_v0 = vld [vmem:[#allocation7_spill] sm:$0xff]  ;;  %v7137_v8 = vcombine.low %v4259_v52, %v4259_v52 }
 0x561   : > { %v10516_v41 = vpack.i.b16 %v6660_v11, %v6626_v37  ;;  %v6703_v13 = vshrl.u32 %v6660_v11, 16  ;;  %v6662_v22 = vcombine.high %v6660_v11, %v11723_v62  ;;  %v10581_v42 = vrot.slane %v5525_v28, %v7652_v19 }
 0x562   : > { %5083 = vrot.lane.b32.xlu0 %v7157_v55, %s7382_s28  ;;  %6101 = vrot.lane.b32.xlu1 %v7211_v40, %s7387_s8  ;;  %v5023_v55 = vcombine.high %v10018_v33, %v11723_v62  ;;  %v11843_v40 = vld [vmem:[#allocation4_spill] sm:$0xff]  ;;  %v5065_v3 = vshrl.u32 %v10424_v38, 16  ;;  %v5058_v52 = vshrl.u32 %v4989_v10, 16 }
 0x563   : > { %11837 = vst [vmem:[#allocation12_spill] sm:$0xff] %v10516_v41  ;;  %v10532_v24 = vpack.i.b16 %v6703_v13, %v6702_v44  ;;  %v10534_v37 = vpack.i.b16 %v6662_v22, %v6628_v15  ;;  %v6709_v54 = vshrl.u32 %v6662_v22, 16  ;;  %v10578_v13 = vrot.slane %v4136_v18, %v7847_v47  ;;  %11844 = vst [vmem:[#allocation14_spill] sm:$0xff] %v10581_v42  ;;  %v11853_v41 = vld [vmem:[#allocation23_spill] sm:$0xff] }
 0x564   : > { %v10530_v7 = vpop.permute.xlu0 %5175  ;;  %v5498_v45 = vpop.permute.xlu1 %5497  ;;  %v4225_v44 = vshrl.u32 %v11845_v0, 16  ;;  %v5059_v48 = vshrl.u32 %v5023_v55, 16 }
 0x565   : > { %11838 = vst [vmem:[#allocation33_spill] sm:$0xff] %v10532_v24  ;;  %11839 = vst [vmem:[#allocation18_spill] sm:$0xff] %v10534_v37  ;;  %v10552_v17 = vpack.i.b16 %v6709_v54, %v6708_v34  ;;  %v5559_v26 = vcombine.low %v10494_v27, %v5498_v45  ;;  %v11842_v27 = vld [vmem:[#allocation3_spill] sm:$0xff]  ;;  %v4577_v45 = vpack.i.b16 %v10555_v56, %v10574_v39  ;;  %v11852_v24 = vld [vmem:[#allocation21_spill] sm:$0xff] }
 0x566   : > { %5099 = vrot.lane.b32.xlu0 %v7161_v31, %s7387_s8  ;;  %5115 = vrot.lane.b32.xlu1 %v7165_v21, %s7383_s29  ;;  %v4102_v15 = vcombine.high %v11843_v40, %v11842_v27  ;;  %v5064_v31 = vshrl.u32 %v10418_v36, 16  ;;  %v5541_v34 = vcombine.low %v10581_v42, %v10565_v51  ;;  %v5057_v36 = vpack.i.b16 %v5023_v55, %v4989_v10  ;;  %v11851_v37 = vld [vmem:[#allocation11_spill] sm:$0xff] }
 0x567   : > { %11841 = vst [vmem:[#allocation13_spill] sm:$0xff] %v10552_v17  ;;  %v10587_v22 = vrot.slane %v5559_v26, %v7652_v19  ;;  %v4237_v27 = vshrl.u32 %v10578_v13, 16 }
 0x568   : > { %v10558_v11 = vpop.permute.xlu0 %5183  ;;  %v5506_v21 = vpop.permute.xlu1 %5505  ;;  %v10600_v18 = vrot.slane %v4102_v15, %v7847_v47  ;;  %v10614_v40 = vrot.slane %v5541_v34, %v7847_v47 }
 0x569   : > { %v5567_v12 = vcombine.low %v5490_v14, %v5506_v21  ;;  %v5215_v55 = vcombine.low %v10507_v25, %v10558_v11 }
 0x56a   : > { %5127 = vrot.lane.b32.xlu0 %v7168_v20, %s7387_s8  ;;  %5091 = vrot.lane.b32.xlu1 %v7159_v30, %s7384_s30  ;;  %v11846_v20 = vld [vmem:[#allocation6_spill] sm:$0xff]  ;;  %v7151_v30 = vcombine.low %v4577_v45, %v4577_v45  ;;  %11848 = vst [vmem:[#allocation34_spill] sm:$0xff] %v10614_v40  ;;  %v4236_v10 = vshrl.u32 %v10600_v18, 16 }
 0x56b   : > { %v10590_v9 = vrot.slane %v5567_v12, %v7652_v19  ;;  %v4224_v26 = vshrl.u32 %v11846_v20, 16  ;;  %v7163_v12 = vcombine.low %v5057_v36, %v5057_v36  ;;  %v4542_v36 = vshrl.u32 %v11851_v37, 16 }
 0x56c   : > { %v10592_v14 = vpop.permute.xlu0 %5479  ;;  %v5164_v54 = vpop.permute.xlu1 %5163 }
 0x56d   : > { %v5575_v28 = vcombine.low %v10587_v22, %v10590_v9  ;;  %v4226_v38 = vpack.i.b16 %v4225_v44, %v4224_v26  ;;  %v4238_v26 = vpack.i.b16 %v4237_v27, %v4236_v10 }
 0x56e   : > { %4311 = vrot.lane.b32.xlu0 %v7137_v8, %s7383_s29  ;;  %5095 = vrot.lane.b32.xlu1 %v7160_v1, %s7386_s7  ;;  %v5066_v8 = vpack.i.b16 %v5065_v3, %v5064_v31  ;;  %v11849_v1 = vld [vmem:[#allocation25_spill] sm:$0xff] }
 0x56f   : > { %v10608_v21 = vrot.slane %v5575_v28, %v7847_v47  ;;  %v11850_v28 = vld [vmem:[#allocation26_spill] sm:$0xff]  ;;  %v7127_v34 = vcombine.low %v4226_v38, %v4226_v38  ;;  %v5207_v38 = vcombine.low %v10491_v23, %v10530_v7  ;;  %v7131_v25 = vcombine.low %v4238_v26, %v4238_v26 }
 0x570   : > { %v10610_v60 = vpop.permute.xlu0 %5487  ;;  %v5172_v15 = vpop.permute.xlu1 %5171  ;;  %v4420_v17 = vcombine.high %v11850_v28, %v11849_v1  ;;  %v7166_v3 = vcombine.low %v5066_v8, %v5066_v8  ;;  %v4454_v1 = vcombine.high %v11853_v41, %v11852_v24  ;;  %v10643_v41 = vrot.slane %v5215_v55, %v7652_v19 }
 0x571   : > { %11847 = vst [vmem:[#allocation8_spill] sm:$0xff] %v10608_v21  ;;  %v10654_v8 = vrot.slane %v5207_v38, %v7652_v19  ;;  %v4151_v38 = vcombine.high %v11845_v0, %v11723_v62 }
 0x572   : > { %4629 = vrot.lane.b32.xlu0 %v7151_v30, %s7383_s29  ;;  %5107 = vrot.lane.b32.xlu1 %v7163_v12, %s7381_s27  ;;  %v5060_v30 = vpack.i.b16 %v5059_v48, %v5058_v52  ;;  %v11854_v12 = vld [vmem:[#allocation16_spill] sm:$0xff]  ;;  %v4434_v44 = vrot.slane %v4420_v17, %v7847_v47  ;;  %v10640_v48 = vcombine.high %v11851_v37, %v11723_v62  ;;  %v11860_v37 = vld [vmem:[#allocation19_spill] sm:$0xff] }
 0x573   : > { %v4543_v28 = vshrl.u32 %v11854_v12, 16  ;;  %11855 = vst [vmem:[#allocation5_spill] sm:$0xff] %v10643_v41  ;;  %v4235_v17 = vpack.i.b16 %v10578_v13, %v10600_v18  ;;  %v4468_v23 = vrot.slane %v4454_v1, %v7847_v47  ;;  %11856 = vst [vmem:[#allocation3_spill] sm:$0xff] %v10654_v8 }
 0x574   : > { %v10623_v45 = vpop.permute.xlu0 %5495  ;;  %v5180_v31 = vpop.permute.xlu1 %5179  ;;  %v7164_v52 = vcombine.low %v5060_v30, %v5060_v30 }
 0x575   : > { %v5241_v27 = vcombine.low %v5164_v54, %v5180_v31  ;;  %v4544_v11 = vpack.i.b16 %v4543_v28, %v4542_v36  ;;  %v10651_v54 = vcombine.high %v11854_v12, %v11723_v62  ;;  %v7130_v1 = vcombine.low %v4235_v17, %v4235_v17 }
 0x576   : > { %4271 = vrot.lane.b32.xlu0 %v7127_v34, %s7385_s6  ;;  %5119 = vrot.lane.b32.xlu1 %v7166_v3, %s7384_s30  ;;  %v4554_v34 = vshrl.u32 %v4434_v44, 16  ;;  %v5223_v3 = vcombine.low %v10654_v8, %v10643_v41  ;;  %v4553_v28 = vpack.i.b16 %v4468_v23, %v4434_v44  ;;  %v10684_v12 = vcombine.high %v11860_v37, %v11723_v62 }
 0x577   : > { %v10658_v26 = vrot.slane %v5241_v27, %v7652_v19  ;;  %v4547_v31 = vpack.i.b16 %v10651_v54, %v10640_v48  ;;  %v4436_v8 = vcombine.high %v4434_v44, %v11723_v62 }
 0x578   : > { %v10636_v10 = vpop.permute.xlu0 %5503  ;;  %v5188_v24 = vpop.permute.xlu1 %5187  ;;  %v10687_v0 = vrot.slane %v5223_v3, %v7847_v47  ;;  %v7144_v40 = vcombine.low %v4553_v28, %v4553_v28 }
 0x579   : > { %v5249_v7 = vcombine.low %v5172_v15, %v5188_v24  ;;  %11857 = vst [vmem:[#allocation4_spill] sm:$0xff] %v10658_v26  ;;  %v7141_v15 = vcombine.low %v4544_v11, %v4544_v11  ;;  %v4117_v11 = vcombine.high %v11846_v20, %v11723_v62  ;;  %v7142_v17 = vcombine.low %v4547_v31, %v4547_v31 }
 0x57a   : > { %4287 = vrot.lane.b32.xlu0 %v7131_v25, %s7384_s30  ;;  %5111 = vrot.lane.b32.xlu1 %v7164_v52, %s7382_s28  ;;  %v4555_v25 = vshrl.u32 %v4468_v23, 16  ;;  %11861 = vst [vmem:[#allocation21_spill] sm:$0xff] %v10687_v0  ;;  %v4152_v20 = vcombine.high %v10578_v13, %v11723_v62  ;;  %v4470_v31 = vcombine.high %v4468_v23, %v11723_v62 }
 0x57b   : > { %v10661_v36 = vrot.slane %v5249_v7, %v7652_v19 }
 0x57c   : > { %v10663_v55 = vpop.permute.xlu0 %5161  ;;  %v5484_v30 = vpop.permute.xlu1 %5483  ;;  %v4556_v7 = vpack.i.b16 %v4555_v25, %v4554_v34  ;;  %v4118_v34 = vcombine.high %v10600_v18, %v11723_v62  ;;  %v4579_v25 = vshrl.u32 %v10555_v56, 16  ;;  %v4578_v18 = vshrl.u32 %v10574_v39, 16 }
 0x57d   : > { %11858 = vst [vmem:[#allocation25_spill] sm:$0xff] %v10661_v36  ;;  %v5257_v27 = vcombine.low %v10658_v26, %v10661_v36  ;;  %v4559_v26 = vpack.i.b16 %v4470_v31, %v4436_v8  ;;  %v4249_v36 = vshrl.u32 %v11860_v37, 16 }
 0x57e   : > { %4589 = vrot.lane.b32.xlu0 %v7141_v15, %s7385_s6  ;;  %4283 = vrot.lane.b32.xlu1 %v7130_v1, %s7383_s29  ;;  %v4229_v1 = vpack.i.b16 %v4151_v38, %v4117_v11  ;;  %v7145_v28 = vcombine.low %v4556_v7, %v4556_v7  ;;  %v5593_v7 = vcombine.low %v10592_v14, %v10623_v45  ;;  %v4243_v45 = vshrl.u32 %v4152_v20, 16 }
 0x57f   : > { %v10678_v24 = vrot.slane %v5257_v27, %v7847_v47  ;;  %v11862_v27 = vld [vmem:[#allocation9_spill] sm:$0xff] }
 0x580   : > { %v10680_v52 = vpop.permute.xlu0 %5169  ;;  %v5492_v15 = vpop.permute.xlu1 %5491  ;;  %v10694_v21 = vcombine.high %v11862_v27, %v11723_v62  ;;  %v7128_v33 = vcombine.low %v4229_v1, %v4229_v1  ;;  %v4231_v1 = vshrl.u32 %v4151_v38, 16  ;;  %v10723_v14 = vrot.slane %v5593_v7, %v7652_v19 }
 0x581   : > { %11859 = vst [vmem:[#allocation26_spill] sm:$0xff] %v10678_v24  ;;  %v4260_v7 = vshrl.u32 %v10537_v50, 16 }
 0x582   : > { %4593 = vrot.lane.b32.xlu0 %v7142_v17, %s7381_s27  ;;  %4601 = vrot.lane.b32.xlu1 %v7144_v40, %s7383_s29  ;;  %v4253_v13 = vpack.i.b16 %v10684_v12, %v10694_v21  ;;  %v5601_v17 = vcombine.low %v10610_v60, %v10636_v10  ;;  %v4241_v40 = vpack.i.b16 %v4152_v20, %v4118_v34 }
 0x583   : > { %v4580_v10 = vpack.i.b16 %v4579_v25, %v4578_v18  ;;  %v4261_v18 = vshrl.u32 %v10521_v63, 16 }
 0x584   : > { %v10701_v3 = vpop.permute.xlu0 %5177  ;;  %v5500_v61 = vpop.permute.xlu1 %5499  ;;  %v7135_v60 = vcombine.low %v4253_v13, %v4253_v13  ;;  %v10718_v41 = vrot.slane %v5601_v17, %v7652_v19  ;;  %v7146_v17 = vcombine.low %v4559_v26, %v4559_v26 }
 0x585   : > { %v5627_v0 = vcombine.low %v5484_v30, %v5500_v61  ;;  %v4248_v61 = vshrl.u32 %v11862_v27, 16 }
 0x586   : > { %4605 = vrot.lane.b32.xlu0 %v7145_v28, %s7384_s30  ;;  %4275 = vrot.lane.b32.xlu1 %v7128_v33, %s7381_s27  ;;  %v7132_v28 = vcombine.low %v4241_v40, %v4241_v40  ;;  %v4230_v33 = vshrl.u32 %v4117_v11, 16  ;;  %v5609_v11 = vcombine.low %v10723_v14, %v10718_v41 }
 0x587   : > { %v10728_v23 = vrot.slane %v5627_v0, %v7652_v19  ;;  %v4250_v40 = vpack.i.b16 %v4249_v36, %v4248_v61  ;;  %v4242_v0 = vshrl.u32 %v4118_v34, 16  ;;  %v4262_v61 = vpack.i.b16 %v4261_v18, %v4260_v7 }
 0x588   : > { %v10715_v24 = vpop.permute.xlu0 %5185  ;;  %v5508_v44 = vpop.permute.xlu1 %5507  ;;  %v4232_v13 = vpack.i.b16 %v4231_v1, %v4230_v33  ;;  %v4561_v1 = vshrl.u32 %v4470_v31, 16  ;;  %v4567_v18 = vshrl.u32 %v10207_v53, 16 }
 0x589   : > { %v5635_v42 = vcombine.low %v5492_v15, %v5508_v44  ;;  %v7152_v15 = vcombine.low %v4580_v10, %v4580_v10  ;;  %v4244_v36 = vpack.i.b16 %v4243_v45, %v4242_v0  ;;  %v10749_v44 = vrot.slane %v5609_v11, %v7847_v47  ;;  %v11865_v0 = vld [vmem:[#allocation45_spill] sm:$0xff] }
 0x58a   : > { %4303 = vrot.lane.b32.xlu0 %v7135_v60, %s7381_s27  ;;  %4291 = vrot.lane.b32.xlu1 %v7132_v28, %s7386_s7  ;;  %v7129_v26 = vcombine.low %v4232_v13, %v4232_v13  ;;  %v7134_v33 = vcombine.low %v4250_v40, %v4250_v40  ;;  %v5283_v11 = vcombine.low %v10680_v52, %v10715_v24 }
 0x58b   : > { %v10731_v30 = vrot.slane %v5635_v42, %v7652_v19  ;;  %v4560_v42 = vshrl.u32 %v4436_v8, 16  ;;  %11864 = vst [vmem:[#allocation19_spill] sm:$0xff] %v10749_v44  ;;  %v4220_v8 = vcombine.high %v10521_v63, %v11723_v62  ;;  %v7133_v13 = vcombine.low %v4244_v36, %v4244_v36 }
 0x58c   : > { %v10733_v38 = vpop.permute.xlu0 %3977  ;;  %v5166_v25 = vpop.permute.xlu1 %5165  ;;  %v7138_v40 = vcombine.low %v4262_v61, %v4262_v61  ;;  %v6677_v36 = vpack.i.b16 %v10327_v57, %v10321_v43  ;;  %v10791_v43 = vcombine.high %v11865_v0, %v11723_v62 }
 0x58d   : > { %v5643_v20 = vcombine.low %v10728_v23, %v10731_v30  ;;  %v4562_v34 = vpack.i.b16 %v4561_v1, %v4560_v42  ;;  %v4566_v42 = vshrl.u32 %v11865_v0, 16  ;;  %v4267_v7 = vshrl.u32 %v4220_v8, 16 }
 0x58e   : > { %4633 = vrot.lane.b32.xlu0 %v7152_v15, %s7384_s30  ;;  %4609 = vrot.lane.b32.xlu1 %v7146_v17, %s7386_s7  ;;  %v4186_v15 = vcombine.high %v10537_v50, %v11723_v62  ;;  %v5275_v50 = vcombine.low %v10663_v55, %v10701_v3  ;;  %v10778_v55 = vrot.slane %v5283_v11, %v7652_v19 }
 0x58f   : > { %v10744_v60 = vrot.slane %v5643_v20, %v7847_v47  ;;  %v7147_v20 = vcombine.low %v4562_v34, %v4562_v34  ;;  %v4568_v34 = vpack.i.b16 %v4567_v18, %v4566_v42  ;;  %v7236_v11 = vcombine.low %v6677_v36, %v6677_v36 }
 0x590   : > { %v10746_v10 = vpop.permute.xlu0 %3937  ;;  %v5174_v28 = vpop.permute.xlu1 %5173  ;;  %v4265_v63 = vpack.i.b16 %v4220_v8, %v4186_v15  ;;  %v4266_v1 = vshrl.u32 %v4186_v15, 16  ;;  %v10782_v8 = vcombine.high %v10207_v53, %v11723_v62 }
 0x591   : > { %11863 = vst [vmem:[#allocation23_spill] sm:$0xff] %v10744_v60 }
 0x592   : > { %4279 = vrot.lane.b32.xlu0 %v7129_v26, %s7382_s28  ;;  %4299 = vrot.lane.b32.xlu1 %v7134_v33, %s7385_s6  ;;  %v4538_v26 = vcombine.high %v10555_v56, %v11723_v62  ;;  %v4504_v33 = vcombine.high %v10574_v39, %v11723_v62  ;;  %v7139_v61 = vcombine.low %v4265_v63, %v4265_v63  ;;  %v4573_v53 = vshrl.u32 %v10782_v8, 16 }
 0x593   : > { %v4268_v57 = vpack.i.b16 %v4267_v7, %v4266_v1  ;;  %v7148_v63 = vcombine.low %v4568_v34, %v4568_v34  ;;  %v4571_v18 = vpack.i.b16 %v10782_v8, %v10791_v43  ;;  %v6260_v7 = vcombine.high %v10239_v58, %v10242_v35  ;;  %v11869_v35 = vld [vmem:[#allocation36_spill] sm:$0xff] }
 0x594   : > { %v10759_v45 = vpop.permute.xlu0 %3953  ;;  %v5182_v17 = vpop.permute.xlu1 %5181  ;;  %v4585_v39 = vshrl.u32 %v4538_v26, 16  ;;  %v4548_v58 = vshrl.u32 %v10640_v48, 16 }
 0x595   : > { %v5309_v24 = vcombine.low %v5166_v25, %v5182_v17  ;;  %v10786_v25 = vrot.slane %v5275_v50, %v7652_v19  ;;  %v6274_v48 = vrot.slane %v6260_v7, %v7847_v47 }
 0x596   : > { %4295 = vrot.lane.b32.xlu0 %v7133_v13, %s7387_s8  ;;  %4315 = vrot.lane.b32.xlu1 %v7138_v40, %s7384_s30 }
 0x597   : > { %v10794_v15 = vrot.slane %v5309_v24, %v7652_v19  ;;  %v5291_v17 = vcombine.low %v10786_v25, %v10778_v55  ;;  %v6294_v24 = vcombine.high %v10395_v32, %v10398_v4  ;;  %v11870_v32 = vld [vmem:[#allocation40_spill] sm:$0xff] }
 0x598   : > { %v10771_v52 = vpop.permute.xlu0 %3969  ;;  %v5190_v3 = vpop.permute.xlu1 %5189  ;;  %v6226_v4 = vcombine.high %v11870_v32, %v11869_v35  ;;  %v6361_v32 = vshrl.u32 %v6274_v48, 16 }
 0x599   : > { %v5317_v56 = vcombine.low %v5174_v28, %v5190_v3  ;;  %v11867_v3 = vld [vmem:[#allocation37_spill] sm:$0xff]  ;;  %v10825_v34 = vrot.slane %v5291_v17, %v7847_v47  ;;  %v4549_v17 = vshrl.u32 %v10651_v54, 16 }
 0x59a   : > { %4613 = vrot.lane.b32.xlu0 %v7147_v20, %s7387_s8  ;;  %4319 = vrot.lane.b32.xlu1 %v7139_v61, %s7386_s7  ;;  %v4584_v20 = vshrl.u32 %v4504_v33, 16  ;;  %v10822_v61 = vcombine.high %v11867_v3, %v11723_v62  ;;  %v6240_v54 = vrot.slane %v6226_v4, %v7847_v47  ;;  %v4255_v4 = vshrl.u32 %v10684_v12, 16 }
 0x59b   : > { %v10797_v13 = vrot.slane %v5317_v56, %v7652_v19  ;;  %v7140_v19 = vcombine.low %v4268_v57, %v4268_v57  ;;  %11868 = vst [vmem:[#allocation46_spill] sm:$0xff] %v10825_v34  ;;  %v7149_v57 = vcombine.low %v4571_v18, %v4571_v18 }
 0x59c   : > { %v10799_v28 = vpop.permute.xlu0 %3985  ;;  %v10803_v40 = vpop.permute.xlu1 %3949  ;;  %v4586_v42 = vpack.i.b16 %v4585_v39, %v4584_v20  ;;  %v4583_v39 = vpack.i.b16 %v4538_v26, %v4504_v33  ;;  %v10845_v33 = vrot.slane %v6294_v24, %v7847_v47  ;;  %v6276_v26 = vcombine.high %v6274_v48, %v11723_v62 }
 0x59d   : > { %11866 = vst [vmem:[#allocation9_spill] sm:$0xff] %v10799_v28  ;;  %v5325_v50 = vcombine.low %v10794_v15, %v10797_v13  ;;  %v6242_v12 = vcombine.high %v6240_v54, %v11723_v62 }
 0x59e   : > { %6725 = vrot.lane.b32.xlu0 %v7236_v11, %s7383_s29  ;;  %4617 = vrot.lane.b32.xlu1 %v7148_v63, %s7385_s6  ;;  %v6328_v11 = vcombine.high %v10391_v16, %v10377_v49  ;;  %v11871_v63 = vld [vmem:[#allocation44_spill] sm:$0xff]  ;;  %v7154_v49 = vcombine.low %v4586_v42, %v4586_v42 }
 0x59f   : > { %v10816_v36 = vrot.slane %v5325_v50, %v7847_v47  ;;  %v10837_v20 = vcombine.high %v11871_v63, %v11723_v62 }
 0x5a0   : > { %v10818_v1 = vpop.permute.xlu0 %3945  ;;  %v10827_v56 = vpop.permute.xlu1 %3941  ;;  %v10855_v35 = vrot.slane %v6328_v11, %v7847_v47  ;;  %v6360_v11 = vshrl.u32 %v6240_v54, 16 }
 0x5a1   : > { %v6353_v16 = vpack.i.b16 %v10822_v61, %v10837_v20 }
 0x5a2   : > { %4323 = vrot.lane.b32.xlu0 %v7140_v19, %s7387_s8  ;;  %4621 = vrot.lane.b32.xlu1 %v7149_v57, %s7381_s27  ;;  %v7153_v19 = vcombine.low %v4583_v39, %v4583_v39  ;;  %v4550_v57 = vpack.i.b16 %v4549_v17, %v4548_v58  ;;  %v6383_v42 = vpack.i.b16 %v10855_v35, %v10845_v33  ;;  %v4254_v17 = vshrl.u32 %v10694_v21, 16 }
 0x5a3   : > { %v7220_v24 = vcombine.low %v6353_v16, %v6353_v16  ;;  %v6359_v58 = vpack.i.b16 %v6274_v48, %v6240_v54  ;;  %v4572_v21 = vshrl.u32 %v10791_v43, 16  ;;  %v10883_v48 = vcombine.high %v10428_v29, %v11723_v62 }
 0x5a4   : > { %v10847_v18 = vpop.permute.xlu0 %3961  ;;  %v10851_v50 = vpop.permute.xlu1 %3957  ;;  %v7143_v39 = vcombine.low %v4550_v57, %v4550_v57  ;;  %v7229_v16 = vcombine.low %v6383_v42, %v6383_v42  ;;  %v4256_v57 = vpack.i.b16 %v4255_v4, %v4254_v17  ;;  %v6349_v4 = vshrl.u32 %v11867_v3, 16 }
 0x5a5   : > { %v7222_v0 = vcombine.low %v6359_v58, %v6359_v58  ;;  %v4574_v8 = vpack.i.b16 %v4573_v53, %v4572_v21  ;;  %v6348_v43 = vshrl.u32 %v11871_v63, 16  ;;  %v6384_v53 = vshrl.u32 %v10845_v33, 16 }
 0x5a6   : > { %4641 = vrot.lane.b32.xlu0 %v7154_v49, %s7387_s8  ;;  %4637 = vrot.lane.b32.xlu1 %v7153_v19, %s7386_s7  ;;  %v6362_v19 = vpack.i.b16 %v6361_v32, %v6360_v11  ;;  %v6365_v32 = vpack.i.b16 %v6276_v26, %v6242_v12  ;;  %v7136_v58 = vcombine.low %v4256_v57, %v4256_v57  ;;  %v6667_v21 = vshrl.u32 %v10346_v5, 16 }
 0x5a7   : > { %v6350_v57 = vpack.i.b16 %v6349_v4, %v6348_v43  ;;  %v6367_v3 = vshrl.u32 %v6276_v26, 16  ;;  %v6593_v4 = vcombine.high %v10346_v5, %v11723_v62  ;;  %v6366_v43 = vshrl.u32 %v6242_v12, 16 }
 0x5a8   : > { %v10859_v7 = vpop.permute.xlu0 %6089  ;;  %v10863_v31 = vpop.permute.xlu1 %3965  ;;  %v7223_v42 = vcombine.low %v6362_v19, %v6362_v19  ;;  %v7224_v11 = vcombine.low %v6365_v32, %v6365_v32  ;;  %v7150_v19 = vcombine.low %v4574_v8, %v4574_v8  ;;  %v6691_v26 = vshrl.u32 %v10526_v46, 16 }
 0x5a9   : > { %v6690_v12 = vshrl.u32 %v10542_v2, 16 }
 0x5aa   : > { %6399 = vrot.lane.b32.xlu0 %v7220_v24, %s7381_s27  ;;  %4597 = vrot.lane.b32.xlu1 %v7143_v39, %s7382_s28 }
 0x5ac   : > { %v10869_v49 = vpop.permute.xlu0 %6093  ;;  %v10872_v28 = vpop.permute.xlu1 %3981 }
 0x5ad   : > { %11872 = vst [vmem:[#allocation36_spill] sm:$0xff] %v10872_v28 }
 0x5ae   : > { %6435 = vrot.lane.b32.xlu0 %v7229_v16, %s7383_s29  ;;  %6407 = vrot.lane.b32.xlu1 %v7222_v0, %s7383_s29  ;;  %v10891_v0 = vcombine.high %v10434_v59, %v11723_v62 }
 0x5b0   : > { %v10879_v24 = vpop.permute.xlu0 %6109  ;;  %v10885_v39 = vpop.permute.xlu1 %3973  ;;  %v6377_v17 = vpack.i.b16 %v10891_v0, %v10883_v48 }
 0x5b1   : > { %11873 = vst [vmem:[#allocation40_spill] sm:$0xff] %v10879_v24 }
 0x5b2   : > { %6411 = vrot.lane.b32.xlu0 %v7223_v42, %s7384_s30  ;;  %4307 = vrot.lane.b32.xlu1 %v7136_v58, %s7382_s28  ;;  %v6385_v42 = vshrl.u32 %v10855_v35, 16  ;;  %v6666_v58 = vshrl.u32 %v10356_v6, 16  ;;  %v7227_v24 = vcombine.low %v6377_v17, %v6377_v17 }
 0x5b4   : > { %v10895_v54 = vpop.permute.xlu0 %6085  ;;  %v10900_v16 = vpop.permute.xlu1 %3989  ;;  %v6386_v63 = vpack.i.b16 %v6385_v42, %v6384_v53  ;;  %v6668_v8 = vpack.i.b16 %v6667_v21, %v6666_v58  ;;  %v6368_v53 = vpack.i.b16 %v6367_v3, %v6366_v43  ;;  %v6372_v58 = vshrl.u32 %v10428_v29, 16 }
 0x5b5   : > { %11874 = vst [vmem:[#allocation47_spill] sm:$0xff] %v10900_v16  ;;  %v7219_v16 = vcombine.low %v6350_v57, %v6350_v57 }
 0x5b6   : > { %6415 = vrot.lane.b32.xlu0 %v7224_v11, %s7386_s7  ;;  %4625 = vrot.lane.b32.xlu1 %v7150_v19, %s7382_s28  ;;  %v6559_v11 = vcombine.high %v10356_v6, %v11723_v62  ;;  %v7230_v17 = vcombine.low %v6386_v63, %v6386_v63  ;;  %v7233_v57 = vcombine.low %v6668_v8, %v6668_v8  ;;  %v6354_v6 = vshrl.u32 %v10837_v20, 16 }
 0x5b7   : > { %v7225_v3 = vcombine.low %v6368_v53, %v6368_v53  ;;  %v6692_v63 = vpack.i.b16 %v6691_v26, %v6690_v12  ;;  %v10930_v8 = vcombine.high %v10526_v46, %v11723_v62  ;;  %v6673_v53 = vshrl.u32 %v6593_v4, 16 }
 0x5b8   : > { %v10907_v32 = vpop.permute.xlu0 %5087  ;;  %v10909_v28 = vpop.permute.xlu1 %6077  ;;  %v6671_v21 = vpack.i.b16 %v6593_v4, %v6559_v11  ;;  %v5644_v26 = vcombine.high %v10728_v23, %v10731_v30  ;;  %v5576_v20 = vcombine.high %v10587_v22, %v10590_v9  ;;  %v11877_v23 = vld [vmem:[#allocation14_spill] sm:$0xff]  ;;  %v10961_v22 = vcombine.high %v10855_v35, %v11723_v62  ;;  %v11882_v35 = vld [vmem:[#allocation4_spill] sm:$0xff] }
 0x5b9   : > { %v5542_v30 = vcombine.high %v11877_v23, %v10565_v51 }
 0x5ba   : > { %6427 = vrot.lane.b32.xlu0 %v7227_v24, %s7381_s27  ;;  %6395 = vrot.lane.b32.xlu1 %v7219_v16, %s7385_s6  ;;  %v6373_v24 = vshrl.u32 %v10434_v59, 16  ;;  %v6355_v16 = vshrl.u32 %v10822_v61, 16  ;;  %v7234_v29 = vcombine.low %v6671_v21, %v6671_v21 }
 0x5bc   : > { %v10917_v19 = vpop.permute.xlu0 %6113  ;;  %v6082_v42 = vpop.permute.xlu1 %6081  ;;  %v6356_v61 = vpack.i.b16 %v6355_v16, %v6354_v6  ;;  %v6672_v6 = vshrl.u32 %v6559_v11, 16  ;;  %v5326_v11 = vcombine.high %v10794_v15, %v10797_v13 }
 0x5bd   : > { %11875 = vst [vmem:[#allocation48_spill] sm:$0xff] %v10917_v19 }
 0x5be   : > { %6439 = vrot.lane.b32.xlu0 %v7230_v17, %s7384_s30  ;;  %6713 = vrot.lane.b32.xlu1 %v7233_v57, %s7385_s6  ;;  %v6374_v17 = vpack.i.b16 %v6373_v24, %v6372_v58  ;;  %v10938_v57 = vcombine.high %v10542_v2, %v11723_v62  ;;  %v7221_v4 = vcombine.low %v6356_v61, %v6356_v61  ;;  %v11881_v61 = vld [vmem:[#allocation25_spill] sm:$0xff] }
 0x5bf   : > { %v6674_v9 = vpack.i.b16 %v6673_v53, %v6672_v6 }
 0x5c0   : > { %v10926_v19 = vpop.permute.xlu0 %6129  ;;  %v10932_v43 = vpop.permute.xlu1 %6117  ;;  %v6695_v21 = vpack.i.b16 %v10930_v8, %v10938_v57  ;;  %v7226_v24 = vcombine.low %v6374_v17, %v6374_v17  ;;  %v10973_v17 = vrot.slane %v5576_v20, %v7847_v47  ;;  %v11884_v20 = vld [vmem:[#allocation24_spill] sm:$0xff] }
 0x5c1   : > { %11876 = vst [vmem:[#allocation49_spill] sm:$0xff] %v10926_v19  ;;  %v7240_v19 = vcombine.low %v6692_v63, %v6692_v63 }
 0x5c2   : > { %6419 = vrot.lane.b32.xlu0 %v7225_v3, %s7387_s8  ;;  %6717 = vrot.lane.b32.xlu1 %v7234_v29, %s7381_s27  ;;  %v10951_v3 = vcombine.high %v10845_v33, %v11723_v62  ;;  %v5610_v29 = vcombine.high %v10723_v14, %v10718_v41  ;;  %v10964_v33 = vrot.slane %v5644_v26, %v7847_v47  ;;  %v11878_v41 = vld [vmem:[#allocation42_spill] sm:$0xff]  ;;  %v11879_v14 = vld [vmem:[#allocation39_spill] sm:$0xff] }
 0x5c3   : > { %v7241_v63 = vcombine.low %v6695_v21, %v6695_v21  ;;  %v11883_v21 = vld [vmem:[#allocation38_spill] sm:$0xff] }
 0x5c4   : > { %v5076_v12 = vpop.permute.xlu0 %5075  ;;  %v10947_v58 = vpop.permute.xlu1 %6097  ;;  %v6389_v15 = vpack.i.b16 %v10961_v22, %v10951_v3  ;;  %v10983_v13 = vrot.slane %v5610_v29, %v7847_v47  ;;  %v11885_v6 = vpack.i.b16 %v11883_v21, %v11884_v20 }
 0x5c6   : > { %6741 = vrot.lane.b32.xlu0 %v7240_v19, %s7385_s6  ;;  %6423 = vrot.lane.b32.xlu1 %v7226_v24, %s7385_s6  ;;  %v11880_v19 = vpack.i.b16 %v11878_v41, %v11879_v14  ;;  %v5258_v24 = vcombine.high %v11882_v35, %v11881_v61  ;;  %v6133_v23 = vsel %vm639_vm0, %v11885_v6, %v10909_v28  ;;  %v11886_v14 = vld [vmem:[#allocation5_spill] sm:$0xff]  ;;  %v11889_v61 = vld [vmem:[#allocation35_spill] sm:$0xff]  ;;  %v11890_v35 = vld [vmem:[#allocation32_spill] sm:$0xff] }
 0x5c7   : > { %v10994_v41 = vrot.slane %v5542_v30, %v7847_v47  ;;  %v6135_v29 = vsel %vm643_vm1, %v6133_v23, %v6082_v42  ;;  %v5699_v28 = vpack.i.b16 %v10964_v33, %v10983_v13  ;;  %v11891_v21 = vpack.i.b16 %v11889_v61, %v11890_v35 }
 0x5c8   : > { %v5131_v16 = vsel %vm639_vm0, %v11880_v19, %v5076_v12  ;;  %v5080_v51 = vpop.permute.xlu0 %5079  ;;  %v10977_v53 = vpop.permute.xlu1 %6105  ;;  %v5292_v12 = vcombine.high %v10786_v25, %v10778_v55  ;;  %v11887_v19 = vld [vmem:[#allocation3_spill] sm:$0xff]  ;;  %v11001_v55 = vrot.slane %v5326_v11, %v7847_v47  ;;  %v6137_v20 = vsel %vm646_vm2, %v6135_v29, %v10895_v54 }
 0x5c9   : > { %v5133_v26 = vsel %vm643_vm1, %v5131_v16, %v5080_v51  ;;  %v5224_v16 = vcombine.high %v11887_v19, %v11886_v14  ;;  %v7235_v51 = vcombine.low %v6674_v9, %v6674_v9  ;;  %v5675_v11 = vpack.i.b16 %v10973_v17, %v10994_v41  ;;  %v11892_v14 = vld [vmem:[#allocation8_spill] sm:$0xff] }
 0x5ca   : > { %6745 = vrot.lane.b32.xlu0 %v7241_v63, %s7381_s27  ;;  %6403 = vrot.lane.b32.xlu1 %v7221_v4, %s7382_s28  ;;  %v11006_v63 = vrot.slane %v5258_v24, %v7847_v47  ;;  %v7231_v4 = vcombine.low %v6389_v15, %v6389_v15  ;;  %v11019_v9 = vrot.slane %v5292_v12, %v7847_v47 }
 0x5cb   : > { %v11025_v24 = vrot.slane %v5224_v16, %v7847_v47  ;;  %v7193_v23 = vcombine.low %v5699_v28, %v5699_v28  ;;  %v11034_v12 = vcombine.high %v11892_v14, %v11723_v62  ;;  %v6139_v54 = vsel %vm649_vm4, %v6137_v20, %v10859_v7 }
 0x5cc   : > { %v5104_v25 = vpop.permute.xlu0 %5103  ;;  %v11008_v30 = vpop.permute.xlu1 %6121  ;;  %v5381_v15 = vpack.i.b16 %v11001_v55, %v11019_v9  ;;  %v7186_v29 = vcombine.low %v5675_v11, %v5675_v11  ;;  %v6378_v16 = vshrl.u32 %v10883_v48, 16  ;;  %v6379_v28 = vshrl.u32 %v10891_v0, 16 }
 0x5cd   : > { %11888 = vst [vmem:[#allocation14_spill] sm:$0xff] %v11008_v30  ;;  %v11014_v42 = vsel %vm639_vm0, %v11891_v21, %v5104_v25  ;;  %v5357_v47 = vpack.i.b16 %v11006_v63, %v11025_v24  ;;  %v11894_v25 = vld [vmem:[#allocation34_spill] sm:$0xff]  ;;  %v6390_v7 = vshrl.u32 %v10951_v3, 16  ;;  %v6141_v61 = vsel %vm652_vm6, %v6139_v54, %v10869_v49 }
 0x5ce   : > { %6721 = vrot.lane.b32.xlu0 %v7235_v51, %s7382_s28  ;;  %6443 = vrot.lane.b32.xlu1 %v7231_v4, %s7386_s7  ;;  %v11046_v51 = vcombine.high %v11894_v25, %v11723_v62  ;;  %v7179_v21 = vcombine.low %v5381_v15, %v5381_v15  ;;  %v5359_v4 = vshrl.u32 %v11006_v63, 16  ;;  %v6143_v11 = vsel %vm655_vm8, %v6141_v61, %v10947_v58 }
 0x5cf   : > { %v6380_v0 = vpack.i.b16 %v6379_v28, %v6378_v16  ;;  %v5358_v49 = vshrl.u32 %v11025_v24, 16  ;;  %v6391_v15 = vshrl.u32 %v10961_v22, 16  ;;  %v5689_v58 = vshrl.u32 %v10744_v60, 16 }
 0x5d0   : > { %v11028_v6 = vpop.permute.xlu0 %5123  ;;  %v11038_v19 = vpop.permute.xlu1 %6125  ;;  %v5669_v48 = vpack.i.b16 %v11034_v12, %v11046_v51  ;;  %v6697_v16 = vshrl.u32 %v10930_v8, 16  ;;  %v5688_v28 = vshrl.u32 %v10749_v44, 16 }
 0x5d1   : > { %11893 = vst [vmem:[#allocation42_spill] sm:$0xff] %v11038_v19  ;;  %v5360_v30 = vpack.i.b16 %v5359_v4, %v5358_v49  ;;  %v11078_v4 = vcombine.high %v10744_v60, %v11723_v62  ;;  %v11097_v49 = vcombine.high %v10816_v36, %v11723_v62  ;;  %v5383_v60 = vshrl.u32 %v11001_v55, 16 }
 0x5d2   : > { %5751 = vrot.lane.b32.xlu0 %v7193_v23, %s7383_s29  ;;  %5723 = vrot.lane.b32.xlu1 %v7186_v29, %s7383_s29  ;;  %v7172_v29 = vcombine.low %v5357_v47, %v5357_v47  ;;  %v7184_v19 = vcombine.low %v5669_v48, %v5669_v48  ;;  %v6392_v47 = vpack.i.b16 %v6391_v15, %v6390_v7 }
 0x5d3   : > { %v5690_v48 = vpack.i.b16 %v5689_v58, %v5688_v28 }
 0x5d4   : > { %v5084_v35 = vpop.permute.xlu0 %5083  ;;  %v6102_v20 = vpop.permute.xlu1 %6101 }
 0x5d5   : > { %v5135_v23 = vsel %vm646_vm2, %v5133_v26, %v5084_v35  ;;  %v11060_v3 = vsel %vm658_vm10, %v6143_v11, %v6102_v20  ;;  %v7228_v26 = vcombine.low %v6380_v0, %v6380_v0  ;;  %v6696_v35 = vshrl.u32 %v10938_v57, 16 }
 0x5d6   : > { %5433 = vrot.lane.b32.xlu0 %v7179_v21, %s7383_s29  ;;  %5405 = vrot.lane.b32.xlu1 %v7172_v29, %s7383_s29  ;;  %v7173_v21 = vcombine.low %v5360_v30, %v5360_v30  ;;  %v5137_v7 = vsel %vm649_vm4, %v5135_v23, %v10907_v32  ;;  %v7232_v11 = vcombine.low %v6392_v47, %v6392_v47  ;;  %v5665_v20 = vshrl.u32 %v11892_v14, 16  ;;  %v11895_v47 = vld [vmem:[#allocation26_spill] sm:$0xff] }
 0x5d7   : > { %v11087_v57 = vcombine.high %v10749_v44, %v11723_v62  ;;  %v5664_v30 = vshrl.u32 %v11894_v25, 16  ;;  %v7190_v32 = vcombine.low %v5690_v48, %v5690_v48  ;;  %v11896_v48 = vld [vmem:[#allocation21_spill] sm:$0xff] }
 0x5d8   : > { %v5100_v54 = vpop.permute.xlu0 %5099  ;;  %v11067_v61 = vpop.permute.xlu1 %5115 }
 0x5d9   : > { %v5693_v23 = vpack.i.b16 %v11078_v4, %v11087_v57 }
 0x5da   : > { %5715 = vrot.lane.b32.xlu0 %v7184_v19, %s7381_s27  ;;  %6431 = vrot.lane.b32.xlu1 %v7228_v26, %s7382_s28  ;;  %v6698_v19 = vpack.i.b16 %v6697_v16, %v6696_v35  ;;  %v5666_v26 = vpack.i.b16 %v5665_v20, %v5664_v30  ;;  %v5347_v16 = vshrl.u32 %v11895_v47, 16  ;;  %v11104_v35 = vcombine.high %v10825_v34, %v11723_v62 }
 0x5db   : > { %v5701_v20 = vshrl.u32 %v10964_v33, 16 }
 0x5dc   : > { %v11074_v22 = vpop.permute.xlu0 %5127  ;;  %v5092_v8 = vpop.permute.xlu1 %5091  ;;  %v7242_v58 = vcombine.low %v6698_v19, %v6698_v19  ;;  %v5375_v19 = vpack.i.b16 %v11097_v49, %v11104_v35  ;;  %v7183_v30 = vcombine.low %v5666_v26, %v5666_v26 }
 0x5dd   : > { %v5139_v29 = vsel %vm652_vm6, %v5137_v7, %v5092_v8  ;;  %v5346_v7 = vshrl.u32 %v11896_v48, 16 }
 0x5de   : > { %5409 = vrot.lane.b32.xlu0 %v7173_v21, %s7384_s30  ;;  %6447 = vrot.lane.b32.xlu1 %v7232_v11, %s7387_s8  ;;  %v7191_v11 = vcombine.low %v5693_v23, %v5693_v23  ;;  %v11127_v23 = vcombine.high %v11896_v48, %v11723_v62  ;;  %v7177_v26 = vcombine.low %v5375_v19, %v5375_v19  ;;  %v5676_v19 = vshrl.u32 %v10994_v41, 16 }
 0x5e0   : > { %v11091_v0 = vpop.permute.xlu0 %4311  ;;  %v5096_v15 = vpop.permute.xlu1 %5095 }
 0x5e1   : > { %v5141_v28 = vsel %vm655_vm8, %v5139_v29, %v5096_v15  ;;  %v11118_v15 = vcombine.high %v11895_v47, %v11723_v62 }
 0x5e2   : > { %5739 = vrot.lane.b32.xlu0 %v7190_v32, %s7385_s6  ;;  %v11107_v21 = vsel %vm658_vm10, %v5141_v28, %v5100_v54  ;;  %6749 = vrot.lane.b32.xlu1 %v7242_v58, %s7382_s28  ;;  %v5348_v32 = vpack.i.b16 %v5347_v16, %v5346_v7  ;;  %v5700_v58 = vshrl.u32 %v10983_v13, 16  ;;  %v11133_v7 = vcombine.high %v10964_v33, %v11723_v62 }
 0x5e4   : > { %v11111_v8 = vpop.permute.xlu0 %4629  ;;  %v5108_v29 = vpop.permute.xlu1 %5107  ;;  %v5702_v16 = vpack.i.b16 %v5701_v20, %v5700_v58 }
 0x5e5   : > { %v5148_v54 = vsel %vm643_vm1, %v11014_v42, %v5108_v29  ;;  %v7169_v42 = vcombine.low %v5348_v32, %v5348_v32  ;;  %v5677_v29 = vshrl.u32 %v10973_v17, 16  ;;  %v5592_v32 = vcombine.high %v10973_v17, %v11723_v62 }
 0x5e6   : > { %5743 = vrot.lane.b32.xlu0 %v7191_v11, %s7381_s27  ;;  %5711 = vrot.lane.b32.xlu1 %v7183_v30, %s7385_s6  ;;  %v5351_v11 = vpack.i.b16 %v11118_v15, %v11127_v23  ;;  %v5626_v30 = vcombine.high %v10983_v13, %v11723_v62  ;;  %v7194_v33 = vcombine.low %v5702_v16, %v5702_v16 }
 0x5e7   : > { %v5558_v13 = vcombine.high %v10994_v41, %v11723_v62 }
 0x5e8   : > { %v11129_v28 = vpop.permute.xlu0 %4271  ;;  %v5120_v44 = vpop.permute.xlu1 %5119  ;;  %v5705_v58 = vpack.i.b16 %v11133_v7, %v5626_v30  ;;  %v7170_v47 = vcombine.low %v5351_v11, %v5351_v11 }
 0x5ea   : > { %5425 = vrot.lane.b32.xlu0 %v7177_v26, %s7381_s27  ;;  %5393 = vrot.lane.b32.xlu1 %v7169_v42, %s7385_s6  ;;  %v5678_v26 = vpack.i.b16 %v5677_v29, %v5676_v19  ;;  %v5382_v42 = vshrl.u32 %v11019_v9, 16  ;;  %v7195_v11 = vcombine.low %v5705_v58, %v5705_v58  ;;  %v5683_v19 = vshrl.u32 %v5592_v32, 16 }
 0x5eb   : > { %v5377_v58 = vshrl.u32 %v11097_v49, 16 }
 0x5ec   : > { %v11143_v20 = vpop.permute.xlu0 %4287  ;;  %v5112_v48 = vpop.permute.xlu1 %5111  ;;  %v5384_v29 = vpack.i.b16 %v5383_v60, %v5382_v42  ;;  %v7187_v41 = vcombine.low %v5678_v26, %v5678_v26  ;;  %v11174_v60 = vcombine.high %v11025_v24, %v11723_v62  ;;  %v5376_v42 = vshrl.u32 %v11104_v35, 16 }
 0x5ed   : > { %v5150_v25 = vsel %vm646_vm2, %v5148_v54, %v5112_v48  ;;  %v5370_v24 = vshrl.u32 %v10825_v34, 16  ;;  %v5308_v35 = vcombine.high %v11019_v9, %v11723_v62 }
 0x5ee   : > { %5755 = vrot.lane.b32.xlu0 %v7194_v33, %s7384_s30  ;;  %v5152_v16 = vsel %vm649_vm4, %v5150_v25, %v11067_v61  ;;  %5397 = vrot.lane.b32.xlu1 %v7170_v47, %s7381_s27  ;;  %v5681_v33 = vpack.i.b16 %v5592_v32, %v5558_v13  ;;  %v11168_v25 = vcombine.high %v11006_v63, %v11723_v62 }
 0x5ef   : > { %v5154_v17 = vsel %vm652_vm6, %v5152_v16, %v5120_v44  ;;  %v5682_v44 = vshrl.u32 %v5558_v13, 16  ;;  %v5371_v13 = vshrl.u32 %v10816_v36, 16  ;;  %v5378_v49 = vpack.i.b16 %v5377_v58, %v5376_v42 }
 0x5f0   : > { %v11158_v14 = vpop.permute.xlu0 %4589  ;;  %v11162_v48 = vsel %vm655_vm8, %v5154_v17, %v11028_v6  ;;  %v11164_v54 = vpop.permute.xlu1 %4283  ;;  %v7180_v6 = vcombine.low %v5384_v29, %v5384_v29  ;;  %v7188_v26 = vcombine.low %v5681_v33, %v5681_v33  ;;  %v5363_v63 = vpack.i.b16 %v11168_v25, %v11174_v60 }
 0x5f1   : > { %v5684_v47 = vpack.i.b16 %v5683_v19, %v5682_v44  ;;  %v5707_v29 = vshrl.u32 %v11133_v7, 16  ;;  %v5372_v33 = vpack.i.b16 %v5371_v13, %v5370_v24  ;;  %v5706_v44 = vshrl.u32 %v5626_v30, 16 }
 0x5f2   : > { %5759 = vrot.lane.b32.xlu0 %v7195_v11, %s7386_s7  ;;  %5727 = vrot.lane.b32.xlu1 %v7187_v41, %s7384_s30  ;;  %v5342_v11 = vcombine.high %v11001_v55, %v11723_v62  ;;  %v7174_v41 = vcombine.low %v5363_v63, %v5363_v63  ;;  %v5671_v55 = vshrl.u32 %v11034_v12, 16  ;;  %v7178_v63 = vcombine.low %v5378_v49, %v5378_v49 }
 0x5f3   : > { %v7189_v17 = vcombine.low %v5684_v47, %v5684_v47  ;;  %v5708_v13 = vpack.i.b16 %v5707_v29, %v5706_v44  ;;  %v7176_v9 = vcombine.low %v5372_v33, %v5372_v33  ;;  %v5670_v24 = vshrl.u32 %v11046_v51, 16  ;;  %v11900_v51 = vld [vmem:[#allocation7_spill] sm:$0xff] }
 0x5f4   : > { %v11176_v61 = vpop.permute.xlu0 %4593  ;;  %v11179_v32 = vpop.permute.xlu1 %4601  ;;  %v5389_v42 = vshrl.u32 %v5342_v11, 16  ;;  %v5387_v30 = vpack.i.b16 %v5342_v11, %v5308_v35  ;;  %v5353_v11 = vshrl.u32 %v11118_v15, 16 }
 0x5f6   : > { %5437 = vrot.lane.b32.xlu0 %v7180_v6, %s7384_s30  ;;  %5731 = vrot.lane.b32.xlu1 %v7188_v26, %s7386_s7  ;;  %v11897_v6 = vld [vmem:[#allocation17_spill] sm:$0xff]  ;;  %v11898_v26 = vld [vmem:[#allocation22_spill] sm:$0xff] }
 0x5f7   : > { %v11899_v34 = vpack.i.b16 %v11897_v6, %v11898_v26  ;;  %v5352_v6 = vshrl.u32 %v11127_v23, 16 }
 0x5f8   : > { %v11188_v16 = vpop.permute.xlu0 %4605  ;;  %v4276_v19 = vpop.permute.xlu1 %4275 }
 0x5f9   : > { %v3993_v47 = vsel %vm639_vm0, %v11899_v34, %v10746_v10  ;;  %v5388_v10 = vshrl.u32 %v5308_v35, 16 }
 0x5fa   : > { %5735 = vrot.lane.b32.xlu0 %v7189_v17, %s7387_s8  ;;  %5413 = vrot.lane.b32.xlu1 %v7174_v41, %s7386_s7  ;;  %v3995_v7 = vsel %vm643_vm1, %v3993_v47, %v10827_v56  ;;  %v7196_v56 = vcombine.low %v5708_v13, %v5708_v13  ;;  %v5672_v17 = vpack.i.b16 %v5671_v55, %v5670_v24  ;;  %v11903_v24 = vld [vmem:[#allocation41_spill] sm:$0xff] }
 0x5fb   : > { %v3997_v34 = vsel %vm646_vm2, %v3995_v7, %v10818_v1  ;;  %v5390_v49 = vpack.i.b16 %v5389_v42, %v5388_v10  ;;  %v7181_v41 = vcombine.low %v5387_v30, %v5387_v30  ;;  %v11901_v1 = vld [vmem:[#allocation6_spill] sm:$0xff]  ;;  %v5354_v13 = vpack.i.b16 %v5353_v11, %v5352_v6  ;;  %v6838_v6 = vld [vmem:[%s11486_s4] sm:$0xff] }
 0x5fc   : > { %v11205_v58 = vpop.permute.xlu0 %4303  ;;  %v4292_v62 = vpop.permute.xlu1 %4291  ;;  %v3999_v33 = vsel %vm649_vm4, %v3997_v34, %v10803_v40  ;;  %v11902_v35 = vpack.i.b16 %v11900_v51, %v11901_v1  ;;  %v7185_v55 = vcombine.low %v5672_v17, %v5672_v17  ;;  %v5365_v42 = vshrl.u32 %v11168_v25, 16 }
 0x5fd   : > { %v7182_v15 = vcombine.low %v5390_v49, %v5390_v49  ;;  %v4001_v40 = vsel %vm652_vm6, %v3999_v33, %v10759_v45  ;;  %v7237_v25 = vcombine.low %v11903_v24, %v11903_v24  ;;  %v7171_v34 = vcombine.low %v5354_v13, %v5354_v13  ;;  %v11904_v49 = vld [vmem:[#allocation31_spill] sm:$0xff]  ;;  %v11908_v13 = vld [vmem:[#allocation33_spill] sm:$0xff] }
 0x5fe   : > { %5429 = vrot.lane.b32.xlu0 %v7178_v63, %s7382_s28  ;;  %5421 = vrot.lane.b32.xlu1 %v7176_v9, %s7385_s6  ;;  %v4327_v44 = vsel %vm639_vm0, %v11902_v35, %v11129_v28  ;;  %v4003_v45 = vsel %vm655_vm8, %v4001_v40, %v10851_v50  ;;  %v5695_v17 = vshrl.u32 %v11078_v4, 16 }
 0x5ff   : > { %v4329_v26 = vsel %vm643_vm1, %v4327_v44, %v4276_v19  ;;  %v5364_v19 = vshrl.u32 %v11174_v60, 16  ;;  %v4005_v50 = vsel %vm658_vm10, %v4003_v45, %v10847_v18  ;;  %v5694_v60 = vshrl.u32 %v11087_v57, 16  ;;  %v11906_v18 = vld [vmem:[#allocation20_spill] sm:$0xff] }
 0x600   : > { %v11212_v12 = vpop.permute.xlu0 %4633  ;;  %v11214_v29 = vpop.permute.xlu1 %4609  ;;  %v7239_v35 = vcombine.low %v11906_v18, %v11906_v18 }
 0x601   : > { %v5696_v4 = vpack.i.b16 %v5695_v17, %v5694_v60  ;;  %v11915_v17 = vld [vmem:[#allocation18_spill] sm:$0xff] }
 0x602   : > { %5763 = vrot.lane.b32.xlu0 %v7196_v56, %s7387_s8  ;;  %5441 = vrot.lane.b32.xlu1 %v7181_v41, %s7386_s7  ;;  %v5366_v56 = vpack.i.b16 %v5365_v42, %v5364_v19  ;;  %v7238_v41 = vcombine.low %v11904_v49, %v11904_v49  ;;  %v7244_v42 = vcombine.low %v11908_v13, %v11908_v13 }
 0x603   : > { %v7192_v44 = vcombine.low %v5696_v4, %v5696_v4  ;;  %v11916_v4 = vld [vmem:[#allocation13_spill] sm:$0xff] }
 0x604   : > { %v4280_v47 = vpop.permute.xlu0 %4279  ;;  %v11230_v7 = vpop.permute.xlu1 %4299  ;;  %v7175_v51 = vcombine.low %v5366_v56, %v5366_v56  ;;  %v7246_v18 = vcombine.low %v11916_v4, %v11916_v4 }
 0x605   : > { %v4331_v63 = vsel %vm646_vm2, %v4329_v26, %v4280_v47 }
 0x606   : > { %v4333_v28 = vsel %vm649_vm4, %v4331_v63, %v11164_v54  ;;  %5445 = vrot.lane.b32.xlu0 %v7182_v15, %s7387_s8  ;;  %5719 = vrot.lane.b32.xlu1 %v7185_v55, %s7382_s28  ;;  %v11907_v55 = vld [vmem:[#allocation12_spill] sm:$0xff] }
 0x607   : > { %v4335_v23 = vsel %vm652_vm6, %v4333_v28, %v11143_v20  ;;  %v7243_v15 = vcombine.low %v11907_v55, %v11907_v55  ;;  %v11909_v28 = vld [vmem:[#allocation30_spill] sm:$0xff]  ;;  %v11919_v55 = vld [vmem:[#allocation36_spill] sm:$0xff] }
 0x608   : > { %v4296_v9 = vpop.permute.xlu0 %4295  ;;  %v4337_v30 = vsel %vm655_vm8, %v4335_v23, %v4292_v62  ;;  %v11246_v10 = vpop.permute.xlu1 %4315  ;;  %v11910_v23 = vld [vmem:[#allocation27_spill] sm:$0xff] }
 0x609   : > { %v4339_v54 = vsel %vm658_vm10, %v4337_v30, %v4296_v9  ;;  %v11911_v19 = vpack.i.b16 %v11909_v28, %v11910_v23  ;;  %v11912_v9 = vld [vmem:[#allocation16_spill] sm:$0xff]  ;;  %v11913_v30 = vld [vmem:[#allocation11_spill] sm:$0xff]  ;;  %v11923_v23 = vld [vmem:[#allocation9_spill] sm:$0xff] }
 0x60a   : > { %v6799_v20 = vrot.slane %v4339_v54, 4  ;;  %6729 = vrot.lane.b32.xlu0 %v7237_v25, %s7384_s30  ;;  %5401 = vrot.lane.b32.xlu1 %v7171_v34, %s7382_s28  ;;  %v11914_v24 = vpack.i.b16 %v11912_v9, %v11913_v30 }
 0x60b   : > { %v4008_v45 = vsel %vm639_vm0, %v11911_v19, %v10863_v31 }
 0x60c   : > { %v4614_v62 = vpop.permute.xlu0 %4613  ;;  %v11258_v11 = vsel %vm11905_vm3, %v4005_v50, %v6799_v20  ;;  %v4320_v33 = vpop.permute.xlu1 %4319  ;;  %v4645_v25 = vsel %vm639_vm0, %v11914_v24, %v11158_v14  ;;  %v7245_v20 = vcombine.low %v11915_v17, %v11915_v17  ;;  %v4010_v60 = vsel %vm643_vm1, %v4008_v45, %v10771_v52 }
 0x60d   : > { %v4647_v34 = vsel %vm643_vm1, %v4645_v25, %v11176_v61  ;;  %v4012_v14 = vsel %vm646_vm2, %v4010_v60, %v10885_v39  ;;  %v11924_v25 = vld [vmem:[#allocation47_spill] sm:$0xff]  ;;  %v11927_v60 = vld [vmem:[#allocation44_spill] sm:$0xff] }
 0x60e   : > { %6733 = vrot.lane.b32.xlu0 %v7238_v41, %s7386_s7  ;;  %5417 = vrot.lane.b32.xlu1 %v7175_v51, %s7387_s8  ;;  %v6803_v41 = vrot.slane %v11107_v21, 4 }
 0x610   : > { %v11262_v1 = vpop.permute.xlu0 %6725  ;;  %v4618_v57 = vpop.permute.xlu1 %4617 }
 0x612   : > { %6737 = vrot.lane.b32.xlu0 %v7239_v35, %s7387_s8  ;;  %5747 = vrot.lane.b32.xlu1 %v7192_v44, %s7382_s28 }
 0x614   : > { %v4324_v26 = vpop.permute.xlu0 %4323  ;;  %v4622_v47 = vpop.permute.xlu1 %4621 }
 0x616   : > { %6841 = vperm.xlu0 %7362, %v6838_v6   ;;  %6753 = vrot.lane.b32.xlu1 %v7243_v15, %s7383_s29 }
 0x618   : > { %v4642_v40 = vpop.permute.xlu0 %4641  ;;  %v4638_v63 = vpop.permute.xlu1 %4637 }
 0x61a   : > { %6757 = vrot.lane.b32.xlu1 %v7244_v42, %s7384_s30 }
 0x61c   : > { %v6400_v54 = vpop.permute.xlu0 %6399  ;;  %v4598_v56 = vpop.permute.xlu1 %4597 }
 0x61d   : > { %v4649_v50 = vsel %vm646_vm2, %v4647_v34, %v4598_v56 }
 0x61e   : > { %v4651_v31 = vsel %vm649_vm4, %v4649_v50, %v11179_v32  ;;  %6761 = vrot.lane.b32.xlu1 %v7245_v20, %s7386_s7  ;;  %v11917_v32 = vpack.i.b16 %v11860_v37, %v11862_v27  ;;  %v11926_v50 = vld [vmem:[#allocation37_spill] sm:$0xff] }
 0x61f   : > { %v4653_v61 = vsel %vm652_vm6, %v4651_v31, %v11188_v16  ;;  %v4014_v16 = vsel %vm649_vm4, %v4012_v14, %v10733_v38 }
 0x620   : > { %v11301_v49 = vpop.permute.xlu0 %6435  ;;  %v6408_v51 = vpop.permute.xlu1 %6407  ;;  %v4655_v52 = vsel %vm655_vm8, %v4653_v61, %v11214_v29  ;;  %v4342_v39 = vsel %vm639_vm0, %v11917_v32, %v11230_v7  ;;  %v4016_v15 = vsel %vm652_vm6, %v4014_v16, %v11919_v55  ;;  %v11920_v7 = vld [vmem:[#allocation10_spill] sm:$0xff] }
 0x621   : > { %v4657_v35 = vsel %vm658_vm10, %v4655_v52, %v4614_v62  ;;  %v4344_v6 = vsel %vm643_vm1, %v4342_v39, %v11205_v58  ;;  %v11921_v62 = vld [vmem:[#allocation45_spill] sm:$0xff]  ;;  %v4018_v58 = vsel %vm655_vm8, %v4016_v15, %v11923_v23  ;;  %v11936_v23 = vld [vmem:[#allocation28_spill] sm:$0xff] }
 0x622   : > { %6765 = vrot.lane.b32.xlu1 %v7246_v18, %s7387_s8  ;;  %v6820_v21 = vsel %vm11918_vm5, %v4657_v35, %v6803_v41  ;;  %v11922_v38 = vpack.i.b16 %v11920_v7, %v11921_v62  ;;  %v4020_v34 = vsel %vm658_vm10, %v4018_v58, %v11924_v25  ;;  %v11933_v35 = vld [vmem:[#allocation15_spill] sm:$0xff] }
 0x623   : > { %v11934_v16 = vpack.i.b16 %v10434_v59, %v11933_v35 }
 0x624   : > { %v6412_v44 = vpop.permute.xlu0 %6411  ;;  %v4308_v29 = vpop.permute.xlu1 %4307  ;;  %v4660_v13 = vsel %vm639_vm0, %v11922_v38, %v4618_v57  ;;  %v5158_v57 = vsel %vm658_vm10, %v11162_v48, %v11074_v22  ;;  %v11928_v22 = vpack.i.b16 %v11926_v50, %v11927_v60 }
 0x625   : > { %v4346_v37 = vsel %vm646_vm2, %v4344_v6, %v4308_v29  ;;  %v4662_v19 = vsel %vm643_vm1, %v4660_v13, %v4622_v47  ;;  %v6804_v20 = vrot.slane %v5158_v57, 4 }
 0x626   : > { %v4348_v27 = vsel %vm649_vm4, %v4346_v37, %v11091_v0 }
 0x627   : > { %v4350_v42 = vsel %vm652_vm6, %v4348_v27, %v11246_v10 }
 0x628   : > { %v6416_v28 = vpop.permute.xlu0 %6415  ;;  %v4626_v45 = vpop.permute.xlu1 %4625  ;;  %v4352_v9 = vsel %vm655_vm8, %v4350_v42, %v4320_v33  ;;  %v11935_v42 = vld [vmem:[#allocation43_spill] sm:$0xff] }
 0x629   : > { %v4664_v30 = vsel %vm646_vm2, %v4662_v19, %v4626_v45  ;;  %v4354_v0 = vsel %vm658_vm10, %v4352_v9, %v4324_v26  ;;  %v11937_v58 = vpack.i.b16 %v11935_v42, %v11936_v23  ;;  %v11939_v45 = vld [vmem:[#allocation40_spill] sm:$0xff]  ;;  %v11951_v42 = vld [vmem:[#allocation46_spill] sm:$0xff] }
 0x62a   : > { %v4666_v10 = vsel %vm649_vm4, %v4664_v30, %v11111_v8  ;;  %v6800_v24 = vrot.slane %v4354_v0, 4  ;;  %v11940_v0 = vld [vmem:[#allocation48_spill] sm:$0xff]  ;;  %v11952_v23 = vpack.i.b16 %v10816_v36, %v11951_v42 }
 0x62b   : > { %v4668_v47 = vsel %vm652_vm6, %v4666_v10, %v11212_v12 }
 0x62c   : > { %v6428_v56 = vpop.permute.xlu0 %6427  ;;  %v6396_v33 = vpop.permute.xlu1 %6395  ;;  %v6817_v17 = vsel %vm11925_vm7, %v4020_v34, %v6800_v24  ;;  %v4670_v26 = vsel %vm655_vm8, %v4668_v47, %v4638_v63  ;;  %v11930_v63 = vld [vmem:[#allocation29_spill] sm:$0xff] }
 0x62d   : > { %v6451_v48 = vsel %vm639_vm0, %v11928_v22, %v6396_v33  ;;  %6852 = vmatprep.subr.bf16.mxu1 %v6817_v17  ;;  %v4672_v8 = vsel %vm658_vm10, %v4670_v26, %v4642_v40  ;;  %v11931_v41 = vpack.i.b16 %v10346_v5, %v11930_v63  ;;  %v11942_v17 = vld [vmem:[#allocation42_spill] sm:$0xff] }
 0x62e   : > { %6853 = vmatpush1.bf16.msra.mxu1 %v11258_v11  ;;  %v6823_v31 = vsel %vm11929_vm9, %v4672_v8, %v6804_v20  ;;  %v6453_v12 = vsel %vm643_vm1, %v6451_v48, %v6400_v54  ;;  %v11932_v11 = vpack.i.b16 %v10526_v46, %v10542_v2  ;;  %v11943_v48 = vld [vmem:[#allocation49_spill] sm:$0xff] }
 0x62f   : > { %6854 = vmatprep.subr.bf16.mxu1 %v6823_v31 }
 0x630   : > { %v6440_v14 = vpop.permute.xlu0 %6439  ;;  %v6714_v61 = vpop.permute.xlu1 %6713 }
 0x631   : > { %v6769_v4 = vsel %vm639_vm0, %v11931_v41, %v6714_v61 }
 0x632   : > { %6855 = vmatpush1.bf16.msra.mxu1 %v6820_v21 }
 0x634   : > { %v6420_v18 = vpop.permute.xlu0 %6419  ;;  %v6718_v52 = vpop.permute.xlu1 %6717 }
 0x635   : > { %v6771_v32 = vsel %vm643_vm1, %v6769_v4, %v6718_v52 }
 0x638   : > { %v6742_v40 = vpop.permute.xlu0 %6741  ;;  %v6424_v39 = vpop.permute.xlu1 %6423 }
 0x639   : > { %v6784_v54 = vsel %vm639_vm0, %v11932_v11, %v6742_v40  ;;  %v6466_v6 = vsel %vm639_vm0, %v11934_v16, %v6424_v39 }
 0x63a   : > { %v6468_v5 = vsel %vm643_vm1, %v6466_v6, %v6428_v56  ;;  %v11945_v6 = vld [vmem:[#allocation8_spill] sm:$0xff] }
 0x63c   : > { %v6746_v29 = vpop.permute.xlu0 %6745  ;;  %v6404_v21 = vpop.permute.xlu1 %6403 }
 0x63d   : > { %v11371_v55 = vsel %vm643_vm1, %v6784_v54, %v6746_v29  ;;  %v6455_v15 = vsel %vm646_vm2, %v6453_v12, %v6404_v21 }
 0x63e   : > { %v6457_v37 = vsel %vm649_vm4, %v6455_v15, %v6408_v51  ;;  %v6148_v51 = vsel %vm639_vm0, %v11937_v58, %v10977_v53 }
 0x63f   : > { %v6459_v46 = vsel %vm652_vm6, %v6457_v37, %v6412_v44 }
 0x640   : > { %v6722_v2 = vpop.permute.xlu0 %6721  ;;  %v6461_v27 = vsel %vm655_vm8, %v6459_v46, %v6416_v28  ;;  %v6444_v7 = vpop.permute.xlu1 %6443 }
 0x641   : > { %v6773_v59 = vsel %vm646_vm2, %v6771_v32, %v6722_v2  ;;  %v6463_v38 = vsel %vm658_vm10, %v6461_v27, %v6420_v18 }
 0x642   : > { %v11380_v62 = vsel %vm649_vm4, %v6773_v59, %v11262_v1  ;;  %v6811_v13 = vrot.slane %v6463_v38, 4  ;;  %v6150_v1 = vsel %vm643_vm1, %v6148_v51, %v11939_v45  ;;  %v11949_v59 = vld [vmem:[#allocation21_spill] sm:$0xff] }
 0x643   : > { %v6152_v57 = vsel %vm646_vm2, %v6150_v1, %v11940_v0 }
 0x644   : > { %v11388_v44 = vpop.permute.xlu0 %5751  ;;  %v5724_v19 = vpop.permute.xlu1 %5723  ;;  %v11392_v28 = vsel %vm11938_vm12, %v11060_v3, %v6811_v13  ;;  %v6154_v24 = vsel %vm649_vm4, %v6152_v57, %v10932_v43  ;;  %v11941_v3 = vld [vmem:[#allocation14_spill] sm:$0xff] }
 0x645   : > { %v6156_v47 = vsel %vm652_vm6, %v6154_v24, %v11941_v3 }
 0x646   : > { %v6158_v26 = vsel %vm655_vm8, %v6156_v47, %v11942_v17 }
 0x647   : > { %v6160_v8 = vsel %vm658_vm10, %v6158_v26, %v11943_v48  ;;  %v11954_v26 = vld [vmem:[#allocation23_spill] sm:$0xff] }
 0x648   : > { %v5434_v9 = vpop.permute.xlu0 %5433  ;;  %v5406_v30 = vpop.permute.xlu1 %5405 }
 0x64c   : > { %v5716_v10 = vpop.permute.xlu0 %5715  ;;  %v6432_v53 = vpop.permute.xlu1 %6431 }
 0x64d   : > { %v6470_v25 = vsel %vm646_vm2, %v6468_v5, %v6432_v53  ;;  %v11946_v5 = vld [vmem:[#allocation34_spill] sm:$0xff] }
 0x64e   : > { %v6472_v34 = vsel %vm649_vm4, %v6470_v25, %v11301_v49  ;;  %v11947_v29 = vpack.i.b16 %v11945_v6, %v11946_v5 }
 0x64f   : > { %v6474_v56 = vsel %vm652_vm6, %v6472_v34, %v6440_v14 }
 0x650   : > { %v5410_v33 = vpop.permute.xlu0 %5409  ;;  %v6476_v20 = vsel %vm655_vm8, %v6474_v56, %v6444_v7  ;;  %v6448_v50 = vpop.permute.xlu1 %6447  ;;  %v11948_v7 = vld [vmem:[#allocation26_spill] sm:$0xff] }
 0x651   : > { %v6478_v43 = vsel %vm658_vm10, %v6476_v20, %v6448_v50  ;;  %v11950_v38 = vpack.i.b16 %v11948_v7, %v11949_v59  ;;  %v11955_v20 = vld [vmem:[#allocation19_spill] sm:$0xff] }
 0x652   : > { %v6812_v60 = vrot.slane %v6478_v43, 4  ;;  %v11956_v50 = vpack.i.b16 %v11954_v26, %v11955_v20 }
 0x654   : > { %v5740_v22 = vpop.permute.xlu0 %5739  ;;  %v11412_v49 = vpop.permute.xlu1 %6749  ;;  %v6835_v31 = vsel %vm11944_vm15, %v6160_v8, %v6812_v60 }
 0x655   : > { %v5782_v43 = vsel %vm639_vm0, %v11956_v50, %v5740_v22 }
 0x658   : > { %v5744_v12 = vpop.permute.xlu0 %5743  ;;  %v5712_v14 = vpop.permute.xlu1 %5711 }
 0x659   : > { %v5767_v21 = vsel %vm639_vm0, %v11947_v29, %v5712_v14  ;;  %v5784_v60 = vsel %vm643_vm1, %v5782_v43, %v5744_v12 }
 0x65a   : > { %v5769_v37 = vsel %vm643_vm1, %v5767_v21, %v5716_v10 }
 0x65c   : > { %v5426_v61 = vpop.permute.xlu0 %5425  ;;  %v5394_v63 = vpop.permute.xlu1 %5393 }
 0x65d   : > { %v5449_v13 = vsel %vm639_vm0, %v11950_v38, %v5394_v63 }
 0x660   : > { %v5756_v41 = vpop.permute.xlu0 %5755  ;;  %v5398_v4 = vpop.permute.xlu1 %5397 }
 0x661   : > { %v5451_v45 = vsel %vm643_vm1, %v5449_v13, %v5398_v4 }
 0x664   : > { %v5760_v18 = vpop.permute.xlu0 %5759  ;;  %v5728_v52 = vpop.permute.xlu1 %5727 }
 0x668   : > { %v5438_v32 = vpop.permute.xlu0 %5437  ;;  %v5732_v40 = vpop.permute.xlu1 %5731 }
 0x66c   : > { %v5414_v39 = vpop.permute.xlu1 %5413  ;;  %v5736_v11 = vpop.permute.xlu0 %5735 }
 0x670   : > { %v5422_v54 = vpop.permute.xlu1 %5421  ;;  %v5430_v35 = vpop.permute.xlu0 %5429 }
 0x671   : > { %v5464_v58 = vsel %vm639_vm0, %v11952_v23, %v5422_v54  ;;  %vm11957_vm0 = vmmov %vm11905_vm3 }
 0x672   : > { %v5466_v10 = vsel %vm643_vm1, %v5464_v58, %v5426_v61  ;;  %vm11958_vm1 = vmmov %vm11957_vm0 }
 0x673   : > { %v5468_v47 = vsel %vm646_vm2, %v5466_v10, %v5430_v35 }
 0x674   : > { %v5442_v16 = vpop.permute.xlu1 %5441  ;;  %v5764_v15 = vpop.permute.xlu0 %5763 }
 0x678   : > { %v5720_v46 = vpop.permute.xlu1 %5719  ;;  %v5446_v24 = vpop.permute.xlu0 %5445 }
 0x679   : > { %v5771_v2 = vsel %vm646_vm2, %v5769_v37, %v5720_v46 }
 0x67a   : > { %v5773_v27 = vsel %vm649_vm4, %v5771_v2, %v5724_v19 }
 0x67b   : > { %v5775_v51 = vsel %vm652_vm6, %v5773_v27, %v5728_v52 }
 0x67c   : > { %v5777_v1 = vsel %vm655_vm8, %v5775_v51, %v5732_v40  ;;  %v5402_v0 = vpop.permute.xlu1 %5401 }
 0x67d   : > { %v5453_v57 = vsel %vm646_vm2, %v5451_v45, %v5402_v0  ;;  %v5779_v19 = vsel %vm658_vm10, %v5777_v1, %v5736_v11 }
 0x67e   : > { %v5455_v53 = vsel %vm649_vm4, %v5453_v57, %v5406_v30  ;;  %v6807_v3 = vrot.slane %v5779_v19, 4  ;;  %v5470_v30 = vsel %vm649_vm4, %v5468_v47, %v5434_v9 }
 0x67f   : > { %v5457_v36 = vsel %vm652_vm6, %v5455_v53, %v5410_v33  ;;  %v6730_v33 = vpop.permute.xlu0 %6729  ;;  %v5472_v61 = vsel %vm652_vm6, %v5470_v30, %v5438_v32 }
 0x680   : > { %v5459_v25 = vsel %vm655_vm8, %v5457_v36, %v5414_v39  ;;  %v5418_v34 = vpop.permute.xlu1 %5417  ;;  %v5474_v12 = vsel %vm655_vm8, %v5472_v61, %v5442_v16 }
 0x681   : > { %v5461_v56 = vsel %vm658_vm10, %v5459_v25, %v5418_v34  ;;  %v5476_v39 = vsel %vm658_vm10, %v5474_v12, %v5446_v24 }
 0x682   : > { %v6826_v17 = vsel %vm11953_vm13, %v5461_v56, %v6807_v3 }
 0x683   : > { %v6734_v40 = vpop.permute.xlu0 %6733 }
 0x684   : > { %v5748_v48 = vpop.permute.xlu1 %5747 }
 0x685   : > { %v5786_v8 = vsel %vm646_vm2, %v5784_v60, %v5748_v48 }
 0x686   : > { %v5788_v14 = vsel %vm649_vm4, %v5786_v8, %v11388_v44 }
 0x687   : > { %v5790_v63 = vsel %vm652_vm6, %v5788_v14, %v5756_v41  ;;  %v6738_v44 = vpop.permute.xlu0 %6737  ;;  %v6788_v41 = vsel %vm646_vm2, %v11371_v55, %v11412_v49  ;;  %vm11959_vm2 = vmmov %vm11957_vm0 }
 0x688   : > { %v5792_v4 = vsel %vm655_vm8, %v5790_v63, %v5760_v18  ;;  %v6754_v52 = vpop.permute.xlu1 %6753  ;;  %v6777_v18 = vsel %vm652_vm6, %v11380_v62, %v6730_v33  ;;  %v6837_v62 = vld [vmem:[%s11485_s3] sm:$0xf] }
 0x689   : > { %v5794_v22 = vsel %vm658_vm10, %v5792_v4, %v5764_v15  ;;  %v6779_v35 = vsel %vm655_vm8, %v6777_v18, %v6734_v40  ;;  %v6790_v16 = vsel %vm649_vm4, %v6788_v41, %v6754_v52  ;;  %vm6844_vm4 = vcmask 588800  }
 0x68a   : > { %v6808_v9 = vrot.slane %v5794_v22, 4  ;;  %v6781_v6 = vsel %vm658_vm10, %v6779_v35, %v6738_v44 }
 0x68b   : > { %v6848_v55 = vsel %vm11959_vm2, %v6781_v6, 0 }
 0x68c   : > { %v6758_v11 = vpop.permute.xlu1 %6757  ;;  %v6829_v54 = vsel %vm11957_vm0, %v5476_v39, %v6808_v9 }
 0x68d   : > { %6856 = vmatprep.subr.bf16.mxu1 %v6829_v54 }
 0x68e   : > { %6857 = vmatpush1.bf16.msra.mxu1 %v6826_v17 }
 0x68f   : > { %6858 = vmatprep.subr.bf16.mxu1 %v6835_v31  ;;  %v6792_v31 = vsel %vm652_vm6, %v6790_v16, %v6758_v11 }
 0x690   : > { %v6762_v32 = vpop.permute.xlu1 %6761 }
 0x691   : > { %v6794_v5 = vsel %vm655_vm8, %v6792_v31, %v6762_v32 }
 0x692   : > { %6859 = vmatpush1.bf16.msra.mxu1 %v11392_v28 }
 0x694   : > { %v6766_v29 = vpop.permute.xlu1 %6765 }
 0x695   : > { %v6796_v21 = vsel %vm658_vm10, %v6794_v5, %v6766_v29  ;;  %v6842_v28 = vpop.permute.xlu0 %6841 }
 0x696   : > { %7247 = vmatprep.subr.msk.bf16.mxu1 %vm11958_vm1, %v6796_v21 }
 0x697   : > { %6861 = vmatpush1.bf16.msra.mxu1 %v6848_v55 }
 0x69a   : > { %7248 = vmatmul.mubr.msk.bf16.vlgmr.msra.gmra.mrb[0].mxu1 %vm6844_vm4, %v6837_v62 }
 0x76d   : > { %v6886_v49 = vpop.f32.mrb[0].mxu1 }
 0x76e   : > { %v6887_v15 = vadd.f32 %v6886_v49, %v6842_v28  ;;  %v6888_v37 = vpop.f32.mrb[1].mxu1 }
 0x76f   : > { %v6889_v46 = vadd.f32 %v6888_v37, %v6842_v28  ;;  %v6890_v2 = vpop.f32.mrb[2].mxu1 }
 0x770   : > { %vm6893_vm6 = vcmp.gt.f32.partialorder %v6887_v15, 0.0  ;;  %v6895_v27 = vmul.f32 0.01, %v6887_v15  ;;  %v6891_v7 = vpop.f32.mrb[3].mxu1 }
 0x771   : > { %vm6894_vm8 = vcmp.gt.f32.partialorder %v6889_v46, 0.0  ;;  %v6896_v59 = vmul.f32 0.01, %v6889_v46 }
 0x772   : > { %v6897_v38 = vsel %vm6893_vm6, %v6887_v15, %v6895_v27 }
 0x773   : > { %6899 = vst [vmem:[%s224_s22] sm:$0xff] %v6897_v38  ;;  %v6898_v13 = vsel %vm6894_vm8, %v6889_v46, %v6896_v59 }
 0x774   : > { %6900 = vst [vmem:[%s224_s22 + $0x8] sm:$0xff] %v6898_v13 }
 0x775 PF: > { %s15_s18 = sadd.s32 1, %s7373_s18  }
 0x776   : > { %p12_p4 = scmp.ge.s32.totalorder %s15_s18, 4  }
 0x778   :  { %14 = sbr.rel (!%p12_p4) target bundleno = 1 (0x1), region = 70 }

</bundles_post_ra>
